<compile_context>
chip_gen: v7x
topology: tpu7x:2x2x1
jax: 0.10.0
libtpu: 0.0.40
codegen_flags: <defaults>
</compile_context>

<pallas_src>
import functools

import jax
import jax.numpy as jnp
from jax import lax
from jax.experimental import pallas as pl
from jax.experimental.pallas import tpu as pltpu

_TILE_M = 1024   # rows (B*H*W) per grid step; v5e/v6e can go 2048, keep <=1024 on v7x
_LANES = 128


def _round_up(x, m):
    return ((x + m - 1) // m) * m


# ----------------------------------------------------------------------------
# Fused kernel: teacher + student stacks interleaved + running SSE, per row tile
# ----------------------------------------------------------------------------
def _fused_distill_kernel(x_ref, w_in_ref, w_mid_t_ref, w_mid_s_ref,
                          w_last_t_ref, w_last_s_ref, b_ref,
                          out_ref, loss_ref, *, n_valid_rows, tile_m, hp, c_out):
    bf16 = jnp.bfloat16
    b_all = b_ref[...]                                   # (8, 2*hp) f32
    x = x_ref[...]                                       # (tile_m, 2C) f32

    # NOTE: padded hidden lanes stay exactly zero because weight/bias padding is
    # zero and relu(0 + 0) == 0, so they never leak into the SSE loss or s_out.

    # Layer 1, teacher+student fused along N: x @ [w1_t | w1_s]  (K = 2C, f32).
    h1 = jnp.dot(x, w_in_ref[...], preferred_element_type=jnp.float32) + b_all[0:1]
    h1 = jnp.maximum(h1, 0.0)
    tf1, sf1 = h1[:, :hp], h1[:, hp:]
    d = sf1 - tf1
    dd = d * d                                            # running SSE accumulator (f32)

    # Layers 2+3 (per net, fused along N): f1 @ [w2 | w3], bf16 operands.
    ht = jnp.maximum(
        jnp.dot(tf1.astype(bf16), w_mid_t_ref[...],
                preferred_element_type=jnp.float32) + b_all[1:2], 0.0)
    hs = jnp.maximum(
        jnp.dot(sf1.astype(bf16), w_mid_s_ref[...],
                preferred_element_type=jnp.float32) + b_all[2:3], 0.0)
    tf2, tg1 = ht[:, :hp], ht[:, hp:]
    sf2, sg1 = hs[:, :hp], hs[:, hp:]
    d = sf2 - tf2
    dd += d * d
    d = sg1 - tg1
    dd += d * d

    # Layer 4 teacher only (teacher output projection is discarded -> skipped).
    tg2 = jnp.maximum(
        jnp.dot(tf2.astype(bf16), w_last_t_ref[...],
                preferred_element_type=jnp.float32) + b_all[3:4, :hp], 0.0)
    # Student layer 4 + output head fused along N: sf2 @ [wo_s | w4_s].
    hl = jnp.dot(sf2.astype(bf16), w_last_s_ref[...],
                 preferred_element_type=jnp.float32) + b_all[4:5]
    s_out = hl[:, :c_out]                                 # no relu on the output head
    sg2 = jnp.maximum(hl[:, hp:], 0.0)
    d = sg2 - tg2
    dd += d * d

    out_ref[...] = s_out                                  # (tile_m, c_out) real channels only

    def partial_sum(v):
        # Lane/sublane-dense per-tile partial sum; final scalar reduce in wrapper.
        return v.reshape(tile_m // 8, 8, hp).sum(axis=0)[None]

    if n_valid_rows % tile_m == 0:
        # All tiles fully valid: no row mask anywhere.
        loss_ref[...] = partial_sum(dd)
    else:
        is_last = pl.program_id(0) == pl.num_programs(0) - 1

        @pl.when(is_last)
        def _():
            row = (pl.program_id(0) * tile_m
                   + lax.broadcasted_iota(jnp.int32, dd.shape, 0))
            loss_ref[...] = partial_sum(jnp.where(row < n_valid_rows, dd, 0.0))

        @pl.when(jnp.logical_not(is_last))
        def _():
            loss_ref[...] = partial_sum(dd)


# ----------------------------------------------------------------------------
# Parameter packing (pad channels to lane width, concat teacher/student pairs)
# ----------------------------------------------------------------------------
def _pad2(w, r, c):
    return jnp.pad(w.astype(jnp.float32), ((0, r - w.shape[0]), (0, c - w.shape[1])))


def _pad1(b, n):
    return jnp.pad(b.astype(jnp.float32), (0, n - b.shape[0]))


def _pack_params(tp, sp, cin2, hp):
    bf16 = jnp.bfloat16
    # [w1_t | w1_s] applied to x (kept f32: tiny K = 2C dot).
    w_in = jnp.concatenate([_pad2(tp["w1"], cin2, hp), _pad2(sp["w1"], cin2, hp)], axis=1)
    # [w2 | w3] per net applied to f1 (bf16 operands).
    w_mid_t = jnp.concatenate([_pad2(tp["w2"], hp, hp), _pad2(tp["w3"], hp, hp)],
                              axis=1).astype(bf16)
    w_mid_s = jnp.concatenate([_pad2(sp["w2"], hp, hp), _pad2(sp["w3"], hp, hp)],
                              axis=1).astype(bf16)
    # Teacher last layer: only w4 (output projection discarded).
    w_last_t = _pad2(tp["w4"], hp, hp).astype(bf16)
    # Student last layer: [wo | w4] so s_out lands in lanes [0, Cout).
    w_last_s = jnp.concatenate([_pad2(sp["wo"], hp, hp), _pad2(sp["w4"], hp, hp)],
                               axis=1).astype(bf16)

    b_all = jnp.zeros((8, 2 * hp), jnp.float32)
    b_all = b_all.at[0].set(jnp.concatenate([_pad1(tp["b1"], hp), _pad1(sp["b1"], hp)]))
    b_all = b_all.at[1].set(jnp.concatenate([_pad1(tp["b2"], hp), _pad1(tp["b3"], hp)]))
    b_all = b_all.at[2].set(jnp.concatenate([_pad1(sp["b2"], hp), _pad1(sp["b3"], hp)]))
    b_all = b_all.at[3, :hp].set(_pad1(tp["b4"], hp))
    b_all = b_all.at[4].set(jnp.concatenate([_pad1(sp["bo"], hp), _pad1(sp["b4"], hp)]))
    return w_in, w_mid_t, w_mid_s, w_last_t, w_last_s, b_all


# ----------------------------------------------------------------------------
# Distiller.forward
# ----------------------------------------------------------------------------
def distiller_forward(t_params, s_params, x1, x2):
    B, C, H, W = x1.shape
    cin2 = 2 * C
    hidden = s_params["w1"].shape[1]
    c_out = s_params["wo"].shape[1]
    hp = max(_round_up(hidden, _LANES), _LANES)
    # Distiller requires matching teacher/student feature channel counts.
    assert t_params["w1"].shape == s_params["w1"].shape
    assert t_params["w2"].shape == s_params["w2"].shape

    rows = B * H * W
    tile_m = min(_TILE_M, _round_up(rows, 8))
    assert tile_m % 8 == 0, "sublane-grouped loss partial needs tile_m % 8 == 0"
    n_tiles = pl.cdiv(rows, tile_m)
    rows_p = n_tiles * tile_m

    # Single NCHW -> channels-last pass (required only by the NCHW interface).
    x = jnp.concatenate(
        [jnp.transpose(x1, (0, 2, 3, 1)), jnp.transpose(x2, (0, 2, 3, 1))],
        axis=-1).reshape(rows, cin2).astype(jnp.float32)
    if rows_p != rows:
        x = jnp.pad(x, ((0, rows_p - rows), (0, 0)))     # pad rows only; channels stay 2C

    # Teacher runs under torch.no_grad() / .detach() in the original module.
    t_detached = jax.tree_util.tree_map(lax.stop_gradient, t_params)
    w_in, w_mid_t, w_mid_s, w_last_t, w_last_s, b_all = _pack_params(
        t_detached, s_params, cin2, hp)

    kernel = functools.partial(_fused_distill_kernel, n_valid_rows=rows,
                               tile_m=tile_m, hp=hp, c_out=c_out)

    const = lambda i: (0, 0)
    out, loss_part = pl.pallas_call(
        kernel,
        out_shape=(
            jax.ShapeDtypeStruct((rows_p, c_out), jnp.float32),
            jax.ShapeDtypeStruct((n_tiles, 8, hp), jnp.float32),
        ),
        grid_spec=pltpu.PrefetchScalarGridSpec(
            num_scalar_prefetch=0,
            grid=(n_tiles,),
            in_specs=[
                pl.BlockSpec((tile_m, cin2), lambda i: (i, 0)),   # x row tile (no lane pad)
                pl.BlockSpec((cin2, 2 * hp), const),              # [w1_t|w1_s]   (resident)
                pl.BlockSpec((hp, 2 * hp), const),                # [w2_t|w3_t]   (resident)
                pl.BlockSpec((hp, 2 * hp), const),                # [w2_s|w3_s]   (resident)
                pl.BlockSpec((hp, hp), const),                    # w4_t          (resident)
                pl.BlockSpec((hp, 2 * hp), const),                # [wo_s|w4_s]   (resident)
                pl.BlockSpec((8, 2 * hp), const),                 # biases        (resident)
            ],
            out_specs=(
                pl.BlockSpec((tile_m, c_out), lambda i: (i, 0)),  # s_out, real channels only
                pl.BlockSpec((1, 8, hp), lambda i: (i, 0, 0)),    # per-tile loss partials
            ),
        ),
        compiler_params=pltpu.CompilerParams(
            dimension_semantics=("parallel",),     # row tiles independent (megacore on v7x)
            vmem_limit_bytes=48 * 1024 * 1024,     # safe on v7x's 64 MiB; headroom on v5e/v6e
        ),
    )(x, w_in, w_mid_t, w_mid_s, w_last_t, w_last_s, b_all)

    loss_distill = jnp.sum(loss_part)
    s_out = jnp.transpose(out[:rows].reshape(B, H, W, c_out), (0, 3, 1, 2))
    return s_out, loss_distill


# ----------------------------------------------------------------------------
# Synthetic teacher / student nets (deterministic parameters)
# ----------------------------------------------------------------------------
def init_net_params(key, c_in, hidden, c_out):
    # TODO(synk): the real CAIN t_net/s_net are large encoder-decoder models;
    # this deterministic 1x1-conv stand-in keeps the Distiller contract.
    ks = jax.random.split(key, 10)
    w = lambda k, shape: 0.1 * jax.random.normal(k, shape, jnp.float32)
    return {
        "w1": w(ks[0], (2 * c_in, hidden)), "b1": w(ks[1], (hidden,)),
        "w2": w(ks[2], (hidden, hidden)),   "b2": w(ks[3], (hidden,)),
        "w3": w(ks[4], (hidden, hidden)),   "b3": w(ks[5], (hidden,)),
        "w4": w(ks[6], (hidden, hidden)),   "b4": w(ks[7], (hidden,)),
        "wo": w(ks[8], (hidden, c_out)),    "bo": w(ks[9], (c_out,)),
    }


if __name__ == "__main__":
    B, C, H, W, HIDDEN = 2, 4, 16, 16, 8

    key = jax.random.PRNGKey(0)
    k_x1, k_x2, k_t, k_s = jax.random.split(key, 4)
    x1 = jax.random.normal(k_x1, (B, C, H, W), jnp.float32)
    x2 = jax.random.normal(k_x2, (B, C, H, W), jnp.float32)

    t_params = init_net_params(k_t, C, HIDDEN, C)
    s_params = init_net_params(k_s, C, HIDDEN, C)

    s_out, loss_distill = jax.jit(distiller_forward)(t_params, s_params, x1, x2)
    s_out = jax.block_until_ready(s_out)
    loss_distill = jax.block_until_ready(loss_distill)

    # Plain-JAX reference of the same graph (mirrors the kernel's precision
    # choice: f32 first dot, bf16-operand / f32-accumulate for the rest).
    def ref_forward(tp, sp, a, b):
        def mm_bf16(x, w):
            return jnp.dot(x.astype(jnp.bfloat16), w.astype(jnp.bfloat16),
                           preferred_element_type=jnp.float32)

        def net(p, x_flat):
            f1 = jnp.maximum(
                jnp.dot(x_flat, p["w1"], preferred_element_type=jnp.float32) + p["b1"], 0.0)
            f2 = jnp.maximum(mm_bf16(f1, p["w2"]) + p["b2"], 0.0)
            g1 = jnp.maximum(mm_bf16(f1, p["w3"]) + p["b3"], 0.0)
            g2 = jnp.maximum(mm_bf16(f2, p["w4"]) + p["b4"], 0.0)
            o = mm_bf16(f2, p["wo"]) + p["bo"]
            return [f1, f2], [g1, g2], o

        Bb, Cc, Hh, Ww = a.shape
        x_flat = jnp.concatenate(
            [jnp.transpose(a, (0, 2, 3, 1)), jnp.transpose(b, (0, 2, 3, 1))],
            axis=-1).reshape(-1, 2 * Cc)
        tfe, tfe1, _ = net(tp, x_flat)
        sfe, sfe1, so = net(sp, x_flat)
        loss = sum(jnp.sum((sfe[i] - tfe[i]) ** 2) + jnp.sum((sfe1[i] - tfe1[i]) ** 2)
                   for i in range(len(tfe)))
        so = jnp.transpose(so.reshape(Bb, Hh, Ww, -1), (0, 3, 1, 2))
        return so, loss

    ref_out, ref_loss = ref_forward(t_params, s_params, x1, x2)
    assert s_out.shape == (B, C, H, W)
    assert jnp.allclose(s_out, ref_out, rtol=2e-2, atol=2e-2), \
        f"max |diff| = {jnp.max(jnp.abs(s_out - ref_out))}"
    assert jnp.allclose(loss_distill, ref_loss, rtol=2e-2, atol=1e-2), \
        f"loss {loss_distill} vs ref {ref_loss}"

    print("KERNEL_OK")
</pallas_src>

<mosaic_0001>
module attributes {stable_mosaic.version = 11 : i64} {
  func.func @_fused_distill_kernel(%arg0: i32, %arg1: memref<512x8xf32, #tpu.memory_space<vmem>>, %arg2: memref<8x256xf32, #tpu.memory_space<vmem>>, %arg3: memref<128x256xbf16, #tpu.memory_space<vmem>>, %arg4: memref<128x256xbf16, #tpu.memory_space<vmem>>, %arg5: memref<128x128xbf16, #tpu.memory_space<vmem>>, %arg6: memref<128x256xbf16, #tpu.memory_space<vmem>>, %arg7: memref<8x256xf32, #tpu.memory_space<vmem>>, %arg8: memref<512x4xf32, #tpu.memory_space<vmem>>, %arg9: memref<1x8x128xf32, #tpu.memory_space<vmem>>) attributes {dimension_semantics = [#tpu.dimension_semantics<parallel>], iteration_bounds = array<i64: 1>, scalar_prefetch = 0 : i64, scratch_operands = 0 : i64, tpu.core_type = #tpu.core_type<tc>, window_params = [{transform_indices = @transform_0, window_bounds = array<i64: 512, 8>}, {pipeline_mode = #tpu.pipeline_mode<synchronous>, transform_indices = @transform_1, window_bounds = array<i64: 8, 256>}, {pipeline_mode = #tpu.pipeline_mode<synchronous>, transform_indices = @transform_2, window_bounds = array<i64: 128, 256>}, {pipeline_mode = #tpu.pipeline_mode<synchronous>, transform_indices = @transform_3, window_bounds = array<i64: 128, 256>}, {pipeline_mode = #tpu.pipeline_mode<synchronous>, transform_indices = @transform_4, window_bounds = array<i64: 128, 128>}, {pipeline_mode = #tpu.pipeline_mode<synchronous>, transform_indices = @transform_5, window_bounds = array<i64: 128, 256>}, {pipeline_mode = #tpu.pipeline_mode<synchronous>, transform_indices = @transform_6, window_bounds = array<i64: 8, 256>}, {transform_indices = @transform_7, window_bounds = array<i64: 512, 4>}, {transform_indices = @transform_8, window_bounds = array<i64: 1, 8, 128>}]} {
    %c0 = arith.constant 0 : index
    %c0_0 = arith.constant 0 : index
    %0 = vector.load %arg7[%c0, %c0_0] : memref<8x256xf32, #tpu.memory_space<vmem>>, vector<8x256xf32>
    %c0_1 = arith.constant 0 : index
    %c0_2 = arith.constant 0 : index
    %1 = vector.load %arg1[%c0_1, %c0_2] : memref<512x8xf32, #tpu.memory_space<vmem>>, vector<512x8xf32>
    %c0_3 = arith.constant 0 : index
    %c0_4 = arith.constant 0 : index
    %2 = vector.load %arg2[%c0_3, %c0_4] : memref<8x256xf32, #tpu.memory_space<vmem>>, vector<8x256xf32>
    %cst = arith.constant dense<0.000000e+00> : vector<512x256xf32>
    %3 = tpu.matmul %1, %2, %cst {dimension_numbers = #tpu.dot_dimension_numbers<[1], [0], [0], [1], [0, 0, 1, 1], [], []>} : vector<512x8xf32>, vector<8x256xf32>, vector<512x256xf32> -> vector<512x256xf32>
    %4 = vector.extract_strided_slice %0 {offsets = [0, 0], sizes = [1, 256], strides = [1, 1]} : vector<8x256xf32> to vector<1x256xf32>
    %5 = vector.broadcast %4 : vector<1x256xf32> to vector<512x256xf32>
    %6 = arith.addf %3, %5 : vector<512x256xf32>
    %cst_5 = arith.constant 0.000000e+00 : f32
    %7 = vector.broadcast %cst_5 : f32 to vector<512x256xf32>
    %8 = arith.maximumf %6, %7 : vector<512x256xf32>
    %9 = vector.extract_strided_slice %8 {offsets = [0, 0], sizes = [512, 128], strides = [1, 1]} : vector<512x256xf32> to vector<512x128xf32>
    %10 = vector.extract_strided_slice %8 {offsets = [0, 128], sizes = [512, 128], strides = [1, 1]} : vector<512x256xf32> to vector<512x128xf32>
    %11 = arith.subf %10, %9 : vector<512x128xf32>
    %12 = arith.mulf %11, %11 : vector<512x128xf32>
    %13 = arith.truncf %9 : vector<512x128xf32> to vector<512x128xbf16>
    %c0_6 = arith.constant 0 : index
    %c0_7 = arith.constant 0 : index
    %14 = vector.load %arg3[%c0_6, %c0_7] : memref<128x256xbf16, #tpu.memory_space<vmem>>, vector<128x256xbf16>
    %cst_8 = arith.constant dense<0.000000e+00> : vector<512x256xf32>
    %15 = tpu.matmul %13, %14, %cst_8 {dimension_numbers = #tpu.dot_dimension_numbers<[1], [0], [0], [1], [0, 0, 1, 1], [], []>} : vector<512x128xbf16>, vector<128x256xbf16>, vector<512x256xf32> -> vector<512x256xf32>
    %16 = vector.extract_strided_slice %0 {offsets = [1, 0], sizes = [1, 256], strides = [1, 1]} : vector<8x256xf32> to vector<1x256xf32>
    %17 = vector.broadcast %16 : vector<1x256xf32> to vector<512x256xf32>
    %18 = arith.addf %15, %17 : vector<512x256xf32>
    %cst_9 = arith.constant 0.000000e+00 : f32
    %19 = vector.broadcast %cst_9 : f32 to vector<512x256xf32>
    %20 = arith.maximumf %18, %19 : vector<512x256xf32>
    %21 = arith.truncf %10 : vector<512x128xf32> to vector<512x128xbf16>
    %c0_10 = arith.constant 0 : index
    %c0_11 = arith.constant 0 : index
    %22 = vector.load %arg4[%c0_10, %c0_11] : memref<128x256xbf16, #tpu.memory_space<vmem>>, vector<128x256xbf16>
    %cst_12 = arith.constant dense<0.000000e+00> : vector<512x256xf32>
    %23 = tpu.matmul %21, %22, %cst_12 {dimension_numbers = #tpu.dot_dimension_numbers<[1], [0], [0], [1], [0, 0, 1, 1], [], []>} : vector<512x128xbf16>, vector<128x256xbf16>, vector<512x256xf32> -> vector<512x256xf32>
    %24 = vector.extract_strided_slice %0 {offsets = [2, 0], sizes = [1, 256], strides = [1, 1]} : vector<8x256xf32> to vector<1x256xf32>
    %25 = vector.broadcast %24 : vector<1x256xf32> to vector<512x256xf32>
    %26 = arith.addf %23, %25 : vector<512x256xf32>
    %cst_13 = arith.constant 0.000000e+00 : f32
    %27 = vector.broadcast %cst_13 : f32 to vector<512x256xf32>
    %28 = arith.maximumf %26, %27 : vector<512x256xf32>
    %29 = vector.extract_strided_slice %20 {offsets = [0, 0], sizes = [512, 128], strides = [1, 1]} : vector<512x256xf32> to vector<512x128xf32>
    %30 = vector.extract_strided_slice %20 {offsets = [0, 128], sizes = [512, 128], strides = [1, 1]} : vector<512x256xf32> to vector<512x128xf32>
    %31 = vector.extract_strided_slice %28 {offsets = [0, 0], sizes = [512, 128], strides = [1, 1]} : vector<512x256xf32> to vector<512x128xf32>
    %32 = vector.extract_strided_slice %28 {offsets = [0, 128], sizes = [512, 128], strides = [1, 1]} : vector<512x256xf32> to vector<512x128xf32>
    %33 = arith.subf %31, %29 : vector<512x128xf32>
    %34 = arith.mulf %33, %33 : vector<512x128xf32>
    %35 = arith.addf %12, %34 : vector<512x128xf32>
    %36 = arith.subf %32, %30 : vector<512x128xf32>
    %37 = arith.mulf %36, %36 : vector<512x128xf32>
    %38 = arith.addf %35, %37 : vector<512x128xf32>
    %39 = arith.truncf %29 : vector<512x128xf32> to vector<512x128xbf16>
    %c0_14 = arith.constant 0 : index
    %c0_15 = arith.constant 0 : index
    %40 = vector.load %arg5[%c0_14, %c0_15] : memref<128x128xbf16, #tpu.memory_space<vmem>>, vector<128x128xbf16>
    %cst_16 = arith.constant dense<0.000000e+00> : vector<512x128xf32>
    %41 = tpu.matmul %39, %40, %cst_16 {dimension_numbers = #tpu.dot_dimension_numbers<[1], [0], [0], [1], [0, 0, 1, 1], [], []>} : vector<512x128xbf16>, vector<128x128xbf16>, vector<512x128xf32> -> vector<512x128xf32>
    %42 = vector.extract_strided_slice %0 {offsets = [3, 0], sizes = [1, 128], strides = [1, 1]} : vector<8x256xf32> to vector<1x128xf32>
    %43 = vector.broadcast %42 : vector<1x128xf32> to vector<512x128xf32>
    %44 = arith.addf %41, %43 : vector<512x128xf32>
    %cst_17 = arith.constant 0.000000e+00 : f32
    %45 = vector.broadcast %cst_17 : f32 to vector<512x128xf32>
    %46 = arith.maximumf %44, %45 : vector<512x128xf32>
    %47 = arith.truncf %31 : vector<512x128xf32> to vector<512x128xbf16>
    %c0_18 = arith.constant 0 : index
    %c0_19 = arith.constant 0 : index
    %48 = vector.load %arg6[%c0_18, %c0_19] : memref<128x256xbf16, #tpu.memory_space<vmem>>, vector<128x256xbf16>
    %cst_20 = arith.constant dense<0.000000e+00> : vector<512x256xf32>
    %49 = tpu.matmul %47, %48, %cst_20 {dimension_numbers = #tpu.dot_dimension_numbers<[1], [0], [0], [1], [0, 0, 1, 1], [], []>} : vector<512x128xbf16>, vector<128x256xbf16>, vector<512x256xf32> -> vector<512x256xf32>
    %50 = vector.extract_strided_slice %0 {offsets = [4, 0], sizes = [1, 256], strides = [1, 1]} : vector<8x256xf32> to vector<1x256xf32>
    %51 = vector.broadcast %50 : vector<1x256xf32> to vector<512x256xf32>
    %52 = arith.addf %49, %51 : vector<512x256xf32>
    %53 = vector.extract_strided_slice %52 {offsets = [0, 0], sizes = [512, 4], strides = [1, 1]} : vector<512x256xf32> to vector<512x4xf32>
    %54 = vector.extract_strided_slice %52 {offsets = [0, 128], sizes = [512, 128], strides = [1, 1]} : vector<512x256xf32> to vector<512x128xf32>
    %cst_21 = arith.constant 0.000000e+00 : f32
    %55 = vector.broadcast %cst_21 : f32 to vector<512x128xf32>
    %56 = arith.maximumf %54, %55 : vector<512x128xf32>
    %57 = arith.subf %56, %46 : vector<512x128xf32>
    %58 = arith.mulf %57, %57 : vector<512x128xf32>
    %59 = arith.addf %38, %58 : vector<512x128xf32>
    %c0_22 = arith.constant 0 : index
    %c0_23 = arith.constant 0 : index
    %60 = vector.load %arg8[%c0_22, %c0_23] : memref<512x4xf32, #tpu.memory_space<vmem>>, vector<512x4xf32>
    tpu.vector_store %arg8[%c0_22, %c0_23], %53 {strides = array<i32>} : memref<512x4xf32, #tpu.memory_space<vmem>>, vector<512x4xf32>,
    %61 = vector.shape_cast %59 : vector<512x128xf32> to vector<64x8x128xf32>
    %cst_24 = arith.constant dense<0.000000e+00> : vector<8x128xf32>
    %62 = vector.multi_reduction <add>, %61, %cst_24 [0] : vector<64x8x128xf32> to vector<8x128xf32>
    %63 = vector.shape_cast %62 : vector<8x128xf32> to vector<1x8x128xf32>
    %c0_25 = arith.constant 0 : index
    %c0_26 = arith.constant 0 : index
    %c0_27 = arith.constant 0 : index
    %64 = vector.load %arg9[%c0_25, %c0_26, %c0_27] : memref<1x8x128xf32, #tpu.memory_space<vmem>>, vector<1x8x128xf32>
    tpu.vector_store %arg9[%c0_25, %c0_26, %c0_27], %63 {strides = array<i32>} : memref<1x8x128xf32, #tpu.memory_space<vmem>>, vector<1x8x128xf32>,
    return
  }
  func.func @transform_0(%arg0: i32) -> (i32, i32) {
    %c0_i32 = arith.constant 0 : i32
    %c0_i32_0 = arith.constant 0 : i32
    return %arg0, %c0_i32 : i32, i32
  }
  func.func @transform_1(%arg0: i32) -> (i32, i32) {
    %c0_i32 = arith.constant 0 : i32
    %c0_i32_0 = arith.constant 0 : i32
    %c0_i32_1 = arith.constant 0 : i32
    return %c0_i32, %c0_i32_0 : i32, i32
  }
  func.func @transform_2(%arg0: i32) -> (i32, i32) {
    %c0_i32 = arith.constant 0 : i32
    %c0_i32_0 = arith.constant 0 : i32
    %c0_i32_1 = arith.constant 0 : i32
    return %c0_i32, %c0_i32_0 : i32, i32
  }
  func.func @transform_3(%arg0: i32) -> (i32, i32) {
    %c0_i32 = arith.constant 0 : i32
    %c0_i32_0 = arith.constant 0 : i32
    %c0_i32_1 = arith.constant 0 : i32
    return %c0_i32, %c0_i32_0 : i32, i32
  }
  func.func @transform_4(%arg0: i32) -> (i32, i32) {
    %c0_i32 = arith.constant 0 : i32
    %c0_i32_0 = arith.constant 0 : i32
    %c0_i32_1 = arith.constant 0 : i32
    return %c0_i32, %c0_i32_0 : i32, i32
  }
  func.func @transform_5(%arg0: i32) -> (i32, i32) {
    %c0_i32 = arith.constant 0 : i32
    %c0_i32_0 = arith.constant 0 : i32
    %c0_i32_1 = arith.constant 0 : i32
    return %c0_i32, %c0_i32_0 : i32, i32
  }
  func.func @transform_6(%arg0: i32) -> (i32, i32) {
    %c0_i32 = arith.constant 0 : i32
    %c0_i32_0 = arith.constant 0 : i32
    %c0_i32_1 = arith.constant 0 : i32
    return %c0_i32, %c0_i32_0 : i32, i32
  }
  func.func @transform_7(%arg0: i32) -> (i32, i32) {
    %c0_i32 = arith.constant 0 : i32
    %c0_i32_0 = arith.constant 0 : i32
    return %arg0, %c0_i32 : i32, i32
  }
  func.func @transform_8(%arg0: i32) -> (i32, i32, i32) {
    %c0_i32 = arith.constant 0 : i32
    %c0_i32_0 = arith.constant 0 : i32
    %c0_i32_1 = arith.constant 0 : i32
    return %arg0, %c0_i32, %c0_i32_0 : i32, i32, i32
  }
}

</mosaic_0001>

<bundles_post_ra>
// kernel: distiller_forward.1
= control target key start
LH: loop header
LB: loop body
LE: loop exit
PB: predicated region body
PF: predicated region fallthrough
CT: control target
= control target key end

     0   :  { %v4298_v2 = vmov 0.0   ;;  %vm105_vm0 = vcmask 64512   ;;  %v7342_v52 = vmov 0   ;;  %vm3819_vm1 = vcmask 31744   ;;  %s7333_s1 = inlined_call_operand.vmem [shape: f32[8,256], index: 1, kind: input, shape index: {}]   ;;  %s7334_s0 = inlined_call_operand.vmem [shape: f32[512,8], index: 0, kind: input, shape index: {}]   ;;  %s7335_s2 = inlined_call_operand.vmem [shape: bf16[128,256], index: 2, kind: input, shape index: {}]   ;;  %s7336_s3 = inlined_call_operand.vmem [shape: bf16[128,256], index: 3, kind: input, shape index: {}]   ;;  %s7337_s6 = inlined_call_operand.vmem [shape: f32[8,256], index: 6, kind: input, shape index: {}]   ;;  %s7338_s4 = inlined_call_operand.vmem [shape: bf16[128,128], index: 4, kind: input, shape index: {}]   ;;  %s7339_s5 = inlined_call_operand.vmem [shape: bf16[128,256], index: 5, kind: input, shape index: {}]   ;;  %s7340_s7 = inlined_call_operand.vmem [shape: f32[512,4], index: 7, kind: output, shape index: {0}]   ;;  %s7341_s8 = inlined_call_operand.vmem [shape: f32[1,8,128], index: 8, kind: output, shape index: {1}]  }
   0x1   :  { %v96_v0 = vld [vmem:[%s7333_s1 + $0x8] sm:$0xff]  ;;  %v95_v1 = vld [vmem:[%s7333_s1] sm:$0xff]  ;;  %362 = vmatprep.mubr.f32.mxu0 %v4298_v2  ;;  %v33_v7 = vld [vmem:[%s7334_s0 + $0x10] sm:$0xff]  ;;  %1261 = vmatprep.mubr.bf16.mxu1 %v7342_v52 }
   0x2   :  { %v31_v3 = vld [vmem:[%s7334_s0] sm:$0xff]  ;;  %298 = vmatprep.subr.mxu0 %v96_v0  ;;  %v32_v4 = vld [vmem:[%s7334_s0 + $0x8] sm:$0xff]  ;;  %v4217_v8 = vld [vmem:[%s7335_s2 + $0x10] ss:$8 sps:$4 sm:$0xff]  }
   0x3   :  { %299 = vmatpush1.msra.mxu0 %v95_v1  ;;  %v4214_v5 = vld [vmem:[%s7335_s2] ss:$8 sps:$4 sm:$0xff]   ;;  %v4216_v6 = vld [vmem:[%s7335_s2 + $0x4] ss:$8 sps:$4 sm:$0xff]   ;;  %v4219_v9 = vld [vmem:[%s7335_s2 + $0x14] ss:$8 sps:$4 sm:$0xff]  }
   0x4   :  { %3956 = vmatmul.mubr.msk.f32.vlgmr.msra.gmra.mrb[0].mxu0 %vm105_vm0, %v31_v3  ;;  %1139 = vmatprep.subr.bf16.mxu0 %v4216_v6  ;;  %v34_v10 = vld [vmem:[%s7334_s0 + $0x18] sm:$0xff]  ;;  %v4220_v11 = vld [vmem:[%s7335_s2 + $0x20] ss:$8 sps:$4 sm:$0xff]   ;;  %v4222_v12 = vld [vmem:[%s7335_s2 + $0x24] ss:$8 sps:$4 sm:$0xff]  }
   0x5   :  { %368 = vmatprep.mubr.f32.mxu0 %v4298_v2  ;;  %4196 = vmatprep.subr.bf16.mxu1 %v4216_v6  ;;  %v35_v13 = vld [vmem:[%s7334_s0 + $0x20] sm:$0xff]  ;;  %v36_v14 = vld [vmem:[%s7334_s0 + $0x28] sm:$0xff]  ;;  %v37_v15 = vld [vmem:[%s7334_s0 + $0x30] sm:$0xff] }
   0x6   :  { %1140 = vmatpush1.bf16.msra.mxu0 %v4214_v5  ;;  %4204 = vmatpush1.bf16.msra.mxu1 %v4214_v5  ;;  %v38_v16 = vld [vmem:[%s7334_s0 + $0x38] sm:$0xff]  ;;  %v39_v19 = vld [vmem:[%s7334_s0 + $0x40] sm:$0xff]  ;;  %v40_v20 = vld [vmem:[%s7334_s0 + $0x48] sm:$0xff] }
   0x7   :  { %1141 = vmatprep.subr.bf16.mxu0 %v4219_v9  ;;  %4197 = vmatprep.subr.bf16.mxu1 %v4219_v9  ;;  %v4223_v17 = vld [vmem:[%s7335_s2 + $0x30] ss:$8 sps:$4 sm:$0xff]   ;;  %v4225_v18 = vld [vmem:[%s7335_s2 + $0x34] ss:$8 sps:$4 sm:$0xff]   ;;  %v43_v23 = vld [vmem:[%s7334_s0 + $0x60] sm:$0xff] }
   0x8   :  { %3957 = vmatmul.mubr.msk.f32.gmra.mrb[2].mxu0 %vm105_vm0, %v32_v4  ;;  %v41_v21 = vld [vmem:[%s7334_s0 + $0x50] sm:$0xff]  ;;  %v42_v22 = vld [vmem:[%s7334_s0 + $0x58] sm:$0xff]  ;;  %v44_v24 = vld [vmem:[%s7334_s0 + $0x68] sm:$0xff] }
   0x9   :  { %374 = vmatprep.mubr.f32.mxu0 %v4298_v2  ;;  %v45_v25 = vld [vmem:[%s7334_s0 + $0x70] sm:$0xff]  ;;  %v46_v26 = vld [vmem:[%s7334_s0 + $0x78] sm:$0xff]  ;;  %v4226_v27 = vld [vmem:[%s7335_s2 + $0x40] ss:$8 sps:$4 sm:$0xff]  }
   0xa   :  { %1142 = vmatpush1.bf16.msra.mxu0 %v4217_v8  ;;  %4205 = vmatpush1.bf16.msra.mxu1 %v4217_v8  ;;  %v4228_v28 = vld [vmem:[%s7335_s2 + $0x44] ss:$8 sps:$4 sm:$0xff]   ;;  %v49_v31 = vld [vmem:[%s7334_s0 + $0x90] sm:$0xff]  ;;  %v50_v32 = vld [vmem:[%s7334_s0 + $0x98] sm:$0xff]  ;;  %v97_v8 = vlaneseq }
   0xb   :  { %1143 = vmatprep.subr.bf16.mxu0 %v4222_v12  ;;  %4198 = vmatprep.subr.bf16.mxu1 %v4222_v12  ;;  %v47_v29 = vld [vmem:[%s7334_s0 + $0x80] sm:$0xff]  ;;  %v48_v30 = vld [vmem:[%s7334_s0 + $0x88] sm:$0xff]  ;;  %v53_v35 = vld [vmem:[%s7334_s0 + $0xb0] sm:$0xff] }
   0xc   :  { %3958 = vmatmul.mubr.msk.f32.gmra.mrb[4].mxu0 %vm105_vm0, %v33_v7  ;;  %v51_v33 = vld [vmem:[%s7334_s0 + $0xa0] sm:$0xff]  ;;  %v52_v34 = vld [vmem:[%s7334_s0 + $0xa8] sm:$0xff]  ;;  %v54_v36 = vld [vmem:[%s7334_s0 + $0xb8] sm:$0xff] }
   0xd   :  { %380 = vmatprep.mubr.f32.mxu0 %v4298_v2  ;;  %v55_v37 = vld [vmem:[%s7334_s0 + $0xc0] sm:$0xff]  ;;  %v56_v38 = vld [vmem:[%s7334_s0 + $0xc8] sm:$0xff]  ;;  %v4229_v39 = vld [vmem:[%s7335_s2 + $0x50] ss:$8 sps:$4 sm:$0xff]  }
   0xe   :  { %1144 = vmatpush1.bf16.msra.mxu0 %v4220_v11  ;;  %4206 = vmatpush1.bf16.msra.mxu1 %v4220_v11  ;;  %v4231_v40 = vld [vmem:[%s7335_s2 + $0x54] ss:$8 sps:$4 sm:$0xff]   ;;  %v59_v43 = vld [vmem:[%s7334_s0 + $0xe0] sm:$0xff]  ;;  %v60_v44 = vld [vmem:[%s7334_s0 + $0xe8] sm:$0xff] }
   0xf   :  { %1145 = vmatprep.subr.bf16.mxu0 %v4225_v18  ;;  %4199 = vmatprep.subr.bf16.mxu1 %v4225_v18  ;;  %v57_v41 = vld [vmem:[%s7334_s0 + $0xd0] sm:$0xff]  ;;  %v58_v42 = vld [vmem:[%s7334_s0 + $0xd8] sm:$0xff]  ;;  %v4234_v46 = vld [vmem:[%s7335_s2 + $0x64] ss:$8 sps:$4 sm:$0xff]  }
  0x10   :  { %3959 = vmatmul.mubr.msk.f32.gmra.mrb[6].mxu0 %vm105_vm0, %v34_v10  ;;  %v61_v45 = vld [vmem:[%s7334_s0 + $0xf0] sm:$0xff]  ;;  %v4232_v47 = vld [vmem:[%s7335_s2 + $0x60] ss:$8 sps:$4 sm:$0xff]   ;;  %v62_v48 = vld [vmem:[%s7334_s0 + $0xf8] sm:$0xff]  ;;  %v4658_v10 = vshrl.u32 %v97_v8, 7 }
  0x11   :  { %386 = vmatprep.mubr.f32.mxu0 %v4298_v2  ;;  %v4237_v49 = vld [vmem:[%s7335_s2 + $0x74] ss:$8 sps:$4 sm:$0xff]   ;;  %v4235_v50 = vld [vmem:[%s7335_s2 + $0x70] ss:$8 sps:$4 sm:$0xff]   ;;  %v63_v51 = vld [vmem:[%s7334_s0 + $0x100] sm:$0xff] }
  0x12   :  { %1146 = vmatpush1.bf16.msra.mxu0 %v4223_v17  ;;  %4207 = vmatpush1.bf16.msra.mxu1 %v4223_v17  ;;  %v64_v53 = vld [vmem:[%s7334_s0 + $0x108] sm:$0xff]  ;;  %v65_v54 = vld [vmem:[%s7334_s0 + $0x110] sm:$0xff]  ;;  %v66_v55 = vld [vmem:[%s7334_s0 + $0x118] sm:$0xff]  ;;  %7422 = vst [vmem:[#allocation2_spill] sm:$0xff] %v4658_v10  ;;  %v99_v12 = vsub.s32 0, %v4658_v10 }
  0x13   :  { %1147 = vmatprep.subr.bf16.mxu0 %v4228_v28  ;;  %4200 = vmatprep.subr.bf16.mxu1 %v4228_v28  ;;  %v67_v56 = vld [vmem:[%s7334_s0 + $0x120] sm:$0xff]  ;;  %v68_v57 = vld [vmem:[%s7334_s0 + $0x128] sm:$0xff]  ;;  %v69_v58 = vld [vmem:[%s7334_s0 + $0x130] sm:$0xff] }
  0x14   :  { %3960 = vmatmul.mubr.msk.f32.gmra.mrb[8].mxu0 %vm105_vm0, %v35_v13  ;;  %v70_v59 = vld [vmem:[%s7334_s0 + $0x138] sm:$0xff]  ;;  %v71_v60 = vld [vmem:[%s7334_s0 + $0x140] sm:$0xff]  ;;  %v72_v61 = vld [vmem:[%s7334_s0 + $0x148] sm:$0xff] }
  0x15   :  { %392 = vmatprep.mubr.f32.mxu0 %v4298_v2  ;;  %v73_v62 = vld [vmem:[%s7334_s0 + $0x150] sm:$0xff]  ;;  %v4240_v63 = vld [vmem:[%s7336_s3 + $0x4] ss:$8 sps:$4 sm:$0xff]   ;;  %v74_v0 = vld [vmem:[%s7334_s0 + $0x158] sm:$0xff] }
  0x16   :  { %1148 = vmatpush1.bf16.msra.mxu0 %v4226_v27  ;;  %4208 = vmatpush1.bf16.msra.mxu1 %v4226_v27  ;;  %v75_v1 = vld [vmem:[%s7334_s0 + $0x160] sm:$0xff]  ;;  %v76_v3 = vld [vmem:[%s7334_s0 + $0x168] sm:$0xff]  ;;  %v77_v4 = vld [vmem:[%s7334_s0 + $0x170] sm:$0xff] }
  0x17   :  { %1149 = vmatprep.subr.bf16.mxu0 %v4231_v40  ;;  %4201 = vmatprep.subr.bf16.mxu1 %v4231_v40  ;;  %v78_v5 = vld [vmem:[%s7334_s0 + $0x178] sm:$0xff]  ;;  %v79_v6 = vld [vmem:[%s7334_s0 + $0x180] sm:$0xff]  ;;  %v80_v7 = vld [vmem:[%s7334_s0 + $0x188] sm:$0xff] }
  0x18   :  { %3961 = vmatmul.mubr.msk.f32.gmra.mrb[10].mxu0 %vm105_vm0, %v36_v14  ;;  %v81_v9 = vld [vmem:[%s7334_s0 + $0x190] sm:$0xff]  ;;  %v82_v11 = vld [vmem:[%s7334_s0 + $0x198] sm:$0xff]  ;;  %v83_v13 = vld [vmem:[%s7334_s0 + $0x1a0] sm:$0xff] }
  0x19   :  { %398 = vmatprep.mubr.f32.mxu0 %v4298_v2  ;;  %v29_v14 = vld [vmem:[%s7337_s6] sm:$0xff]  ;;  %v84_v18 = vld [vmem:[%s7334_s0 + $0x1a8] sm:$0xff] }
  0x1a   :  { %1150 = vmatpush1.bf16.msra.mxu0 %v4229_v39  ;;  %4209 = vmatpush1.bf16.msra.mxu1 %v4229_v39 }
  0x1b   :  { %1151 = vmatprep.subr.bf16.mxu0 %v4234_v46  ;;  %4202 = vmatprep.subr.bf16.mxu1 %v4234_v46 }
  0x1c   :  { %3962 = vmatmul.mubr.msk.f32.gmra.mrb[12].mxu0 %vm105_vm0, %v37_v15  ;;  %v30_v15 = vld [vmem:[%s7337_s6 + $0x8] sm:$0xff] }
  0x1d   :  { %404 = vmatprep.mubr.f32.mxu0 %v4298_v2  ;;  %v4680_v17 = vrot.slane %v30_v15, %v99_v12  ;;  %v91_v15 = vld [vmem:[%s7334_s0 + $0x1e0] sm:$0xff] }
  0x1e   :  { %1152 = vmatpush1.bf16.msra.mxu0 %v4232_v47  ;;  %4210 = vmatpush1.bf16.msra.mxu1 %v4232_v47 }
  0x1f   :  { %1153 = vmatprep.subr.bf16.mxu0 %v4237_v49  ;;  %4203 = vmatprep.subr.bf16.mxu1 %v4237_v49  ;;  %v88_v49 = vld [vmem:[%s7334_s0 + $0x1c8] sm:$0xff] }
  0x20   :  { %3963 = vmatmul.mubr.msk.f32.gmra.mrb[14].mxu0 %vm105_vm0, %v38_v16  ;;  %v4677_v16 = vrot.slane %v29_v14, %v99_v12 }
  0x21   :  { %410 = vmatprep.mubr.f32.mxu0 %v4298_v2 }
  0x22   :  { %1154 = vmatpush1.bf16.msra.mxu0 %v4235_v50  ;;  %4211 = vmatpush1.bf16.msra.mxu1 %v4235_v50 }
  0x23   :  { %1756 = vmatprep.subr.bf16.mxu0 %v4240_v63 }
  0x24   :  { %3964 = vmatmul.mubr.msk.f32.gmra.mrb[16].mxu0 %vm105_vm0, %v39_v19 }
  0x25   :  { %416 = vmatprep.mubr.f32.mxu0 %v4298_v2 }
  0x28   :  { %3965 = vmatmul.mubr.msk.f32.gmra.mrb[18].mxu0 %vm105_vm0, %v40_v20 }
  0x29   :  { %422 = vmatprep.mubr.f32.mxu0 %v4298_v2 }
  0x2c   :  { %3966 = vmatmul.mubr.msk.f32.gmra.mrb[20].mxu0 %vm105_vm0, %v41_v21 }
  0x2d   :  { %428 = vmatprep.mubr.f32.mxu0 %v4298_v2 }
  0x30   :  { %3967 = vmatmul.mubr.msk.f32.gmra.mrb[22].mxu0 %vm105_vm0, %v42_v22 }
  0x31   :  { %434 = vmatprep.mubr.f32.mxu0 %v4298_v2 }
  0x34   :  { %3968 = vmatmul.mubr.msk.f32.gmra.mrb[24].mxu0 %vm105_vm0, %v43_v23  ;;  %v85_v23 = vld [vmem:[%s7334_s0 + $0x1b0] sm:$0xff] }
  0x35   :  { %440 = vmatprep.mubr.f32.mxu0 %v4298_v2 }
  0x38   :  { %3969 = vmatmul.mubr.msk.f32.gmra.mrb[26].mxu0 %vm105_vm0, %v44_v24 }
  0x39   :  { %446 = vmatprep.mubr.f32.mxu0 %v4298_v2 }
  0x3c   :  { %3970 = vmatmul.mubr.msk.f32.gmra.mrb[28].mxu0 %vm105_vm0, %v45_v25 }
  0x3d   :  { %452 = vmatprep.mubr.f32.mxu0 %v4298_v2 }
  0x40   :  { %3971 = vmatmul.mubr.msk.f32.gmra.mrb[30].mxu0 %vm105_vm0, %v46_v26 }
  0x41   :  { %458 = vmatprep.mubr.f32.mxu0 %v4298_v2 }
  0x44   :  { %3972 = vmatmul.mubr.msk.f32.gmra.mrb[32].mxu0 %vm105_vm0, %v47_v29 }
  0x45   :  { %464 = vmatprep.mubr.f32.mxu0 %v4298_v2 }
  0x48   :  { %3973 = vmatmul.mubr.msk.f32.gmra.mrb[34].mxu0 %vm105_vm0, %v48_v30 }
  0x49   :  { %470 = vmatprep.mubr.f32.mxu0 %v4298_v2 }
  0x4c   :  { %3974 = vmatmul.mubr.msk.f32.gmra.mrb[36].mxu0 %vm105_vm0, %v49_v31  ;;  %v86_v31 = vld [vmem:[%s7334_s0 + $0x1b8] sm:$0xff] }
  0x4d   :  { %476 = vmatprep.mubr.f32.mxu0 %v4298_v2 }
  0x50   :  { %3975 = vmatmul.mubr.msk.f32.gmra.mrb[38].mxu0 %vm105_vm0, %v50_v32 }
  0x51   :  { %482 = vmatprep.mubr.f32.mxu0 %v4298_v2 }
  0x54   :  { %3976 = vmatmul.mubr.msk.f32.gmra.mrb[40].mxu0 %vm105_vm0, %v51_v33 }
  0x55   :  { %488 = vmatprep.mubr.f32.mxu0 %v4298_v2 }
  0x58   :  { %3977 = vmatmul.mubr.msk.f32.gmra.mrb[42].mxu0 %vm105_vm0, %v52_v34 }
  0x59   :  { %494 = vmatprep.mubr.f32.mxu0 %v4298_v2 }
  0x5c   :  { %3978 = vmatmul.mubr.msk.f32.gmra.mrb[44].mxu0 %vm105_vm0, %v53_v35 }
  0x5d   :  { %500 = vmatprep.mubr.f32.mxu0 %v4298_v2 }
  0x60   :  { %3979 = vmatmul.mubr.msk.f32.gmra.mrb[46].mxu0 %vm105_vm0, %v54_v36 }
  0x61   :  { %506 = vmatprep.mubr.f32.mxu0 %v4298_v2 }
  0x64   :  { %3980 = vmatmul.mubr.msk.f32.gmra.mrb[48].mxu0 %vm105_vm0, %v55_v37 }
  0x65   :  { %512 = vmatprep.mubr.f32.mxu0 %v4298_v2 }
  0x68   :  { %3981 = vmatmul.mubr.msk.f32.gmra.mrb[50].mxu0 %vm105_vm0, %v56_v38 }
  0x69   :  { %518 = vmatprep.mubr.f32.mxu0 %v4298_v2 }
  0x6c   :  { %3982 = vmatmul.mubr.msk.f32.gmra.mrb[52].mxu0 %vm105_vm0, %v57_v41  ;;  %v87_v41 = vld [vmem:[%s7334_s0 + $0x1c0] sm:$0xff] }
  0x6d   :  { %524 = vmatprep.mubr.f32.mxu0 %v4298_v2 }
  0x70   :  { %3983 = vmatmul.mubr.msk.f32.gmra.mrb[54].mxu0 %vm105_vm0, %v58_v42 }
  0x71   :  { %530 = vmatprep.mubr.f32.mxu0 %v4298_v2 }
  0x74   :  { %3984 = vmatmul.mubr.msk.f32.gmra.mrb[56].mxu0 %vm105_vm0, %v59_v43 }
  0x75   :  { %536 = vmatprep.mubr.f32.mxu0 %v4298_v2 }
  0x78   :  { %3985 = vmatmul.mubr.msk.f32.gmra.mrb[58].mxu0 %vm105_vm0, %v60_v44 }
  0x79   :  { %542 = vmatprep.mubr.f32.mxu0 %v4298_v2 }
  0x7c   :  { %3986 = vmatmul.mubr.msk.f32.gmra.mrb[60].mxu0 %vm105_vm0, %v61_v45 }
  0x7d   :  { %548 = vmatprep.mubr.f32.mxu0 %v4298_v2 }
  0x80   :  { %3987 = vmatmul.mubr.msk.f32.gmra.mrb[62].mxu0 %vm105_vm0, %v62_v48 }
  0x81   :  { %554 = vmatprep.mubr.f32.mxu0 %v4298_v2 }
  0x84   :  { %3988 = vmatmul.mubr.msk.f32.gmra.mrb[64].mxu0 %vm105_vm0, %v63_v51 }
  0x85   :  { %560 = vmatprep.mubr.f32.mxu0 %v4298_v2 }
  0x88   :  { %3989 = vmatmul.mubr.msk.f32.gmra.mrb[66].mxu0 %vm105_vm0, %v64_v53 }
  0x89   :  { %566 = vmatprep.mubr.f32.mxu0 %v4298_v2 }
  0x8c   :  { %3990 = vmatmul.mubr.msk.f32.gmra.mrb[68].mxu0 %vm105_vm0, %v65_v54 }
  0x8d   :  { %572 = vmatprep.mubr.f32.mxu0 %v4298_v2 }
  0x90   :  { %3991 = vmatmul.mubr.msk.f32.gmra.mrb[70].mxu0 %vm105_vm0, %v66_v55 }
  0x91   :  { %578 = vmatprep.mubr.f32.mxu0 %v4298_v2 }
  0x94   :  { %3992 = vmatmul.mubr.msk.f32.gmra.mrb[72].mxu0 %vm105_vm0, %v67_v56 }
  0x95   :  { %584 = vmatprep.mubr.f32.mxu0 %v4298_v2 }
  0x98   :  { %3993 = vmatmul.mubr.msk.f32.gmra.mrb[74].mxu0 %vm105_vm0, %v68_v57 }
  0x99   :  { %590 = vmatprep.mubr.f32.mxu0 %v4298_v2 }
  0x9c   :  { %3994 = vmatmul.mubr.msk.f32.gmra.mrb[76].mxu0 %vm105_vm0, %v69_v58 }
  0x9d   :  { %596 = vmatprep.mubr.f32.mxu0 %v4298_v2 }
  0xa0   :  { %3995 = vmatmul.mubr.msk.f32.gmra.mrb[78].mxu0 %vm105_vm0, %v70_v59  ;;  %v89_v59 = vld [vmem:[%s7334_s0 + $0x1d0] sm:$0xff] }
  0xa1   :  { %602 = vmatprep.mubr.f32.mxu0 %v4298_v2 }
  0xa4   :  { %3996 = vmatmul.mubr.msk.f32.gmra.mrb[80].mxu0 %vm105_vm0, %v71_v60 }
  0xa5   :  { %608 = vmatprep.mubr.f32.mxu0 %v4298_v2 }
  0xa8   :  { %3997 = vmatmul.mubr.msk.f32.gmra.mrb[82].mxu0 %vm105_vm0, %v72_v61 }
  0xa9   :  { %614 = vmatprep.mubr.f32.mxu0 %v4298_v2 }
  0xac   :  { %3998 = vmatmul.mubr.msk.f32.gmra.mrb[84].mxu0 %vm105_vm0, %v73_v62 }
  0xad   :  { %620 = vmatprep.mubr.f32.mxu0 %v4298_v2 }
  0xb0   :  { %3999 = vmatmul.mubr.msk.f32.gmra.mrb[86].mxu0 %vm105_vm0, %v74_v0 }
  0xb1   :  { %626 = vmatprep.mubr.f32.mxu0 %v4298_v2 }
  0xb4   :  { %4000 = vmatmul.mubr.msk.f32.gmra.mrb[88].mxu0 %vm105_vm0, %v75_v1 }
  0xb5   :  { %632 = vmatprep.mubr.f32.mxu0 %v4298_v2 }
  0xb8   :  { %4001 = vmatmul.mubr.msk.f32.gmra.mrb[90].mxu0 %vm105_vm0, %v76_v3 }
  0xb9   :  { %638 = vmatprep.mubr.f32.mxu0 %v4298_v2 }
  0xbc   :  { %4002 = vmatmul.mubr.msk.f32.gmra.mrb[92].mxu0 %vm105_vm0, %v77_v4 }
  0xbd   :  { %644 = vmatprep.mubr.f32.mxu0 %v4298_v2 }
  0xc0   :  { %4003 = vmatmul.mubr.msk.f32.gmra.mrb[94].mxu0 %vm105_vm0, %v78_v5  ;;  %v90_v5 = vld [vmem:[%s7334_s0 + $0x1d8] sm:$0xff] }
  0xc1   :  { %650 = vmatprep.mubr.f32.mxu0 %v4298_v2 }
  0xc4   :  { %4004 = vmatmul.mubr.msk.f32.gmra.mrb[96].mxu0 %vm105_vm0, %v79_v6 }
  0xc5   :  { %656 = vmatprep.mubr.f32.mxu0 %v4298_v2 }
  0xc8   :  { %4005 = vmatmul.mubr.msk.f32.gmra.mrb[98].mxu0 %vm105_vm0, %v80_v7 }
  0xc9   :  { %662 = vmatprep.mubr.f32.mxu0 %v4298_v2 }
  0xcc   :  { %4006 = vmatmul.mubr.msk.f32.gmra.mrb[100].mxu0 %vm105_vm0, %v81_v9 }
  0xcd   :  { %668 = vmatprep.mubr.f32.mxu0 %v4298_v2 }
  0xd0   :  { %4007 = vmatmul.mubr.msk.f32.gmra.mrb[102].mxu0 %vm105_vm0, %v82_v11 }
  0xd1   :  { %674 = vmatprep.mubr.f32.mxu0 %v4298_v2 }
  0xd4   :  { %4008 = vmatmul.mubr.msk.f32.gmra.mrb[104].mxu0 %vm105_vm0, %v83_v13 }
  0xd5   :  { %680 = vmatprep.mubr.f32.mxu0 %v4298_v2 }
  0xd7   :  { %v364_v19 = vpop.f32.mrb[0].mxu0 }
  0xd8   :  { %v365_v20 = vadd.f32 %v364_v19, %v4677_v16  ;;  %v366_v21 = vpop.f32.mrb[1].mxu0  ;;  %4009 = vmatmul.mubr.msk.f32.gmra.mrb[106].mxu0 %vm105_vm0, %v84_v18 }
  0xd9   :  { %v367_v22 = vadd.f32 %v366_v21, %v4680_v17  ;;  %686 = vmatprep.mubr.f32.mxu0 %v4298_v2 }
  0xda   :  { %v747_v24 = vmax.f32 %v365_v20, 0.0 }
  0xdb   :  { %v748_v25 = vmax.f32 %v367_v22, 0.0  ;;  %v370_v26 = vpop.f32.mrb[2].mxu0 }
  0xdc   :  { %v371_v27 = vadd.f32 %v370_v26, %v4677_v16  ;;  %v372_v28 = vpop.f32.mrb[3].mxu0  ;;  %4010 = vmatmul.mubr.msk.f32.gmra.mrb[108].mxu0 %vm105_vm0, %v85_v23  ;;  %v92_v26 = vld [vmem:[%s7334_s0 + $0x1e8] sm:$0xff] }
  0xdd   :  { %v4694_v29 = vsub.f32 %v748_v25, %v747_v24  ;;  %v373_v30 = vadd.f32 %v372_v28, %v4680_v17  ;;  %692 = vmatprep.mubr.f32.mxu0 %v4298_v2 }
  0xde   :  { %v749_v32 = vmax.f32 %v371_v27, 0.0 }
  0xdf   :  { %v750_v33 = vmax.f32 %v373_v30, 0.0  ;;  %v376_v34 = vpop.f32.mrb[4].mxu0 }
  0xe0   :  { %v4701_v35 = vpack.c.bf16 %v749_v32, %v747_v24  ;;  %v377_v36 = vadd.f32 %v376_v34, %v4677_v16  ;;  %v378_v37 = vpop.f32.mrb[5].mxu0  ;;  %4011 = vmatmul.mubr.msk.f32.gmra.mrb[110].mxu0 %vm105_vm0, %v86_v31 }
  0xe1   :  { %v4705_v38 = vsub.f32 %v750_v33, %v749_v32  ;;  %v4707_v39 = vpack.c.bf16 %v750_v33, %v748_v25  ;;  %v379_v40 = vadd.f32 %v378_v37, %v4680_v17  ;;  %698 = vmatprep.mubr.f32.mxu0 %v4298_v2  ;;  %v93_v37 = vld [vmem:[%s7334_s0 + $0x1f0] sm:$0xff] }
  0xe2   :  { %v751_v42 = vmax.f32 %v377_v36, 0.0 }
  0xe3   :  { %v752_v43 = vmax.f32 %v379_v40, 0.0  ;;  %v382_v44 = vpop.f32.mrb[6].mxu0 }
  0xe4   :  { %v383_v45 = vadd.f32 %v382_v44, %v4677_v16  ;;  %v384_v46 = vpop.f32.mrb[7].mxu0  ;;  %4012 = vmatmul.mubr.msk.f32.gmra.mrb[112].mxu0 %vm105_vm0, %v87_v41 }
  0xe5   :  { %v4716_v47 = vsub.f32 %v752_v43, %v751_v42  ;;  %v385_v48 = vadd.f32 %v384_v46, %v4680_v17  ;;  %704 = vmatprep.mubr.f32.mxu0 %v4298_v2 }
  0xe6   :  { %v753_v50 = vmax.f32 %v383_v45, 0.0 }
  0xe7   :  { %v754_v51 = vmax.f32 %v385_v48, 0.0  ;;  %v388_v53 = vpop.f32.mrb[8].mxu0 }
  0xe8   :  { %v389_v54 = vadd.f32 %v388_v53, %v4677_v16  ;;  %v390_v55 = vpop.f32.mrb[9].mxu0  ;;  %4013 = vmatmul.mubr.msk.f32.gmra.mrb[114].mxu0 %vm105_vm0, %v88_v49  ;;  %v4725_v56 = vpack.c.bf16 %v753_v50, %v751_v42  ;;  %v94_v49 = vld [vmem:[%s7334_s0 + $0x1f8] sm:$0xff] }
  0xe9   :  { %v4727_v57 = vsub.f32 %v754_v51, %v753_v50  ;;  %v391_v58 = vadd.f32 %v390_v55, %v4680_v17  ;;  %710 = vmatprep.mubr.f32.mxu0 %v4298_v2  ;;  %v4734_v60 = vpack.c.bf16 %v754_v51, %v752_v43 }
  0xea   :  { %v755_v61 = vmax.f32 %v389_v54, 0.0 }
  0xeb   :  { %v756_v62 = vmax.f32 %v391_v58, 0.0  ;;  %v394_v63 = vpop.f32.mrb[10].mxu0 }
  0xec   :  { %v395_v0 = vadd.f32 %v394_v63, %v4677_v16  ;;  %v396_v1 = vpop.f32.mrb[11].mxu0  ;;  %4014 = vmatmul.mubr.msk.f32.gmra.mrb[116].mxu0 %vm105_vm0, %v89_v59 }
  0xed   :  { %v4738_v3 = vsub.f32 %v756_v62, %v755_v61  ;;  %v397_v4 = vadd.f32 %v396_v1, %v4680_v17  ;;  %716 = vmatprep.mubr.f32.mxu0 %v4298_v2 }
  0xee   :  { %v757_v6 = vmax.f32 %v395_v0, 0.0  ;;  %v4243_v0 = vld [vmem:[%s7336_s3 + $0x14] ss:$8 sps:$4 sm:$0xff]  }
  0xef   :  { %v758_v7 = vmax.f32 %v397_v4, 0.0  ;;  %v400_v8 = vpop.f32.mrb[12].mxu0 }
  0xf0   :  { %v401_v9 = vadd.f32 %v400_v8, %v4677_v16  ;;  %v402_v11 = vpop.f32.mrb[13].mxu0  ;;  %4015 = vmatmul.mubr.msk.f32.gmra.mrb[118].mxu0 %vm105_vm0, %v90_v5  ;;  %v4747_v12 = vpack.c.bf16 %v757_v6, %v755_v61 }
  0xf1   :  { %v4749_v13 = vsub.f32 %v758_v7, %v757_v6  ;;  %v403_v14 = vadd.f32 %v402_v11, %v4680_v17  ;;  %722 = vmatprep.mubr.f32.mxu0 %v4298_v2  ;;  %v4756_v18 = vpack.c.bf16 %v758_v7, %v756_v62 }
  0xf2   :  { %v759_v19 = vmax.f32 %v401_v9, 0.0  ;;  %v4241_v9 = vld [vmem:[%s7336_s3 + $0x10] ss:$8 sps:$4 sm:$0xff]  }
  0xf3   :  { %v760_v20 = vmax.f32 %v403_v14, 0.0  ;;  %v406_v21 = vpop.f32.mrb[14].mxu0  ;;  %v4246_v14 = vld [vmem:[%s7336_s3 + $0x24] ss:$8 sps:$4 sm:$0xff]  }
  0xf4   :  { %v407_v22 = vadd.f32 %v406_v21, %v4677_v16  ;;  %v408_v23 = vpop.f32.mrb[15].mxu0  ;;  %4016 = vmatmul.mubr.msk.f32.gmra.mrb[120].mxu0 %vm105_vm0, %v91_v15 }
  0xf5   :  { %v4760_v24 = vsub.f32 %v760_v20, %v759_v19  ;;  %v409_v25 = vadd.f32 %v408_v23, %v4680_v17  ;;  %728 = vmatprep.mubr.f32.mxu0 %v4298_v2 }
  0xf6   :  { %v761_v27 = vmax.f32 %v407_v22, 0.0 }
  0xf7   :  { %v762_v28 = vmax.f32 %v409_v25, 0.0  ;;  %v412_v30 = vpop.f32.mrb[16].mxu0  ;;  %v4244_v25 = vld [vmem:[%s7336_s3 + $0x20] ss:$8 sps:$4 sm:$0xff]  }
  0xf8   :  { %v413_v31 = vadd.f32 %v412_v30, %v4677_v16  ;;  %v414_v32 = vpop.f32.mrb[17].mxu0  ;;  %4017 = vmatmul.mubr.msk.f32.gmra.mrb[122].mxu0 %vm105_vm0, %v92_v26  ;;  %v4769_v33 = vpack.c.bf16 %v761_v27, %v759_v19 }
  0xf9   :  { %v4771_v34 = vsub.f32 %v762_v28, %v761_v27  ;;  %v415_v36 = vadd.f32 %v414_v32, %v4680_v17  ;;  %734 = vmatprep.mubr.f32.mxu0 %v4298_v2  ;;  %v4778_v40 = vpack.c.bf16 %v762_v28, %v760_v20  ;;  %v4249_v28 = vld [vmem:[%s7336_s3 + $0x34] ss:$8 sps:$4 sm:$0xff]   ;;  %v4247_v32 = vld [vmem:[%s7336_s3 + $0x30] ss:$8 sps:$4 sm:$0xff]  }
  0xfa   :  { %v763_v41 = vmax.f32 %v413_v31, 0.0 }
  0xfb   :  { %v764_v42 = vmax.f32 %v415_v36, 0.0  ;;  %v418_v43 = vpop.f32.mrb[18].mxu0 }
  0xfc   :  { %v419_v44 = vadd.f32 %v418_v43, %v4677_v16  ;;  %v420_v45 = vpop.f32.mrb[19].mxu0  ;;  %4018 = vmatmul.mubr.msk.f32.gmra.mrb[124].mxu0 %vm105_vm0, %v93_v37 }
  0xfd   :  { %v4782_v46 = vsub.f32 %v764_v42, %v763_v41  ;;  %v421_v48 = vadd.f32 %v420_v45, %v4680_v17  ;;  %740 = vmatprep.mubr.f32.mxu0 %v4298_v2  ;;  %v4238_v2 = vld [vmem:[%s7336_s3] ss:$8 sps:$4 sm:$0xff]  }
  0xfe   :  { %v765_v50 = vmax.f32 %v419_v44, 0.0 }
  0xff   :  { %v766_v51 = vmax.f32 %v421_v48, 0.0  ;;  %v424_v53 = vpop.f32.mrb[20].mxu0 }
 0x100   :  { %v425_v54 = vadd.f32 %v424_v53, %v4677_v16  ;;  %v426_v55 = vpop.f32.mrb[21].mxu0  ;;  %4019 = vmatmul.mubr.msk.f32.gmra.mrb[126].mxu0 %vm105_vm0, %v94_v49  ;;  %v4791_v58 = vpack.c.bf16 %v765_v50, %v763_v41  ;;  %v4252_v41 = vld [vmem:[%s7336_s3 + $0x44] ss:$8 sps:$4 sm:$0xff]   ;;  %v4250_v49 = vld [vmem:[%s7336_s3 + $0x40] ss:$8 sps:$4 sm:$0xff]  }
 0x101   :  { %v4793_v59 = vsub.f32 %v766_v51, %v765_v50  ;;  %v427_v61 = vadd.f32 %v426_v55, %v4680_v17  ;;  %1171 = vmatprep.mubr.bf16.mxu0 %v7342_v52  ;;  %v4800_v62 = vpack.c.bf16 %v766_v51, %v764_v42  ;;  %v4842_v42 = vld [vmem:[%s7338_s4] sm:$0xff]  }
 0x102   :  { %v767_v63 = vmax.f32 %v425_v54, 0.0  ;;  %4116 = vmatprep.subr.bf16.mxu1 %v4842_v42  ;;  %v4255_v54 = vld [vmem:[%s7336_s3 + $0x54] ss:$8 sps:$4 sm:$0xff]  }
 0x103   :  { %v768_v1 = vmax.f32 %v427_v61, 0.0  ;;  %v430_v4 = vpop.f32.mrb[22].mxu0 }
 0x104   :  { %v431_v5 = vadd.f32 %v430_v4, %v4677_v16  ;;  %v432_v6 = vpop.f32.mrb[23].mxu0  ;;  %1172 = vmatmul.mubr.bf16.vlgmr.msra.gmra.mrb[128].mxu0 %v4701_v35 }
 0x105   :  { %v4807_v7 = vsub.f32 %v768_v1, %v767_v63  ;;  %v433_v8 = vadd.f32 %v432_v6, %v4680_v17  ;;  %1181 = vmatprep.mubr.bf16.mxu0 %v7342_v52  ;;  %1757 = vmatpush1.bf16.msra.mxu0 %v4238_v2 }
 0x106   :  { %v769_v11 = vmax.f32 %v431_v5, 0.0  ;;  %1758 = vmatprep.subr.bf16.mxu0 %v4243_v0 }
 0x107   :  { %7423 = vst [vmem:[#allocation3_spill] sm:$0xff] %v4807_v7  ;;  %v770_v15 = vmax.f32 %v433_v8, 0.0  ;;  %v436_v19 = vpop.f32.mrb[24].mxu0 }
 0x108   :  { %v437_v35 = vadd.f32 %v436_v19, %v4677_v16  ;;  %v438_v20 = vpop.f32.mrb[25].mxu0  ;;  %v4818_v21 = vpack.c.bf16 %v769_v11, %v767_v63 }
 0x109   :  { %v4820_v22 = vsub.f32 %v770_v15, %v769_v11  ;;  %v439_v23 = vadd.f32 %v438_v20, %v4680_v17  ;;  %1759 = vmatpush1.bf16.msra.mxu0 %v4241_v9  ;;  %v4826_v26 = vpack.c.bf16 %v770_v15, %v768_v1  ;;  %v4253_v9 = vld [vmem:[%s7336_s3 + $0x50] ss:$8 sps:$4 sm:$0xff]  }
 0x10a   :  { %v771_v27 = vmax.f32 %v437_v35, 0.0  ;;  %1760 = vmatprep.subr.bf16.mxu0 %v4246_v14  ;;  %v4258_v14 = vld [vmem:[%s7336_s3 + $0x64] ss:$8 sps:$4 sm:$0xff]  }
 0x10b   :  { %7424 = vst [vmem:[#allocation4_spill] sm:$0xff] %v4820_v22  ;;  %v772_v30 = vmax.f32 %v439_v23, 0.0  ;;  %v442_v31 = vpop.f32.mrb[26].mxu0 }
 0x10c   :  { %v443_v36 = vadd.f32 %v442_v31, %v4677_v16  ;;  %v444_v37 = vpop.f32.mrb[27].mxu0  ;;  %1182 = vmatmul.mubr.bf16.gmra.mrb[132].mxu0 %v4725_v56  ;;  %v4261_v31 = vld [vmem:[%s7336_s3 + $0x74] ss:$8 sps:$4 sm:$0xff]  }
 0x10d   :  { %v4844_v43 = vsub.f32 %v772_v30, %v771_v27  ;;  %v445_v44 = vadd.f32 %v444_v37, %v4680_v17  ;;  %1191 = vmatprep.mubr.bf16.mxu0 %v7342_v52  ;;  %1761 = vmatpush1.bf16.msra.mxu0 %v4244_v25 }
 0x10e   :  { %v773_v45 = vmax.f32 %v443_v36, 0.0  ;;  %1762 = vmatprep.subr.bf16.mxu0 %v4249_v28 }
 0x10f   :  { %7425 = vst [vmem:[#allocation5_spill] sm:$0xff] %v4844_v43  ;;  %v774_v56 = vmax.f32 %v445_v44, 0.0  ;;  %v448_v48 = vpop.f32.mrb[28].mxu0 }
 0x110   :  { %v449_v50 = vadd.f32 %v448_v48, %v4677_v16  ;;  %v450_v51 = vpop.f32.mrb[29].mxu0  ;;  %v4853_v53 = vpack.c.bf16 %v773_v45, %v771_v27  ;;  %v4256_v27 = vld [vmem:[%s7336_s3 + $0x60] ss:$8 sps:$4 sm:$0xff]  }
 0x111   :  { %v4858_v55 = vsub.f32 %v774_v56, %v773_v45  ;;  %v451_v61 = vadd.f32 %v450_v51, %v4680_v17  ;;  %1763 = vmatpush1.bf16.msra.mxu0 %v4247_v32  ;;  %v4861_v2 = vpack.c.bf16 %v774_v56, %v772_v30  ;;  %v4259_v56 = vld [vmem:[%s7336_s3 + $0x70] ss:$8 sps:$4 sm:$0xff]  }
 0x112   :  { %v775_v63 = vmax.f32 %v449_v50, 0.0  ;;  %1764 = vmatprep.subr.bf16.mxu0 %v4252_v41 }
 0x113   :  { %7426 = vst [vmem:[#allocation6_spill] sm:$0xff] %v4858_v55  ;;  %v776_v0 = vmax.f32 %v451_v61, 0.0  ;;  %v454_v1 = vpop.f32.mrb[30].mxu0 }
 0x114   :  { %v455_v4 = vadd.f32 %v454_v1, %v4677_v16  ;;  %v456_v5 = vpop.f32.mrb[31].mxu0  ;;  %1192 = vmatmul.mubr.bf16.gmra.mrb[136].mxu0 %v4747_v12 }
 0x115   :  { %v4865_v6 = vsub.f32 %v776_v0, %v775_v63  ;;  %v457_v8 = vadd.f32 %v456_v5, %v4680_v17  ;;  %1201 = vmatprep.mubr.bf16.mxu0 %v7342_v52  ;;  %1765 = vmatpush1.bf16.msra.mxu0 %v4250_v49 }
 0x116   :  { %v777_v11 = vmax.f32 %v455_v4, 0.0  ;;  %1766 = vmatprep.subr.bf16.mxu0 %v4255_v54 }
 0x117   :  { %7427 = vst [vmem:[#allocation7_spill] sm:$0xff] %v4865_v6  ;;  %v778_v15 = vmax.f32 %v457_v8, 0.0  ;;  %v460_v19 = vpop.f32.mrb[32].mxu0 }
 0x118   :  { %v461_v12 = vadd.f32 %v460_v19, %v4677_v16  ;;  %v462_v35 = vpop.f32.mrb[33].mxu0  ;;  %v4876_v20 = vpack.c.bf16 %v777_v11, %v775_v63 }
 0x119   :  { %v4878_v23 = vsub.f32 %v778_v15, %v777_v11  ;;  %v463_v25 = vadd.f32 %v462_v35, %v4680_v17  ;;  %1767 = vmatpush1.bf16.msra.mxu0 %v4253_v9  ;;  %v4884_v28 = vpack.c.bf16 %v778_v15, %v776_v0 }
 0x11a   :  { %v779_v30 = vmax.f32 %v461_v12, 0.0  ;;  %1768 = vmatprep.subr.bf16.mxu0 %v4258_v14 }
 0x11b   :  { %7428 = vst [vmem:[#allocation8_spill] sm:$0xff] %v4878_v23  ;;  %v780_v32 = vmax.f32 %v463_v25, 0.0  ;;  %v466_v36 = vpop.f32.mrb[34].mxu0 }
 0x11c   :  { %v467_v37 = vadd.f32 %v466_v36, %v4677_v16  ;;  %v468_v41 = vpop.f32.mrb[35].mxu0  ;;  %1202 = vmatmul.mubr.bf16.gmra.mrb[140].mxu0 %v4769_v33 }
 0x11d   :  { %v4891_v44 = vsub.f32 %v780_v32, %v779_v30  ;;  %v469_v45 = vadd.f32 %v468_v41, %v4680_v17  ;;  %1211 = vmatprep.mubr.bf16.mxu0 %v7342_v52  ;;  %1769 = vmatpush1.bf16.msra.mxu0 %v4256_v27 }
 0x11e   :  { %v781_v48 = vmax.f32 %v467_v37, 0.0  ;;  %1770 = vmatprep.subr.bf16.mxu0 %v4261_v31 }
 0x11f   :  { %7429 = vst [vmem:[#allocation9_spill] sm:$0xff] %v4891_v44  ;;  %v782_v49 = vmax.f32 %v469_v45, 0.0  ;;  %v472_v50 = vpop.f32.mrb[36].mxu0 }
 0x120   :  { %v473_v51 = vadd.f32 %v472_v50, %v4677_v16  ;;  %v474_v54 = vpop.f32.mrb[37].mxu0  ;;  %v4899_v61 = vpack.c.bf16 %v781_v48, %v779_v30  ;;  %v4263_v30 = vld [vmem:[%s7338_s4 + $0x8] sm:$0xff]  }
 0x121   :  { %v4901_v33 = vsub.f32 %v782_v49, %v781_v48  ;;  %v475_v63 = vadd.f32 %v474_v54, %v4680_v17  ;;  %1771 = vmatpush1.bf16.msra.mxu0 %v4259_v56  ;;  %v4904_v0 = vpack.c.bf16 %v782_v49, %v780_v32 }
 0x122   :  { %v783_v1 = vmax.f32 %v473_v51, 0.0 }
 0x123   :  { %7430 = vst [vmem:[#allocation10_spill] sm:$0xff] %v4901_v33  ;;  %v784_v4 = vmax.f32 %v475_v63, 0.0  ;;  %v478_v5 = vpop.f32.mrb[38].mxu0 }
 0x124   :  { %v479_v8 = vadd.f32 %v478_v5, %v4677_v16  ;;  %v480_v9 = vpop.f32.mrb[39].mxu0  ;;  %1212 = vmatmul.mubr.bf16.gmra.mrb[144].mxu0 %v4791_v58 }
 0x125   :  { %v4908_v11 = vsub.f32 %v784_v4, %v783_v1  ;;  %v481_v14 = vadd.f32 %v480_v9, %v4680_v17  ;;  %1221 = vmatprep.mubr.bf16.mxu0 %v7342_v52 }
 0x126   :  { %v785_v15 = vmax.f32 %v479_v8, 0.0 }
 0x127   :  { %7431 = vst [vmem:[#allocation11_spill] sm:$0xff] %v4908_v11  ;;  %v786_v19 = vmax.f32 %v481_v14, 0.0  ;;  %v484_v12 = vpop.f32.mrb[40].mxu0 }
 0x128   :  { %v1012_v35 = vpack.c.bf16 %v785_v15, %v783_v1  ;;  %v485_v25 = vadd.f32 %v484_v12, %v4677_v16  ;;  %v486_v27 = vpop.f32.mrb[41].mxu0 }
 0x129   :  { %v4916_v31 = vsub.f32 %v786_v19, %v785_v15  ;;  %v4918_v58 = vpack.c.bf16 %v786_v19, %v784_v4  ;;  %v487_v32 = vadd.f32 %v486_v27, %v4680_v17 }
 0x12a   :  { %v787_v36 = vmax.f32 %v485_v25, 0.0  ;;  %1262 = vmatmul.mubr.bf16.vlgmr.msra.gmra.mrb[0].mxu1 %v1012_v35 }
 0x12b   :  { %7432 = vst [vmem:[#allocation12_spill] sm:$0xff] %v4916_v31  ;;  %v788_v37 = vmax.f32 %v487_v32, 0.0  ;;  %v490_v41 = vpop.f32.mrb[42].mxu0  ;;  %1271 = vmatprep.mubr.bf16.mxu1 %v7342_v52  ;;  %4117 = vmatpush3.bf16.msra.mxu1 %v4842_v42 }
 0x12c   :  { %v491_v45 = vadd.f32 %v490_v41, %v4677_v16  ;;  %v492_v56 = vpop.f32.mrb[43].mxu0  ;;  %1222 = vmatmul.mubr.bf16.gmra.mrb[148].mxu0 %v4818_v21  ;;  %4118 = vmatprep.subr.bf16.mxu1 %v4263_v30  ;;  %v4264_v41 = vld [vmem:[%s7338_s4 + $0x10] sm:$0xff]  }
 0x12d   :  { %v4925_v48 = vsub.f32 %v788_v37, %v787_v36  ;;  %v493_v49 = vadd.f32 %v492_v56, %v4680_v17  ;;  %1231 = vmatprep.mubr.bf16.mxu0 %v7342_v52 }
 0x12e   :  { %v789_v50 = vmax.f32 %v491_v45, 0.0 }
 0x12f   :  { %7433 = vst [vmem:[#allocation13_spill] sm:$0xff] %v4925_v48  ;;  %v790_v51 = vmax.f32 %v493_v49, 0.0  ;;  %v496_v54 = vpop.f32.mrb[44].mxu0  ;;  %4119 = vmatpush3.bf16.msra.mxu1 %v4263_v30 }
 0x130   :  { %v1013_v63 = vpack.c.bf16 %v789_v50, %v787_v36  ;;  %v497_v1 = vadd.f32 %v496_v54, %v4677_v16  ;;  %v498_v42 = vpop.f32.mrb[45].mxu0  ;;  %4120 = vmatprep.subr.bf16.mxu1 %v4264_v41 }
 0x131   :  { %v4930_v4 = vsub.f32 %v790_v51, %v789_v50  ;;  %v4932_v5 = vpack.c.bf16 %v790_v51, %v788_v37  ;;  %v499_v21 = vadd.f32 %v498_v42, %v4680_v17 }
 0x132   :  { %v791_v8 = vmax.f32 %v497_v1, 0.0  ;;  %1272 = vmatmul.mubr.bf16.gmra.mrb[4].mxu1 %v1013_v63 }
 0x133   :  { %7434 = vst [vmem:[#allocation14_spill] sm:$0xff] %v4930_v4  ;;  %v792_v9 = vmax.f32 %v499_v21, 0.0  ;;  %v502_v14 = vpop.f32.mrb[46].mxu0  ;;  %1281 = vmatprep.mubr.bf16.mxu1 %v7342_v52  ;;  %4121 = vmatpush3.bf16.msra.mxu1 %v4264_v41 }
 0x134   :  { %v503_v15 = vadd.f32 %v502_v14, %v4677_v16  ;;  %v504_v19 = vpop.f32.mrb[47].mxu0  ;;  %1232 = vmatmul.mubr.bf16.gmra.mrb[152].mxu0 %v4853_v53 }
 0x135   :  { %v4938_v12 = vsub.f32 %v792_v9, %v791_v8  ;;  %v505_v35 = vadd.f32 %v504_v19, %v4680_v17  ;;  %1241 = vmatprep.mubr.bf16.mxu0 %v7342_v52 }
 0x136   :  { %v793_v25 = vmax.f32 %v503_v15, 0.0 }
 0x137   :  { %7435 = vst [vmem:[#allocation15_spill] sm:$0xff] %v4938_v12  ;;  %v794_v27 = vmax.f32 %v505_v35, 0.0  ;;  %v508_v30 = vpop.f32.mrb[48].mxu0 }
 0x138   :  { %v1014_v32 = vpack.c.bf16 %v793_v25, %v791_v8  ;;  %v509_v36 = vadd.f32 %v508_v30, %v4677_v16  ;;  %v510_v37 = vpop.f32.mrb[49].mxu0 }
 0x139   :  { %v4946_v45 = vsub.f32 %v794_v27, %v793_v25  ;;  %v4948_v53 = vpack.c.bf16 %v794_v27, %v792_v9  ;;  %v511_v56 = vadd.f32 %v510_v37, %v4680_v17 }
 0x13a   :  { %v795_v49 = vmax.f32 %v509_v36, 0.0  ;;  %1282 = vmatmul.mubr.bf16.gmra.mrb[8].mxu1 %v1014_v32 }
 0x13b   :  { %7436 = vst [vmem:[#allocation16_spill] sm:$0xff] %v4946_v45  ;;  %v796_v50 = vmax.f32 %v511_v56, 0.0  ;;  %v514_v51 = vpop.f32.mrb[50].mxu0  ;;  %1291 = vmatprep.mubr.bf16.mxu1 %v7342_v52 }
 0x13c   :  { %v515_v54 = vadd.f32 %v514_v51, %v4677_v16  ;;  %v516_v63 = vpop.f32.mrb[51].mxu0  ;;  %1242 = vmatmul.mubr.bf16.gmra.mrb[156].mxu0 %v4876_v20 }
 0x13d   :  { %v4954_v1 = vsub.f32 %v796_v50, %v795_v49  ;;  %v517_v42 = vadd.f32 %v516_v63, %v4680_v17  ;;  %1251 = vmatprep.mubr.bf16.mxu0 %v7342_v52 }
 0x13e   :  { %v797_v21 = vmax.f32 %v515_v54, 0.0 }
 0x13f   :  { %7437 = vst [vmem:[#allocation17_spill] sm:$0xff] %v4954_v1  ;;  %v798_v8 = vmax.f32 %v517_v42, 0.0  ;;  %v520_v9 = vpop.f32.mrb[52].mxu0 }
 0x140   :  { %v1015_v14 = vpack.c.bf16 %v797_v21, %v795_v49  ;;  %v521_v15 = vadd.f32 %v520_v9, %v4677_v16  ;;  %v522_v19 = vpop.f32.mrb[53].mxu0 }
 0x141   :  { %v4959_v35 = vsub.f32 %v798_v8, %v797_v21  ;;  %v4961_v25 = vpack.c.bf16 %v798_v8, %v796_v50  ;;  %v523_v27 = vadd.f32 %v522_v19, %v4680_v17 }
 0x142   :  { %v799_v20 = vmax.f32 %v521_v15, 0.0  ;;  %1292 = vmatmul.mubr.bf16.gmra.mrb[12].mxu1 %v1015_v14 }
 0x143   :  { %7438 = vst [vmem:[#allocation18_spill] sm:$0xff] %v4959_v35  ;;  %v800_v30 = vmax.f32 %v523_v27, 0.0  ;;  %v526_v32 = vpop.f32.mrb[54].mxu0  ;;  %1301 = vmatprep.mubr.bf16.mxu1 %v7342_v52 }
 0x144   :  { %v527_v36 = vadd.f32 %v526_v32, %v4677_v16  ;;  %v528_v37 = vpop.f32.mrb[55].mxu0  ;;  %1252 = vmatmul.mubr.bf16.gmra.mrb[160].mxu0 %v4899_v61 }
 0x145   :  { %v4967_v41 = vsub.f32 %v800_v30, %v799_v20  ;;  %v529_v56 = vadd.f32 %v528_v37, %v4680_v17  ;;  %1788 = vmatprep.mubr.bf16.mxu0 %v7342_v52 }
 0x146   :  { %v801_v49 = vmax.f32 %v527_v36, 0.0 }
 0x147   :  { %7439 = vst [vmem:[#allocation19_spill] sm:$0xff] %v4967_v41  ;;  %v802_v50 = vmax.f32 %v529_v56, 0.0  ;;  %v532_v51 = vpop.f32.mrb[56].mxu0  ;;  %v4265_v56 = vld [vmem:[%s7338_s4 + $0x18] sm:$0xff]  }
 0x148   :  { %v1016_v54 = vpack.c.bf16 %v801_v49, %v799_v20  ;;  %v533_v63 = vadd.f32 %v532_v51, %v4677_v16  ;;  %v534_v42 = vpop.f32.mrb[57].mxu0  ;;  %4122 = vmatprep.subr.bf16.mxu1 %v4265_v56 }
 0x149   :  { %v4972_v21 = vsub.f32 %v802_v50, %v801_v49  ;;  %v4974_v8 = vpack.c.bf16 %v802_v50, %v800_v30  ;;  %v535_v9 = vadd.f32 %v534_v42, %v4680_v17  ;;  %4123 = vmatpush3.bf16.msra.mxu1 %v4265_v56 }
 0x14a   :  { %v803_v61 = vmax.f32 %v533_v63, 0.0  ;;  %1302 = vmatmul.mubr.bf16.gmra.mrb[16].mxu1 %v1016_v54 }
 0x14b   :  { %7440 = vst [vmem:[#allocation20_spill] sm:$0xff] %v4972_v21  ;;  %v804_v14 = vmax.f32 %v535_v9, 0.0  ;;  %v538_v15 = vpop.f32.mrb[58].mxu0  ;;  %1311 = vmatprep.mubr.bf16.mxu1 %v7342_v52 }
 0x14c   :  { %v539_v19 = vadd.f32 %v538_v15, %v4677_v16  ;;  %v540_v27 = vpop.f32.mrb[59].mxu0  ;;  %1789 = vmatmul.mubr.bf16.vlgmr.msra.gmra.mrb[164].mxu0 %v4707_v39 }
 0x14d   :  { %v4980_v20 = vsub.f32 %v804_v14, %v803_v61  ;;  %v541_v32 = vadd.f32 %v540_v27, %v4680_v17  ;;  %1798 = vmatprep.mubr.bf16.mxu0 %v7342_v52 }
 0x14e   :  { %v805_v30 = vmax.f32 %v539_v19, 0.0 }
 0x14f   :  { %7441 = vst [vmem:[#allocation21_spill] sm:$0xff] %v4980_v20  ;;  %v806_v36 = vmax.f32 %v541_v32, 0.0  ;;  %v544_v37 = vpop.f32.mrb[60].mxu0 }
 0x150   :  { %v1017_v49 = vpack.c.bf16 %v805_v30, %v803_v61  ;;  %v545_v50 = vadd.f32 %v544_v37, %v4677_v16  ;;  %v546_v51 = vpop.f32.mrb[61].mxu0 }
 0x151   :  { %v4988_v54 = vsub.f32 %v806_v36, %v805_v30  ;;  %v4990_v39 = vpack.c.bf16 %v806_v36, %v804_v14  ;;  %v547_v63 = vadd.f32 %v546_v51, %v4680_v17  ;;  %v4266_v30 = vld [vmem:[%s7338_s4 + $0x20] sm:$0xff]  }
 0x152   :  { %v807_v42 = vmax.f32 %v545_v50, 0.0  ;;  %1312 = vmatmul.mubr.bf16.gmra.mrb[20].mxu1 %v1017_v49  ;;  %4124 = vmatprep.subr.bf16.mxu1 %v4266_v30 }
 0x153   :  { %7442 = vst [vmem:[#allocation22_spill] sm:$0xff] %v4988_v54  ;;  %v808_v9 = vmax.f32 %v547_v63, 0.0  ;;  %v550_v15 = vpop.f32.mrb[62].mxu0  ;;  %1321 = vmatprep.mubr.bf16.mxu1 %v7342_v52  ;;  %4125 = vmatpush3.bf16.msra.mxu1 %v4266_v30 }
 0x154   :  { %v551_v19 = vadd.f32 %v550_v15, %v4677_v16  ;;  %v552_v61 = vpop.f32.mrb[63].mxu0  ;;  %1799 = vmatmul.mubr.bf16.gmra.mrb[168].mxu0 %v4734_v60 }
 0x155   :  { %v4996_v27 = vsub.f32 %v808_v9, %v807_v42  ;;  %v553_v14 = vadd.f32 %v552_v61, %v4680_v17  ;;  %1808 = vmatprep.mubr.bf16.mxu0 %v7342_v52 }
 0x156   :  { %v809_v32 = vmax.f32 %v551_v19, 0.0  ;;  %v4267_v19 = vld [vmem:[%s7338_s4 + $0x28] sm:$0xff]  }
 0x157   :  { %7443 = vst [vmem:[#allocation23_spill] sm:$0xff] %v4996_v27  ;;  %v810_v36 = vmax.f32 %v553_v14, 0.0  ;;  %v556_v37 = vpop.f32.mrb[64].mxu0  ;;  %4126 = vmatprep.subr.bf16.mxu1 %v4267_v19 }
 0x158   :  { %v1018_v49 = vpack.c.bf16 %v809_v32, %v807_v42  ;;  %v557_v56 = vadd.f32 %v556_v37, %v4677_v16  ;;  %v558_v50 = vpop.f32.mrb[65].mxu0  ;;  %4127 = vmatpush3.bf16.msra.mxu1 %v4267_v19 }
 0x159   :  { %v5004_v51 = vsub.f32 %v810_v36, %v809_v32  ;;  %v5006_v60 = vpack.c.bf16 %v810_v36, %v808_v9  ;;  %v559_v63 = vadd.f32 %v558_v50, %v4680_v17  ;;  %v4268_v36 = vld [vmem:[%s7338_s4 + $0x30] sm:$0xff]  }
 0x15a   :  { %v811_v15 = vmax.f32 %v557_v56, 0.0  ;;  %1322 = vmatmul.mubr.bf16.gmra.mrb[24].mxu1 %v1018_v49  ;;  %4128 = vmatprep.subr.bf16.mxu1 %v4268_v36 }
 0x15b   :  { %7444 = vst [vmem:[#allocation24_spill] sm:$0xff] %v5004_v51  ;;  %v812_v61 = vmax.f32 %v559_v63, 0.0  ;;  %v562_v14 = vpop.f32.mrb[66].mxu0  ;;  %1331 = vmatprep.mubr.bf16.mxu1 %v7342_v52 }
 0x15c   :  { %v563_v42 = vadd.f32 %v562_v14, %v4677_v16  ;;  %v564_v37 = vpop.f32.mrb[67].mxu0  ;;  %1809 = vmatmul.mubr.bf16.gmra.mrb[172].mxu0 %v4756_v18  ;;  %4129 = vmatpush3.bf16.msra.mxu1 %v4268_v36 }
 0x15d   :  { %v5015_v9 = vsub.f32 %v812_v61, %v811_v15  ;;  %v565_v32 = vadd.f32 %v564_v37, %v4680_v17  ;;  %1818 = vmatprep.mubr.bf16.mxu0 %v7342_v52 }
 0x15e   :  { %v813_v30 = vmax.f32 %v563_v42, 0.0  ;;  %v4269_v42 = vld [vmem:[%s7338_s4 + $0x38] sm:$0xff]  }
 0x15f   :  { %7445 = vst [vmem:[#allocation25_spill] sm:$0xff] %v5015_v9  ;;  %v814_v49 = vmax.f32 %v565_v32, 0.0  ;;  %v568_v56 = vpop.f32.mrb[68].mxu0  ;;  %4130 = vmatprep.subr.bf16.mxu1 %v4269_v42 }
 0x160   :  { %v1019_v50 = vpack.c.bf16 %v813_v30, %v811_v15  ;;  %v569_v63 = vadd.f32 %v568_v56, %v4677_v16  ;;  %v570_v14 = vpop.f32.mrb[69].mxu0  ;;  %v7447_v15 = vmov 0   ;;  %4131 = vmatpush3.bf16.msra.mxu1 %v4269_v42 }
 0x161   :  { %v5023_v18 = vsub.f32 %v814_v49, %v813_v30  ;;  %v5025_v9 = vpack.c.bf16 %v814_v49, %v812_v61  ;;  %v571_v37 = vadd.f32 %v570_v14, %v4680_v17 }
 0x162   :  { %v815_v19 = vmax.f32 %v569_v63, 0.0  ;;  %1332 = vmatmul.mubr.bf16.gmra.mrb[28].mxu1 %v1019_v50 }
 0x163   :  { %7446 = vst [vmem:[#allocation26_spill] sm:$0xff] %v5023_v18  ;;  %v816_v32 = vmax.f32 %v571_v37, 0.0  ;;  %v574_v52 = vpop.f32.mrb[70].mxu0  ;;  %1341 = vmatprep.mubr.bf16.mxu1 %v7447_v15 }
 0x164   :  { %v575_v56 = vadd.f32 %v574_v52, %v4677_v16  ;;  %v576_v51 = vpop.f32.mrb[71].mxu0  ;;  %1819 = vmatmul.mubr.bf16.gmra.mrb[176].mxu0 %v4778_v40 }
 0x165   :  { %v5034_v61 = vsub.f32 %v816_v32, %v815_v19  ;;  %v577_v30 = vadd.f32 %v576_v51, %v4680_v17  ;;  %1828 = vmatprep.mubr.bf16.mxu0 %v7447_v15 }
 0x166   :  { %v817_v36 = vmax.f32 %v575_v56, 0.0 }
 0x167   :  { %7448 = vst [vmem:[#allocation27_spill] sm:$0xff] %v5034_v61  ;;  %v818_v49 = vmax.f32 %v577_v30, 0.0  ;;  %v580_v50 = vpop.f32.mrb[72].mxu0 }
 0x168   :  { %v1020_v63 = vpack.c.bf16 %v817_v36, %v815_v19  ;;  %v581_v14 = vadd.f32 %v580_v50, %v4677_v16  ;;  %v582_v37 = vpop.f32.mrb[73].mxu0 }
 0x169   :  { %v5039_v18 = vsub.f32 %v818_v49, %v817_v36  ;;  %v5041_v52 = vpack.c.bf16 %v818_v49, %v816_v32  ;;  %v583_v40 = vadd.f32 %v582_v37, %v4680_v17 }
 0x16a   :  { %v819_v27 = vmax.f32 %v581_v14, 0.0  ;;  %1342 = vmatmul.mubr.bf16.gmra.mrb[32].mxu1 %v1020_v63 }
 0x16b   :  { %7449 = vst [vmem:[#allocation28_spill] sm:$0xff] %v5039_v18  ;;  %v820_v61 = vmax.f32 %v583_v40, 0.0  ;;  %v586_v51 = vpop.f32.mrb[74].mxu0  ;;  %1351 = vmatprep.mubr.bf16.mxu1 %v7447_v15 }
 0x16c   :  { %v587_v42 = vadd.f32 %v586_v51, %v4677_v16  ;;  %v588_v56 = vpop.f32.mrb[75].mxu0  ;;  %1829 = vmatmul.mubr.bf16.gmra.mrb[180].mxu0 %v4800_v62 }
 0x16d   :  { %v5047_v19 = vsub.f32 %v820_v61, %v819_v27  ;;  %v589_v30 = vadd.f32 %v588_v56, %v4680_v17  ;;  %1838 = vmatprep.mubr.bf16.mxu0 %v7447_v15 }
 0x16e   :  { %v821_v32 = vmax.f32 %v587_v42, 0.0 }
 0x16f   :  { %7450 = vst [vmem:[#allocation29_spill] sm:$0xff] %v5047_v19  ;;  %v822_v36 = vmax.f32 %v589_v30, 0.0  ;;  %v592_v49 = vpop.f32.mrb[76].mxu0 }
 0x170   :  { %v1021_v50 = vpack.c.bf16 %v821_v32, %v819_v27  ;;  %v593_v63 = vadd.f32 %v592_v49, %v4677_v16  ;;  %v594_v14 = vpop.f32.mrb[77].mxu0 }
 0x171   :  { %v5052_v37 = vsub.f32 %v822_v36, %v821_v32  ;;  %v5054_v40 = vpack.c.bf16 %v822_v36, %v820_v61  ;;  %v595_v51 = vadd.f32 %v594_v14, %v4680_v17 }
 0x172   :  { %v823_v62 = vmax.f32 %v593_v63, 0.0  ;;  %1352 = vmatmul.mubr.bf16.gmra.mrb[36].mxu1 %v1021_v50 }
 0x173   :  { %7451 = vst [vmem:[#allocation30_spill] sm:$0xff] %v5052_v37  ;;  %v824_v19 = vmax.f32 %v595_v51, 0.0  ;;  %v598_v18 = vpop.f32.mrb[78].mxu0  ;;  %1361 = vmatprep.mubr.bf16.mxu1 %v7447_v15 }
 0x174   :  { %v599_v42 = vadd.f32 %v598_v18, %v4677_v16  ;;  %v600_v56 = vpop.f32.mrb[79].mxu0  ;;  %1839 = vmatmul.mubr.bf16.gmra.mrb[184].mxu0 %v4826_v26 }
 0x175   :  { %v5060_v27 = vsub.f32 %v824_v19, %v823_v62  ;;  %v601_v30 = vadd.f32 %v600_v56, %v4680_v17  ;;  %1848 = vmatprep.mubr.bf16.mxu0 %v7447_v15 }
 0x176   :  { %v825_v61 = vmax.f32 %v599_v42, 0.0 }
 0x177   :  { %7452 = vst [vmem:[#allocation31_spill] sm:$0xff] %v5060_v27  ;;  %v826_v32 = vmax.f32 %v601_v30, 0.0  ;;  %v604_v36 = vpop.f32.mrb[80].mxu0 }
 0x178   :  { %v1022_v49 = vpack.c.bf16 %v825_v61, %v823_v62  ;;  %v605_v50 = vadd.f32 %v604_v36, %v4677_v16  ;;  %v606_v63 = vpop.f32.mrb[81].mxu0 }
 0x179   :  { %v5065_v14 = vsub.f32 %v826_v32, %v825_v61  ;;  %v5067_v51 = vpack.c.bf16 %v826_v32, %v824_v19  ;;  %v607_v18 = vadd.f32 %v606_v63, %v4680_v17 }
 0x17a   :  { %v827_v26 = vmax.f32 %v605_v50, 0.0  ;;  %1362 = vmatmul.mubr.bf16.gmra.mrb[40].mxu1 %v1022_v49 }
 0x17b   :  { %7453 = vst [vmem:[#allocation32_spill] sm:$0xff] %v5065_v14  ;;  %v828_v27 = vmax.f32 %v607_v18, 0.0  ;;  %v610_v37 = vpop.f32.mrb[82].mxu0  ;;  %1371 = vmatprep.mubr.bf16.mxu1 %v7447_v15 }
 0x17c   :  { %v611_v42 = vadd.f32 %v610_v37, %v4677_v16  ;;  %v612_v56 = vpop.f32.mrb[83].mxu0  ;;  %1849 = vmatmul.mubr.bf16.gmra.mrb[188].mxu0 %v4861_v2 }
 0x17d   :  { %v5073_v62 = vsub.f32 %v828_v27, %v827_v26  ;;  %v613_v30 = vadd.f32 %v612_v56, %v4680_v17  ;;  %1858 = vmatprep.mubr.bf16.mxu0 %v7447_v15 }
 0x17e   :  { %v829_v19 = vmax.f32 %v611_v42, 0.0 }
 0x17f   :  { %7454 = vst [vmem:[#allocation33_spill] sm:$0xff] %v5073_v62  ;;  %v830_v61 = vmax.f32 %v613_v30, 0.0  ;;  %v616_v32 = vpop.f32.mrb[84].mxu0 }
 0x180   :  { %v1023_v36 = vpack.c.bf16 %v829_v19, %v827_v26  ;;  %v617_v49 = vadd.f32 %v616_v32, %v4677_v16  ;;  %v618_v50 = vpop.f32.mrb[85].mxu0 }
 0x181   :  { %v5078_v63 = vsub.f32 %v830_v61, %v829_v19  ;;  %v5080_v18 = vpack.c.bf16 %v830_v61, %v828_v27  ;;  %v619_v37 = vadd.f32 %v618_v50, %v4680_v17 }
 0x182   :  { %v831_v2 = vmax.f32 %v617_v49, 0.0  ;;  %1372 = vmatmul.mubr.bf16.gmra.mrb[44].mxu1 %v1023_v36 }
 0x183   :  { %7455 = vst [vmem:[#allocation34_spill] sm:$0xff] %v5078_v63  ;;  %v832_v62 = vmax.f32 %v619_v37, 0.0  ;;  %v622_v14 = vpop.f32.mrb[86].mxu0  ;;  %1381 = vmatprep.mubr.bf16.mxu1 %v7447_v15 }
 0x184   :  { %v623_v42 = vadd.f32 %v622_v14, %v4677_v16  ;;  %v624_v56 = vpop.f32.mrb[87].mxu0  ;;  %1859 = vmatmul.mubr.bf16.gmra.mrb[192].mxu0 %v4884_v28 }
 0x185   :  { %v5086_v26 = vsub.f32 %v832_v62, %v831_v2  ;;  %v625_v30 = vadd.f32 %v624_v56, %v4680_v17  ;;  %1868 = vmatprep.mubr.bf16.mxu0 %v7447_v15 }
 0x186   :  { %v833_v27 = vmax.f32 %v623_v42, 0.0 }
 0x187   :  { %7456 = vst [vmem:[#allocation35_spill] sm:$0xff] %v5086_v26  ;;  %v834_v19 = vmax.f32 %v625_v30, 0.0  ;;  %v628_v61 = vpop.f32.mrb[88].mxu0 }
 0x188   :  { %v1024_v32 = vpack.c.bf16 %v833_v27, %v831_v2  ;;  %v629_v36 = vadd.f32 %v628_v61, %v4677_v16  ;;  %v630_v49 = vpop.f32.mrb[89].mxu0 }
 0x189   :  { %v5091_v50 = vsub.f32 %v834_v19, %v833_v27  ;;  %v5093_v37 = vpack.c.bf16 %v834_v19, %v832_v62  ;;  %v631_v14 = vadd.f32 %v630_v49, %v4680_v17 }
 0x18a   :  { %v835_v28 = vmax.f32 %v629_v36, 0.0  ;;  %1382 = vmatmul.mubr.bf16.gmra.mrb[48].mxu1 %v1024_v32 }
 0x18b   :  { %7457 = vst [vmem:[#allocation36_spill] sm:$0xff] %v5091_v50  ;;  %v836_v26 = vmax.f32 %v631_v14, 0.0  ;;  %v634_v63 = vpop.f32.mrb[90].mxu0  ;;  %1391 = vmatprep.mubr.bf16.mxu1 %v7447_v15 }
 0x18c   :  { %v635_v42 = vadd.f32 %v634_v63, %v4677_v16  ;;  %v636_v56 = vpop.f32.mrb[91].mxu0  ;;  %1869 = vmatmul.mubr.bf16.gmra.mrb[196].mxu0 %v4904_v0 }
 0x18d   :  { %v5099_v2 = vsub.f32 %v836_v26, %v835_v28  ;;  %v637_v30 = vadd.f32 %v636_v56, %v4680_v17  ;;  %1878 = vmatprep.mubr.bf16.mxu0 %v7447_v15 }
 0x18e   :  { %v837_v62 = vmax.f32 %v635_v42, 0.0 }
 0x18f   :  { %7458 = vst [vmem:[#allocation37_spill] sm:$0xff] %v5099_v2  ;;  %v838_v27 = vmax.f32 %v637_v30, 0.0  ;;  %v640_v19 = vpop.f32.mrb[92].mxu0 }
 0x190   :  { %v1025_v61 = vpack.c.bf16 %v837_v62, %v835_v28  ;;  %v641_v32 = vadd.f32 %v640_v19, %v4677_v16  ;;  %v642_v36 = vpop.f32.mrb[93].mxu0 }
 0x191   :  { %v5104_v49 = vsub.f32 %v838_v27, %v837_v62  ;;  %v5106_v14 = vpack.c.bf16 %v838_v27, %v836_v26  ;;  %v643_v63 = vadd.f32 %v642_v36, %v4680_v17 }
 0x192   :  { %v839_v0 = vmax.f32 %v641_v32, 0.0  ;;  %1392 = vmatmul.mubr.bf16.gmra.mrb[52].mxu1 %v1025_v61 }
 0x193   :  { %7459 = vst [vmem:[#allocation38_spill] sm:$0xff] %v5104_v49  ;;  %v840_v2 = vmax.f32 %v643_v63, 0.0  ;;  %v646_v50 = vpop.f32.mrb[94].mxu0  ;;  %1401 = vmatprep.mubr.bf16.mxu1 %v7447_v15 }
 0x194   :  { %v647_v42 = vadd.f32 %v646_v50, %v4677_v16  ;;  %v648_v56 = vpop.f32.mrb[95].mxu0  ;;  %1879 = vmatmul.mubr.bf16.gmra.mrb[200].mxu0 %v4918_v58 }
 0x195   :  { %v5112_v28 = vsub.f32 %v840_v2, %v839_v0  ;;  %v649_v30 = vadd.f32 %v648_v56, %v4680_v17  ;;  %1888 = vmatprep.mubr.bf16.mxu0 %v7447_v15 }
 0x196   :  { %v841_v26 = vmax.f32 %v647_v42, 0.0 }
 0x197   :  { %7460 = vst [vmem:[#allocation39_spill] sm:$0xff] %v5112_v28  ;;  %v842_v62 = vmax.f32 %v649_v30, 0.0  ;;  %v652_v27 = vpop.f32.mrb[96].mxu0 }
 0x198   :  { %v1026_v19 = vpack.c.bf16 %v841_v26, %v839_v0  ;;  %v653_v61 = vadd.f32 %v652_v27, %v4677_v16  ;;  %v654_v32 = vpop.f32.mrb[97].mxu0 }
 0x199   :  { %v5117_v36 = vsub.f32 %v842_v62, %v841_v26  ;;  %v5119_v63 = vpack.c.bf16 %v842_v62, %v840_v2  ;;  %v655_v50 = vadd.f32 %v654_v32, %v4680_v17 }
 0x19a   :  { %v843_v58 = vmax.f32 %v653_v61, 0.0  ;;  %1402 = vmatmul.mubr.bf16.gmra.mrb[56].mxu1 %v1026_v19 }
 0x19b   :  { %7461 = vst [vmem:[#allocation40_spill] sm:$0xff] %v5117_v36  ;;  %v844_v28 = vmax.f32 %v655_v50, 0.0  ;;  %v658_v49 = vpop.f32.mrb[98].mxu0  ;;  %1411 = vmatprep.mubr.bf16.mxu1 %v7447_v15 }
 0x19c   :  { %v659_v42 = vadd.f32 %v658_v49, %v4677_v16  ;;  %v660_v56 = vpop.f32.mrb[99].mxu0  ;;  %1889 = vmatmul.mubr.bf16.gmra.mrb[204].mxu0 %v4932_v5 }
 0x19d   :  { %v5125_v0 = vsub.f32 %v844_v28, %v843_v58  ;;  %v661_v30 = vadd.f32 %v660_v56, %v4680_v17  ;;  %1898 = vmatprep.mubr.bf16.mxu0 %v7447_v15 }
 0x19e   :  { %v845_v2 = vmax.f32 %v659_v42, 0.0 }
 0x19f   :  { %7462 = vst [vmem:[#allocation41_spill] sm:$0xff] %v5125_v0  ;;  %v846_v26 = vmax.f32 %v661_v30, 0.0  ;;  %v664_v62 = vpop.f32.mrb[100].mxu0 }
 0x1a0   :  { %v1027_v27 = vpack.c.bf16 %v845_v2, %v843_v58  ;;  %v665_v19 = vadd.f32 %v664_v62, %v4677_v16  ;;  %v666_v61 = vpop.f32.mrb[101].mxu0 }
 0x1a1   :  { %v5130_v32 = vsub.f32 %v846_v26, %v845_v2  ;;  %v5132_v50 = vpack.c.bf16 %v846_v26, %v844_v28  ;;  %v667_v49 = vadd.f32 %v666_v61, %v4680_v17 }
 0x1a2   :  { %v847_v5 = vmax.f32 %v665_v19, 0.0  ;;  %1412 = vmatmul.mubr.bf16.gmra.mrb[60].mxu1 %v1027_v27 }
 0x1a3   :  { %7463 = vst [vmem:[#allocation42_spill] sm:$0xff] %v5130_v32  ;;  %v848_v0 = vmax.f32 %v667_v49, 0.0  ;;  %v670_v36 = vpop.f32.mrb[102].mxu0  ;;  %1421 = vmatprep.mubr.bf16.mxu1 %v7447_v15 }
 0x1a4   :  { %v671_v42 = vadd.f32 %v670_v36, %v4677_v16  ;;  %v672_v56 = vpop.f32.mrb[103].mxu0  ;;  %1899 = vmatmul.mubr.bf16.gmra.mrb[208].mxu0 %v4948_v53 }
 0x1a5   :  { %v5138_v58 = vsub.f32 %v848_v0, %v847_v5  ;;  %v673_v30 = vadd.f32 %v672_v56, %v4680_v17  ;;  %1908 = vmatprep.mubr.bf16.mxu0 %v7447_v15 }
 0x1a6   :  { %v849_v28 = vmax.f32 %v671_v42, 0.0 }
 0x1a7   :  { %7464 = vst [vmem:[#allocation43_spill] sm:$0xff] %v5138_v58  ;;  %v850_v2 = vmax.f32 %v673_v30, 0.0  ;;  %v676_v26 = vpop.f32.mrb[104].mxu0 }
 0x1a8   :  { %v1028_v62 = vpack.c.bf16 %v849_v28, %v847_v5  ;;  %v677_v27 = vadd.f32 %v676_v26, %v4677_v16  ;;  %v678_v19 = vpop.f32.mrb[105].mxu0 }
 0x1a9   :  { %v5143_v61 = vsub.f32 %v850_v2, %v849_v28  ;;  %v5145_v49 = vpack.c.bf16 %v850_v2, %v848_v0  ;;  %v679_v36 = vadd.f32 %v678_v19, %v4680_v17 }
 0x1aa   :  { %v851_v53 = vmax.f32 %v677_v27, 0.0  ;;  %1422 = vmatmul.mubr.bf16.gmra.mrb[64].mxu1 %v1028_v62 }
 0x1ab   :  { %7465 = vst [vmem:[#allocation44_spill] sm:$0xff] %v5143_v61  ;;  %v852_v58 = vmax.f32 %v679_v36, 0.0  ;;  %v682_v32 = vpop.f32.mrb[106].mxu0  ;;  %1431 = vmatprep.mubr.bf16.mxu1 %v7447_v15 }
 0x1ac   :  { %v683_v42 = vadd.f32 %v682_v32, %v4677_v16  ;;  %v684_v56 = vpop.f32.mrb[107].mxu0  ;;  %1909 = vmatmul.mubr.bf16.gmra.mrb[212].mxu0 %v4961_v25 }
 0x1ad   :  { %v5151_v5 = vsub.f32 %v852_v58, %v851_v53  ;;  %v685_v30 = vadd.f32 %v684_v56, %v4680_v17  ;;  %1918 = vmatprep.mubr.bf16.mxu0 %v7447_v15 }
 0x1ae   :  { %v853_v0 = vmax.f32 %v683_v42, 0.0 }
 0x1af   :  { %7466 = vst [vmem:[#allocation45_spill] sm:$0xff] %v5151_v5  ;;  %v854_v28 = vmax.f32 %v685_v30, 0.0  ;;  %v688_v2 = vpop.f32.mrb[108].mxu0 }
 0x1b0   :  { %v1029_v26 = vpack.c.bf16 %v853_v0, %v851_v53  ;;  %v689_v62 = vadd.f32 %v688_v2, %v4677_v16  ;;  %v690_v27 = vpop.f32.mrb[109].mxu0 }
 0x1b1   :  { %v5156_v19 = vsub.f32 %v854_v28, %v853_v0  ;;  %v5158_v36 = vpack.c.bf16 %v854_v28, %v852_v58  ;;  %v691_v32 = vadd.f32 %v690_v27, %v4680_v17 }
 0x1b2   :  { %v855_v25 = vmax.f32 %v689_v62, 0.0  ;;  %1432 = vmatmul.mubr.bf16.gmra.mrb[68].mxu1 %v1029_v26 }
 0x1b3   :  { %7467 = vst [vmem:[#allocation46_spill] sm:$0xff] %v5156_v19  ;;  %v856_v5 = vmax.f32 %v691_v32, 0.0  ;;  %v694_v61 = vpop.f32.mrb[110].mxu0  ;;  %1441 = vmatprep.mubr.bf16.mxu1 %v7447_v15 }
 0x1b4   :  { %v695_v42 = vadd.f32 %v694_v61, %v4677_v16  ;;  %v696_v56 = vpop.f32.mrb[111].mxu0  ;;  %1919 = vmatmul.mubr.bf16.gmra.mrb[216].mxu0 %v4974_v8 }
 0x1b5   :  { %v5164_v53 = vsub.f32 %v856_v5, %v855_v25  ;;  %v697_v30 = vadd.f32 %v696_v56, %v4680_v17  ;;  %1928 = vmatprep.mubr.bf16.mxu0 %v7447_v15 }
 0x1b6   :  { %v857_v58 = vmax.f32 %v695_v42, 0.0 }
 0x1b7   :  { %7468 = vst [vmem:[#allocation47_spill] sm:$0xff] %v5164_v53  ;;  %v858_v0 = vmax.f32 %v697_v30, 0.0  ;;  %v700_v28 = vpop.f32.mrb[112].mxu0 }
 0x1b8   :  { %v1030_v2 = vpack.c.bf16 %v857_v58, %v855_v25  ;;  %v701_v26 = vadd.f32 %v700_v28, %v4677_v16  ;;  %v702_v62 = vpop.f32.mrb[113].mxu0 }
 0x1b9   :  { %v5169_v27 = vsub.f32 %v858_v0, %v857_v58  ;;  %v5171_v32 = vpack.c.bf16 %v858_v0, %v856_v5  ;;  %v703_v61 = vadd.f32 %v702_v62, %v4680_v17 }
 0x1ba   :  { %v859_v8 = vmax.f32 %v701_v26, 0.0  ;;  %1442 = vmatmul.mubr.bf16.gmra.mrb[72].mxu1 %v1030_v2 }
 0x1bb   :  { %7469 = vst [vmem:[#allocation48_spill] sm:$0xff] %v5169_v27  ;;  %v860_v53 = vmax.f32 %v703_v61, 0.0  ;;  %v706_v19 = vpop.f32.mrb[114].mxu0  ;;  %1451 = vmatprep.mubr.bf16.mxu1 %v7447_v15 }
 0x1bc   :  { %v707_v42 = vadd.f32 %v706_v19, %v4677_v16  ;;  %v708_v56 = vpop.f32.mrb[115].mxu0  ;;  %1929 = vmatmul.mubr.bf16.gmra.mrb[220].mxu0 %v4990_v39 }
 0x1bd   :  { %v5177_v25 = vsub.f32 %v860_v53, %v859_v8  ;;  %v709_v30 = vadd.f32 %v708_v56, %v4680_v17  ;;  %1938 = vmatprep.mubr.bf16.mxu0 %v7447_v15 }
 0x1be   :  { %v861_v5 = vmax.f32 %v707_v42, 0.0 }
 0x1bf   :  { %7470 = vst [vmem:[#allocation49_spill] sm:$0xff] %v5177_v25  ;;  %v862_v58 = vmax.f32 %v709_v30, 0.0  ;;  %v712_v0 = vpop.f32.mrb[116].mxu0 }
 0x1c0   :  { %v1031_v28 = vpack.c.bf16 %v861_v5, %v859_v8  ;;  %v713_v2 = vadd.f32 %v712_v0, %v4677_v16  ;;  %v714_v26 = vpop.f32.mrb[117].mxu0  ;;  %v4272_v0 = vld [vmem:[%s7339_s5 + $0x4] ss:$8 sps:$4 sm:$0xff]  }
 0x1c1   :  { %v5182_v62 = vsub.f32 %v862_v58, %v861_v5  ;;  %v5184_v61 = vpack.c.bf16 %v862_v58, %v860_v53  ;;  %v715_v19 = vadd.f32 %v714_v26, %v4680_v17  ;;  %3210 = vmatprep.subr.bf16.mxu1 %v4272_v0 }
 0x1c2   :  { %v863_v39 = vmax.f32 %v713_v2, 0.0  ;;  %1452 = vmatmul.mubr.bf16.gmra.mrb[76].mxu1 %v1031_v28 }
 0x1c3   :  { %7471 = vst [vmem:[#allocation50_spill] sm:$0xff] %v5182_v62  ;;  %v864_v25 = vmax.f32 %v715_v19, 0.0  ;;  %v718_v27 = vpop.f32.mrb[118].mxu0  ;;  %1461 = vmatprep.mubr.bf16.mxu1 %v7447_v15 }
 0x1c4   :  { %v719_v42 = vadd.f32 %v718_v27, %v4677_v16  ;;  %v720_v56 = vpop.f32.mrb[119].mxu0  ;;  %1939 = vmatmul.mubr.bf16.gmra.mrb[224].mxu0 %v5006_v60 }
 0x1c5   :  { %v5190_v8 = vsub.f32 %v864_v25, %v863_v39  ;;  %v721_v30 = vadd.f32 %v720_v56, %v4680_v17  ;;  %1948 = vmatprep.mubr.bf16.mxu0 %v7447_v15 }
 0x1c6   :  { %v865_v53 = vmax.f32 %v719_v42, 0.0 }
 0x1c7   :  { %7472 = vst [vmem:[#allocation51_spill] sm:$0xff] %v5190_v8  ;;  %v866_v5 = vmax.f32 %v721_v30, 0.0  ;;  %v724_v58 = vpop.f32.mrb[120].mxu0 }
 0x1c8   :  { %v1032_v28 = vpack.c.bf16 %v865_v53, %v863_v39  ;;  %v725_v2 = vadd.f32 %v724_v58, %v4677_v16  ;;  %v726_v27 = vpop.f32.mrb[121].mxu0 }
 0x1c9   :  { %v5198_v26 = vsub.f32 %v866_v5, %v865_v53  ;;  %v5200_v60 = vpack.c.bf16 %v866_v5, %v864_v25  ;;  %v727_v19 = vadd.f32 %v726_v27, %v4680_v17  ;;  %v7344_v27 = vsub.s32 1, %v4658_v10 }
 0x1ca   :  { %v867_v56 = vmax.f32 %v725_v2, 0.0  ;;  %1462 = vmatmul.mubr.bf16.gmra.mrb[80].mxu1 %v1032_v28 }
 0x1cb   :  { %7473 = vst [vmem:[#allocation52_spill] sm:$0xff] %v5198_v26  ;;  %v868_v42 = vmax.f32 %v727_v19, 0.0  ;;  %v730_v30 = vpop.f32.mrb[122].mxu0  ;;  %1471 = vmatprep.mubr.bf16.mxu1 %v7447_v15 }
 0x1cc   :  { %v731_v8 = vadd.f32 %v730_v30, %v4677_v16  ;;  %v732_v62 = vpop.f32.mrb[123].mxu0  ;;  %1949 = vmatmul.mubr.bf16.gmra.mrb[228].mxu0 %v5025_v9 }
 0x1cd   :  { %v5206_v39 = vsub.f32 %v868_v42, %v867_v56  ;;  %v733_v53 = vadd.f32 %v732_v62, %v4680_v17  ;;  %1958 = vmatprep.mubr.bf16.mxu0 %v7447_v15 }
 0x1ce   :  { %v869_v25 = vmax.f32 %v731_v8, 0.0 }
 0x1cf   :  { %7474 = vst [vmem:[#allocation53_spill] sm:$0xff] %v5206_v39  ;;  %v870_v5 = vmax.f32 %v733_v53, 0.0  ;;  %v736_v58 = vpop.f32.mrb[124].mxu0  ;;  %v5223_v53 = vld [vmem:[%s7337_s6] sm:$0xff] }
 0x1d0   :  { %v1033_v0 = vpack.c.bf16 %v869_v25, %v867_v56  ;;  %v737_v28 = vadd.f32 %v736_v58, %v4677_v16  ;;  %v738_v2 = vpop.f32.mrb[125].mxu0 }
 0x1d1   :  { %v5212_v19 = vsub.f32 %v870_v5, %v869_v25  ;;  %v5214_v30 = vpack.c.bf16 %v870_v5, %v868_v42  ;;  %v739_v9 = vadd.f32 %v738_v2, %v4680_v17  ;;  %v5228_v42 = vrot.slane %v5223_v53, %v7344_v27 }
 0x1d2   :  { %v871_v39 = vmax.f32 %v737_v28, 0.0  ;;  %1472 = vmatmul.mubr.bf16.gmra.mrb[84].mxu1 %v1033_v0 }
 0x1d3   :  { %7475 = vst [vmem:[#allocation54_spill] sm:$0xff] %v5212_v19  ;;  %v872_v62 = vmax.f32 %v739_v9, 0.0  ;;  %v742_v26 = vpop.f32.mrb[126].mxu0  ;;  %1481 = vmatprep.mubr.bf16.mxu1 %v7447_v15  ;;  %v4273_v19 = vld [vmem:[%s7339_s5 + $0x10] ss:$8 sps:$4 sm:$0xff]  }
 0x1d4   :  { %v743_v8 = vadd.f32 %v742_v26, %v4677_v16  ;;  %v744_v56 = vpop.f32.mrb[127].mxu0  ;;  %1959 = vmatmul.mubr.bf16.gmra.mrb[232].mxu0 %v5041_v52 }
 0x1d5   :  { %v5230_v25 = vsub.f32 %v872_v62, %v871_v39  ;;  %v745_v5 = vadd.f32 %v744_v56, %v4680_v17  ;;  %1968 = vmatprep.mubr.bf16.mxu0 %v7447_v15 }
 0x1d6   :  { %v873_v16 = vmax.f32 %v743_v8, 0.0 }
 0x1d7   :  { %7476 = vst [vmem:[#allocation55_spill] sm:$0xff] %v5230_v25  ;;  %v874_v26 = vmax.f32 %v745_v5, 0.0  ;;  %v1173_v58 = vpop.f32.mrb[128].mxu0 }
 0x1d8   :  { %v1034_v52 = vpack.c.bf16 %v873_v16, %v871_v39  ;;  %v5235_v0 = vadd.f32 %v1173_v58, %v5228_v42  ;;  %v5237_v28 = vpop.f32.mrb[129].mxu0 }
 0x1d9   :  { %v5239_v2 = vsub.f32 %v874_v26, %v873_v16  ;;  %v5241_v9 = vpack.c.bf16 %v874_v26, %v872_v62  ;;  %v1177_v27 = vpop.f32.mrb[130].mxu0 }
 0x1da   :  { %v5244_v25 = vadd.f32 %v1177_v27, %v5228_v42  ;;  %v5246_v17 = vpop.f32.mrb[131].mxu0  ;;  %1482 = vmatmul.mubr.bf16.gmra.mrb[88].mxu1 %v1034_v52  ;;  %v7346_v8 = vmax.f32 %v5235_v0, 0.0 }
 0x1db   :  { %7477 = vst [vmem:[#allocation56_spill] sm:$0xff] %v5239_v2 }
 0x1dc   :  { %v7345_v39 = vmax.f32 %v5244_v25, 0.0  ;;  %1969 = vmatmul.mubr.bf16.gmra.mrb[236].mxu0 %v5054_v40 }
 0x1dd   :  { %1978 = vmatprep.mubr.bf16.mxu0 %v7447_v15 }
 0x1de   :  { %v2621_v62 = vpack.c.bf16 %v7345_v39, %v7346_v8 }
 0x1df   :  { %v1183_v56 = vpop.f32.mrb[132].mxu0 }
 0x1e0   :  { %v5257_v27 = vadd.f32 %v1183_v56, %v5228_v42  ;;  %v5259_v5 = vpop.f32.mrb[133].mxu0  ;;  %4132 = vmatprep.mubr.bf16.mxu1 %v2621_v62  ;;  %v4270_v56 = vld [vmem:[%s7339_s5] ss:$8 sps:$4 sm:$0xff]  }
 0x1e1   :  { %v1187_v16 = vpop.f32.mrb[134].mxu0 }
 0x1e2   :  { %v5262_v26 = vadd.f32 %v1187_v16, %v5228_v42  ;;  %v5264_v58 = vpop.f32.mrb[135].mxu0  ;;  %v7348_v40 = vmax.f32 %v5257_v27, 0.0  ;;  %v4275_v16 = vld [vmem:[%s7339_s5 + $0x14] ss:$8 sps:$4 sm:$0xff]  }
 0x1e4   :  { %v7347_v52 = vmax.f32 %v5262_v26, 0.0  ;;  %1979 = vmatmul.mubr.bf16.gmra.mrb[240].mxu0 %v5067_v51 }
 0x1e5   :  { %1988 = vmatprep.mubr.bf16.mxu0 %v7447_v15 }
 0x1e6   :  { %v2622_v62 = vpack.c.bf16 %v7347_v52, %v7348_v40 }
 0x1e7   :  { %v1193_v39 = vpop.f32.mrb[136].mxu0 }
 0x1e8   :  { %v5281_v8 = vadd.f32 %v1193_v39, %v5228_v42  ;;  %v5283_v51 = vpop.f32.mrb[137].mxu0  ;;  %4133 = vmatmul.mubr.bf16.vlgmr.msra.gmra.mrb[92].mxu1 %v2622_v62  ;;  %v4278_v39 = vld [vmem:[%s7339_s5 + $0x24] ss:$8 sps:$4 sm:$0xff]  }
 0x1e9   :  { %v1197_v2 = vpop.f32.mrb[138].mxu0  ;;  %3211 = vmatpush1.bf16.msra.mxu1 %v4270_v56 }
 0x1ea   :  { %v5289_v54 = vadd.f32 %v1197_v2, %v5228_v42  ;;  %v5291_v52 = vpop.f32.mrb[139].mxu0  ;;  %3212 = vmatprep.subr.bf16.mxu1 %v4275_v16  ;;  %v7350_v40 = vmax.f32 %v5281_v8, 0.0  ;;  %v4276_v2 = vld [vmem:[%s7339_s5 + $0x20] ss:$8 sps:$4 sm:$0xff]  }
 0x1ec   :  { %v7349_v62 = vmax.f32 %v5289_v54, 0.0  ;;  %1989 = vmatmul.mubr.bf16.gmra.mrb[244].mxu0 %v5080_v18 }
 0x1ed   :  { %1998 = vmatprep.mubr.bf16.mxu0 %v7447_v15  ;;  %3213 = vmatpush1.bf16.msra.mxu1 %v4273_v19 }
 0x1ee   :  { %v2623_v56 = vpack.c.bf16 %v7349_v62, %v7350_v40  ;;  %3214 = vmatprep.subr.bf16.mxu1 %v4278_v39  ;;  %v4279_v39 = vld [vmem:[%s7339_s5 + $0x30] ss:$8 sps:$4 sm:$0xff]  }
 0x1ef   :  { %v1203_v16 = vpop.f32.mrb[140].mxu0 }
 0x1f0   :  { %v5308_v20 = vadd.f32 %v1203_v16, %v5228_v42  ;;  %v5310_v21 = vpop.f32.mrb[141].mxu0  ;;  %4136 = vmatprep.mubr.bf16.mxu1 %v2623_v56 }
 0x1f1   :  { %v1207_v18 = vpop.f32.mrb[142].mxu0  ;;  %3215 = vmatpush1.bf16.msra.mxu1 %v4276_v2  ;;  %v4281_v2 = vld [vmem:[%s7339_s5 + $0x34] ss:$8 sps:$4 sm:$0xff]  }
 0x1f2   :  { %v5313_v19 = vadd.f32 %v1207_v18, %v5228_v42  ;;  %v5315_v41 = vpop.f32.mrb[143].mxu0  ;;  %v7352_v35 = vmax.f32 %v5308_v20, 0.0  ;;  %3216 = vmatprep.subr.bf16.mxu1 %v4281_v2 }
 0x1f4   :  { %v7351_v1 = vmax.f32 %v5313_v19, 0.0  ;;  %1999 = vmatmul.mubr.bf16.gmra.mrb[248].mxu0 %v5093_v37 }
 0x1f5   :  { %2008 = vmatprep.mubr.bf16.mxu0 %v7447_v15  ;;  %3217 = vmatpush1.bf16.msra.mxu1 %v4279_v39 }
 0x1f6   :  { %v2624_v56 = vpack.c.bf16 %v7351_v1, %v7352_v35 }
 0x1f7   :  { %v1213_v16 = vpop.f32.mrb[144].mxu0 }
 0x1f8   :  { %v5332_v18 = vadd.f32 %v1213_v16, %v5228_v42  ;;  %v5334_v37 = vpop.f32.mrb[145].mxu0  ;;  %4137 = vmatmul.mubr.bf16.gmra.mrb[96].mxu1 %v2624_v56 }
 0x1f9   :  { %v1217_v62 = vpop.f32.mrb[146].mxu0 }
 0x1fa   :  { %v5337_v40 = vadd.f32 %v1217_v62, %v5228_v42  ;;  %v5339_v45 = vpop.f32.mrb[147].mxu0  ;;  %v7354_v12 = vmax.f32 %v5332_v18, 0.0 }
 0x1fc   :  { %7478 = vst [vmem:[#allocation57_spill] sm:$0xff] %v5337_v40  ;;  %v7353_v4 = vmax.f32 %v5337_v40, 0.0  ;;  %2009 = vmatmul.mubr.bf16.gmra.mrb[252].mxu0 %v5106_v14 }
 0x1fd   :  { %v5344_v2 = vpop.f32.mrb[0].mxu1  ;;  %2018 = vmatprep.mubr.bf16.mxu0 %v7447_v15 }
 0x1fe   :  { %v2625_v39 = vpack.c.bf16 %v7353_v4, %v7354_v12  ;;  %v5351_v56 = vpop.f32.mrb[1].mxu1 }
 0x1ff   :  { %7479 = vst [vmem:[#allocation58_spill] sm:$0xff] %v5351_v56  ;;  %v1223_v62 = vpop.f32.mrb[148].mxu0  ;;  %v1267_v16 = vpop.f32.mrb[2].mxu1 }
 0x200   :  { %v5354_v1 = vadd.f32 %v1223_v62, %v5228_v42  ;;  %v5356_v35 = vpop.f32.mrb[149].mxu0  ;;  %v5358_v48 = vpop.f32.mrb[3].mxu1  ;;  %4140 = vmatprep.mubr.bf16.mxu1 %v2625_v39  ;;  %v4282_v62 = vld [vmem:[%s7339_s5 + $0x40] ss:$8 sps:$4 sm:$0xff]   ;;  %v4284_v39 = vld [vmem:[%s7339_s5 + $0x44] ss:$8 sps:$4 sm:$0xff]  }
 0x201   :  { %7481 = vst [vmem:[#allocation60_spill] sm:$0xff] %v5356_v35  ;;  %7482 = vst [vmem:[#allocation61_spill] sm:$0xff] %v5358_v48  ;;  %v1227_v14 = vpop.f32.mrb[150].mxu0  ;;  %3218 = vmatprep.subr.bf16.mxu1 %v4284_v39 }
 0x202   :  { %7480 = vst [vmem:[#allocation59_spill] sm:$0xff] %v5354_v1  ;;  %v5361_v31 = vadd.f32 %v1227_v14, %v5228_v42  ;;  %v5363_v11 = vpop.f32.mrb[151].mxu0  ;;  %v7357_v4 = vmax.f32 %v5354_v1, 0.0  ;;  %3219 = vmatpush1.bf16.msra.mxu1 %v4282_v62 }
 0x203   :  { %7484 = vst [vmem:[#allocation63_spill] sm:$0xff] %v5363_v11 }
 0x204   :  { %7483 = vst [vmem:[#allocation62_spill] sm:$0xff] %v5361_v31  ;;  %v7356_v12 = vmax.f32 %v5361_v31, 0.0  ;;  %2019 = vmatmul.mubr.bf16.gmra.mrb[0].mxu0 %v5119_v63 }
 0x205   :  { %v1273_v56 = vpop.f32.mrb[4].mxu1  ;;  %2028 = vmatprep.mubr.bf16.mxu0 %v7447_v15 }
 0x206   :  { %v2626_v14 = vpack.c.bf16 %v7356_v12, %v7357_v4  ;;  %v5379_v48 = vpop.f32.mrb[5].mxu1 }
 0x207   :  { %7485 = vst [vmem:[#allocation64_spill] sm:$0xff] %v5379_v48  ;;  %v1233_v33 = vpop.f32.mrb[152].mxu0  ;;  %v1277_v63 = vpop.f32.mrb[6].mxu1 }
 0x208   :  { %v5382_v44 = vadd.f32 %v1233_v33, %v5228_v42  ;;  %v5384_v23 = vpop.f32.mrb[153].mxu0  ;;  %v5386_v6 = vpop.f32.mrb[7].mxu1  ;;  %4141 = vmatmul.mubr.bf16.gmra.mrb[100].mxu1 %v2626_v14 }
 0x209   :  { %7487 = vst [vmem:[#allocation66_spill] sm:$0xff] %v5384_v23  ;;  %7488 = vst [vmem:[#allocation67_spill] sm:$0xff] %v5386_v6  ;;  %v1237_v55 = vpop.f32.mrb[154].mxu0 }
 0x20a   :  { %7486 = vst [vmem:[#allocation65_spill] sm:$0xff] %v5382_v44  ;;  %v5389_v43 = vadd.f32 %v1237_v55, %v5228_v42  ;;  %v5391_v31 = vpop.f32.mrb[155].mxu0  ;;  %v7360_v12 = vmax.f32 %v5382_v44, 0.0 }
 0x20b   :  { %7490 = vst [vmem:[#allocation69_spill] sm:$0xff] %v5391_v31 }
 0x20c   :  { %7489 = vst [vmem:[#allocation68_spill] sm:$0xff] %v5389_v43  ;;  %v7359_v4 = vmax.f32 %v5389_v43, 0.0  ;;  %2029 = vmatmul.mubr.bf16.gmra.mrb[4].mxu0 %v5132_v50  ;;  %v5435_v43 = vadd.f32 %v1277_v63, %v5228_v42  ;;  %v4295_v63 = vld [vmem:[%s7337_s6 + $0x8] sm:$0xff] }
 0x20d   :  { %v1283_v33 = vpop.f32.mrb[8].mxu1  ;;  %2038 = vmatprep.mubr.bf16.mxu0 %v7447_v15 }
 0x20e   :  { %v2627_v39 = vpack.c.bf16 %v7359_v4, %v7360_v12  ;;  %v5401_v62 = vpop.f32.mrb[9].mxu1  ;;  %7499 = vst [vmem:[#allocation78_spill] sm:$0xff] %v5435_v43 }
 0x20f   :  { %7491 = vst [vmem:[#allocation70_spill] sm:$0xff] %v5401_v62  ;;  %v1243_v55 = vpop.f32.mrb[156].mxu0  ;;  %v1287_v14 = vpop.f32.mrb[10].mxu1 }
 0x210   :  { %v5404_v6 = vadd.f32 %v1243_v55, %v5228_v42  ;;  %v5406_v48 = vpop.f32.mrb[157].mxu0  ;;  %v5408_v31 = vpop.f32.mrb[11].mxu1  ;;  %4144 = vmatprep.mubr.bf16.mxu1 %v2627_v39  ;;  %v4285_v55 = vld [vmem:[%s7339_s5 + $0x50] ss:$8 sps:$4 sm:$0xff]   ;;  %v4287_v39 = vld [vmem:[%s7339_s5 + $0x54] ss:$8 sps:$4 sm:$0xff]  }
 0x211   :  { %7493 = vst [vmem:[#allocation72_spill] sm:$0xff] %v5406_v48  ;;  %7494 = vst [vmem:[#allocation73_spill] sm:$0xff] %v5408_v31  ;;  %v1247_v50 = vpop.f32.mrb[158].mxu0  ;;  %3220 = vmatprep.subr.bf16.mxu1 %v4287_v39 }
 0x212   :  { %7492 = vst [vmem:[#allocation71_spill] sm:$0xff] %v5404_v6  ;;  %v5411_v23 = vadd.f32 %v1247_v50, %v5228_v42  ;;  %v5413_v44 = vpop.f32.mrb[159].mxu0  ;;  %v7365_v4 = vmax.f32 %v5404_v6, 0.0  ;;  %3221 = vmatpush1.bf16.msra.mxu1 %v4285_v55 }
 0x213   :  { %7496 = vst [vmem:[#allocation75_spill] sm:$0xff] %v5413_v44 }
 0x214   :  { %7495 = vst [vmem:[#allocation74_spill] sm:$0xff] %v5411_v23  ;;  %v7364_v12 = vmax.f32 %v5411_v23, 0.0  ;;  %2039 = vmatmul.mubr.bf16.gmra.mrb[8].mxu0 %v5145_v49  ;;  %v5432_v49 = vadd.f32 %v1267_v16, %v5228_v42  ;;  %v5447_v16 = vadd.f32 %v5344_v2, %v5228_v42 }
 0x215   :  { %v1293_v62 = vpop.f32.mrb[12].mxu1  ;;  %2048 = vmatprep.mubr.bf16.mxu0 %v7447_v15 }
 0x216   :  { %v2628_v50 = vpack.c.bf16 %v7364_v12, %v7365_v4  ;;  %v5429_v31 = vpop.f32.mrb[13].mxu1  ;;  %7498 = vst [vmem:[#allocation77_spill] sm:$0xff] %v5432_v49  ;;  %v1670_v12 = vsub.s32 2, %v4658_v10  ;;  %7503 = vst [vmem:[#allocation82_spill] sm:$0xff] %v5447_v16  ;;  %v7510_v7 = vmax.f32 %v5447_v16, 0.0 }
 0x217   :  { %7497 = vst [vmem:[#allocation76_spill] sm:$0xff] %v5429_v31  ;;  %v1253_v44 = vpop.f32.mrb[160].mxu0  ;;  %v1297_v48 = vpop.f32.mrb[14].mxu1  ;;  %v5457_v31 = vadd.f32 %v1273_v56, %v5228_v42 }
 0x218   :  { %v5438_v22 = vadd.f32 %v1253_v44, %v5228_v42  ;;  %v5440_v1 = vpop.f32.mrb[161].mxu0  ;;  %v5442_v6 = vpop.f32.mrb[15].mxu1  ;;  %4145 = vmatmul.mubr.bf16.gmra.mrb[104].mxu1 %v2628_v50  ;;  %v7504_v44 = vsub.s32 1, %v4658_v10 }
 0x219   :  { %7501 = vst [vmem:[#allocation80_spill] sm:$0xff] %v5440_v1  ;;  %7502 = vst [vmem:[#allocation81_spill] sm:$0xff] %v5442_v6  ;;  %v1257_v4 = vpop.f32.mrb[162].mxu0 }
 0x21a   :  { %7500 = vst [vmem:[#allocation79_spill] sm:$0xff] %v5438_v22  ;;  %v5454_v39 = vrot.slane %v4295_v63, %v7504_v44  ;;  %7505 = vst [vmem:[#allocation83_spill] sm:$0xff] %v5457_v31  ;;  %v5460_v50 = vadd.f32 %v1257_v4, %v5228_v42  ;;  %v5462_v6 = vpop.f32.mrb[163].mxu0  ;;  %v7370_v1 = vmax.f32 %v5438_v22, 0.0  ;;  %v5470_v44 = vrot.slane %v5223_v53, %v1670_v12 }
 0x21b   :  { %7507 = vst [vmem:[#allocation85_spill] sm:$0xff] %v5462_v6  ;;  %v5473_v4 = vrot.slane %v4295_v63, %v1670_v12  ;;  %v5488_v12 = vadd.f32 %v1287_v14, %v5228_v42  ;;  %v5491_v63 = vadd.f32 %v1297_v48, %v5228_v42  ;;  %v5498_v22 = vadd.f32 %v1283_v33, %v5228_v42 }
 0x21c   :  { %7506 = vst [vmem:[#allocation84_spill] sm:$0xff] %v5460_v50  ;;  %2049 = vmatmul.mubr.bf16.gmra.mrb[12].mxu0 %v5158_v36  ;;  %v1176_v2 = vadd.f32 %v5237_v28, %v5454_v39  ;;  %v1180_v55 = vadd.f32 %v5246_v17, %v5454_v39  ;;  %v7508_v36 = vmax.f32 %v5460_v50, 0.0  ;;  %v7511_v17 = vmax.f32 %v5432_v49, 0.0 }
 0x21d   :  { %v1303_v10 = vpop.f32.mrb[16].mxu1  ;;  %2058 = vmatprep.mubr.bf16.mxu0 %v7447_v15  ;;  %v7513_v48 = vmax.f32 %v5457_v31, 0.0  ;;  %v7514_v50 = vmax.f32 %v5435_v43, 0.0  ;;  %v940_v33 = vmul.f32 %v4705_v38, %v4705_v38  ;;  %v7517_v11 = vmax.f32 %v5488_v12, 0.0 }
 0x21e   :  { %v2629_v53 = vpack.c.bf16 %v7508_v36, %v7370_v1  ;;  %v5485_v6 = vpop.f32.mrb[17].mxu1  ;;  %v2630_v23 = vpack.c.bf16 %v7511_v17, %v7510_v7  ;;  %v5501_v36 = vadd.f32 %v1293_v62, %v5228_v42  ;;  %v939_v7 = vmul.f32 %v4694_v29, %v4694_v29 }
 0x21f   :  { %7509 = vst [vmem:[#allocation86_spill] sm:$0xff] %v5485_v6  ;;  %v1307_v56 = vpop.f32.mrb[18].mxu1  ;;  %v1790_v28 = vpop.f32.mrb[164].mxu0  ;;  %v2631_v16 = vpack.c.bf16 %v7514_v50, %v7513_v48  ;;  %v5516_v62 = vmul.f32 %v4716_v47, %v4716_v47  ;;  %v7377_v47 = vmax.f32 %v5498_v22, 0.0 }
 0x220   :  { %v1791_v1 = vadd.f32 %v1790_v28, %v5470_v44  ;;  %v5504_v14 = vpop.f32.mrb[19].mxu1  ;;  %v1792_v6 = vpop.f32.mrb[165].mxu0  ;;  %4148 = vmatprep.mubr.bf16.mxu1 %v2629_v53  ;;  %v1493_v53 = vmax.f32 %v1176_v2, 0.0  ;;  %v7518_v40 = vmax.f32 %v5501_v36, 0.0 }
 0x221   :  { %7512 = vst [vmem:[#allocation87_spill] sm:$0xff] %v5504_v14  ;;  %v1793_v28 = vadd.f32 %v1792_v6, %v5473_v4  ;;  %v1794_v17 = vpop.f32.mrb[166].mxu0  ;;  %4149 = vmatmul.mubr.bf16.gmra.mrb[108].mxu1 %v2630_v23  ;;  %v1495_v14 = vmax.f32 %v1180_v55, 0.0  ;;  %v7515_v23 = vmax.f32 %v5235_v0, 0.0  ;;  %v4288_v0 = vld [vmem:[%s7339_s5 + $0x60] ss:$8 sps:$4 sm:$0xff]   ;;  %v2632_v35 = vpack.c.bf16 %v7517_v11, %v7377_v47 }
 0x222   :  { %v2109_v31 = vmax.f32 %v1791_v1, 0.0  ;;  %v1795_v43 = vadd.f32 %v1794_v17, %v5470_v44  ;;  %v1796_v50 = vpop.f32.mrb[167].mxu0  ;;  %4152 = vmatprep.mubr.bf16.mxu1 %v2631_v16  ;;  %v5530_v1 = vmul.f32 %v4727_v57, %v4727_v57  ;;  %v5533_v16 = vadd.f32 %v1307_v56, %v5228_v42 }
 0x223   :  { %v2110_v38 = vmax.f32 %v1793_v28, 0.0  ;;  %v1797_v49 = vadd.f32 %v1796_v50, %v5473_v4  ;;  %v1186_v57 = vadd.f32 %v5259_v5, %v5454_v39  ;;  %v7516_v56 = vmax.f32 %v5244_v25, 0.0 }
 0x224   :  { %v2237_v2 = vsub.f32 %v2109_v31, %v7515_v23  ;;  %v2111_v55 = vmax.f32 %v1795_v43, 0.0  ;;  %2059 = vmatmul.mubr.bf16.gmra.mrb[16].mxu0 %v5171_v32  ;;  %v4290_v43 = vld [vmem:[%s7339_s5 + $0x64] ss:$8 sps:$4 sm:$0xff]   ;;  %v7519_v5 = vmax.f32 %v5491_v63, 0.0  ;;  %v1190_v11 = vadd.f32 %v5264_v58, %v5454_v39 }
 0x225   :  { %v2429_v28 = vsub.f32 %v2110_v38, %v1493_v53  ;;  %v2112_v17 = vmax.f32 %v1797_v49, 0.0  ;;  %v1313_v50 = vpop.f32.mrb[20].mxu1  ;;  %2068 = vmatprep.mubr.bf16.mxu0 %v7447_v15  ;;  %3222 = vmatprep.subr.bf16.mxu1 %v4290_v43 }
 0x226   :  { %v2301_v32 = vmul.f32 %v2237_v2, %v2237_v2  ;;  %v2238_v23 = vsub.f32 %v2111_v55, %v7516_v56  ;;  %v5546_v53 = vpack.c.bf16 %v2111_v55, %v2109_v31  ;;  %v5548_v49 = vpop.f32.mrb[21].mxu1  ;;  %v2633_v2 = vpack.c.bf16 %v7519_v5, %v7518_v40  ;;  %3223 = vmatpush1.bf16.msra.mxu1 %v4288_v0 }
 0x227   :  { %v2493_v38 = vmul.f32 %v2429_v28, %v2429_v28  ;;  %v2430_v48 = vsub.f32 %v2112_v17, %v1495_v14  ;;  %v1317_v6 = vpop.f32.mrb[22].mxu1  ;;  %v1800_v29 = vpop.f32.mrb[168].mxu0  ;;  %v5559_v31 = vadd.f32 %v1303_v10, %v5228_v42  ;;  %v1497_v0 = vmax.f32 %v1186_v57, 0.0 }
 0x228   :  { %v2365_v25 = vadd.f32 %v2301_v32, %v939_v7  ;;  %v2302_v55 = vmul.f32 %v2238_v23, %v2238_v23  ;;  %v5562_v14 = vadd.f32 %v1317_v6, %v5228_v42  ;;  %v5564_v28 = vpop.f32.mrb[23].mxu1  ;;  %v1802_v17 = vpop.f32.mrb[169].mxu0  ;;  %v1801_v40 = vadd.f32 %v1800_v29, %v5470_v44 }
 0x229   :  { %v2494_v47 = vmul.f32 %v2430_v48, %v2430_v48  ;;  %v1804_v43 = vpop.f32.mrb[170].mxu0  ;;  %4153 = vmatmul.mubr.bf16.gmra.mrb[112].mxu1 %v2632_v35  ;;  %v5573_v6 = vadd.f32 %v1313_v50, %v5228_v42  ;;  %v1803_v32 = vadd.f32 %v1802_v17, %v5473_v4  ;;  %v7378_v29 = vmax.f32 %v5559_v31, 0.0 }
 0x22a   :  { %v5570_v10 = vadd.f32 %v2493_v38, %v2365_v25  ;;  %v2366_v7 = vadd.f32 %v2302_v55, %v940_v33  ;;  %v1806_v23 = vpop.f32.mrb[171].mxu0  ;;  %4156 = vmatprep.mubr.bf16.mxu1 %v2633_v2  ;;  %v2113_v5 = vmax.f32 %v1801_v40, 0.0  ;;  %v1805_v58 = vadd.f32 %v1804_v43, %v5470_v44 }
 0x22b   :  { %v1807_v48 = vadd.f32 %v1806_v23, %v5473_v4  ;;  %v2114_v33 = vmax.f32 %v1803_v32, 0.0  ;;  %v1499_v50 = vmax.f32 %v1190_v11, 0.0  ;;  %v7522_v38 = vmax.f32 %v5257_v27, 0.0 }
 0x22c   :  { %7520 = vst [vmem:[#allocation88_spill] sm:$0xff] %v5570_v10  ;;  %v5579_v56 = vadd.f32 %v2494_v47, %v2366_v7  ;;  %2069 = vmatmul.mubr.bf16.gmra.mrb[20].mxu0 %v5184_v61  ;;  %v2115_v2 = vmax.f32 %v1805_v58, 0.0  ;;  %v1196_v17 = vadd.f32 %v5283_v51, %v5454_v39  ;;  %v7523_v61 = vmax.f32 %v5533_v16, 0.0 }
 0x22d   :  { %v2239_v25 = vsub.f32 %v2113_v5, %v7522_v38  ;;  %v2116_v57 = vmax.f32 %v1807_v48, 0.0  ;;  %v1323_v55 = vpop.f32.mrb[24].mxu1  ;;  %2078 = vmatprep.mubr.bf16.mxu0 %v7447_v15  ;;  %v2431_v40 = vsub.f32 %v2114_v33, %v1497_v0  ;;  %v7524_v7 = vmax.f32 %v5262_v26, 0.0 }
 0x22e   :  { %7521 = vst [vmem:[#allocation89_spill] sm:$0xff] %v5579_v56  ;;  %v5589_v43 = vpop.f32.mrb[25].mxu1  ;;  %v2634_v11 = vpack.c.bf16 %v7523_v61, %v7378_v29  ;;  %v5597_v23 = vpack.c.bf16 %v2115_v2, %v2113_v5  ;;  %v5600_v35 = vadd.f32 %v1323_v55, %v5228_v42  ;;  %v7527_v26 = vmax.f32 %v5562_v14, 0.0 }
 0x22f   :  { %v2303_v27 = vmul.f32 %v2239_v25, %v2239_v25  ;;  %v2240_v32 = vsub.f32 %v2115_v2, %v7524_v7  ;;  %v2432_v58 = vsub.f32 %v2116_v57, %v1499_v50  ;;  %v1327_v48 = vpop.f32.mrb[26].mxu1  ;;  %v1810_v38 = vpop.f32.mrb[172].mxu0  ;;  %v2495_v51 = vmul.f32 %v2431_v40, %v2431_v40 }
 0x230   :  { %7525 = vst [vmem:[#allocation90_spill] sm:$0xff] %v5597_v23  ;;  %v5603_v0 = vadd.f32 %v1327_v48, %v5228_v42  ;;  %v5605_v33 = vpop.f32.mrb[27].mxu1  ;;  %v1812_v47 = vpop.f32.mrb[173].mxu0  ;;  %v7526_v25 = vmax.f32 %v5573_v6, 0.0  ;;  %v1811_v57 = vadd.f32 %v1810_v38, %v5470_v44  ;;  %v943_v55 = vmul.f32 %v4738_v3, %v4738_v3 }
 0x231   :  { %v2367_v5 = vadd.f32 %v2303_v27, %v5516_v62  ;;  %v2304_v50 = vmul.f32 %v2240_v32, %v2240_v32  ;;  %v2496_v2 = vmul.f32 %v2432_v58, %v2432_v58  ;;  %v1814_v40 = vpop.f32.mrb[174].mxu0  ;;  %4157 = vmatmul.mubr.bf16.gmra.mrb[116].mxu1 %v2634_v11  ;;  %v1200_v7 = vadd.f32 %v5291_v52, %v5454_v39 }
 0x232   :  { %v2635_v61 = vpack.c.bf16 %v7527_v26, %v7526_v25  ;;  %v7379_v48 = vmax.f32 %v5603_v0, 0.0  ;;  %v1813_v29 = vadd.f32 %v1812_v47, %v5473_v4  ;;  %v1816_v56 = vpop.f32.mrb[175].mxu0  ;;  %v2117_v27 = vmax.f32 %v1811_v57, 0.0 }
 0x233   :  { %v5619_v25 = vadd.f32 %v2495_v51, %v2367_v5  ;;  %v2368_v62 = vadd.f32 %v2304_v50, %v5530_v1  ;;  %v1815_v32 = vadd.f32 %v1814_v40, %v5470_v44  ;;  %v1501_v11 = vmax.f32 %v1196_v17, 0.0 }
 0x234   :  { %4160 = vmatprep.mubr.bf16.mxu1 %v2635_v61  ;;  %v7380_v58 = vmax.f32 %v5600_v35, 0.0  ;;  %v2118_v3 = vmax.f32 %v1813_v29, 0.0  ;;  %v1817_v38 = vadd.f32 %v1816_v56, %v5473_v4  ;;  %2079 = vmatmul.mubr.bf16.gmra.mrb[24].mxu0 %v5200_v60  ;;  %v944_v52 = vmul.f32 %v4749_v13, %v4749_v13  ;;  %v4291_v29 = vld [vmem:[%s7339_s5 + $0x70] ss:$8 sps:$4 sm:$0xff]   ;;  %v4293_v60 = vld [vmem:[%s7339_s5 + $0x74] ss:$8 sps:$4 sm:$0xff]  }
 0x235   :  { %7528 = vst [vmem:[#allocation91_spill] sm:$0xff] %v5619_v25  ;;  %v5628_v47 = vadd.f32 %v2496_v2, %v2368_v62  ;;  %v7530_v51 = vmax.f32 %v5281_v8, 0.0  ;;  %v2119_v1 = vmax.f32 %v1815_v32, 0.0  ;;  %v1333_v61 = vpop.f32.mrb[28].mxu1  ;;  %2088 = vmatprep.mubr.bf16.mxu0 %v7447_v15  ;;  %v1503_v56 = vmax.f32 %v1200_v7, 0.0  ;;  %3224 = vmatprep.subr.bf16.mxu1 %v4293_v60 }
 0x236   :  { %v2433_v17 = vsub.f32 %v2118_v3, %v1501_v11  ;;  %v2120_v13 = vmax.f32 %v1817_v38, 0.0  ;;  %v5640_v5 = vadd.f32 %v1333_v61, %v5228_v42  ;;  %v5642_v8 = vpop.f32.mrb[29].mxu1  ;;  %v7531_v2 = vmax.f32 %v5289_v54, 0.0  ;;  %3225 = vmatpush1.bf16.msra.mxu1 %v4291_v29 }
 0x237   :  { %7529 = vst [vmem:[#allocation92_spill] sm:$0xff] %v5628_v47  ;;  %v2241_v26 = vsub.f32 %v2117_v27, %v7530_v51  ;;  %v5646_v40 = vpack.c.bf16 %v2119_v1, %v2117_v27  ;;  %v1337_v62 = vpop.f32.mrb[30].mxu1  ;;  %v1820_v32 = vpop.f32.mrb[176].mxu0  ;;  %v2636_v7 = vpack.c.bf16 %v7379_v48, %v7380_v58  ;;  %v1206_v11 = vadd.f32 %v5310_v21, %v5454_v39 }
 0x238   :  { %v2242_v57 = vsub.f32 %v2119_v1, %v7531_v2  ;;  %v2497_v3 = vmul.f32 %v2433_v17, %v2433_v17  ;;  %v2434_v38 = vsub.f32 %v2120_v13, %v1503_v56  ;;  %v5655_v51 = vadd.f32 %v1337_v62, %v5228_v42  ;;  %v5657_v54 = vpop.f32.mrb[31].mxu1  ;;  %v1822_v27 = vpop.f32.mrb[177].mxu0 }
 0x239   :  { %v2305_v50 = vmul.f32 %v2241_v26, %v2241_v26  ;;  %7532 = vst [vmem:[#allocation93_spill] sm:$0xff] %v5646_v40  ;;  %v1210_v26 = vadd.f32 %v5315_v41, %v5454_v39  ;;  %v1821_v2 = vadd.f32 %v1820_v32, %v5470_v44  ;;  %v1824_v60 = vpop.f32.mrb[178].mxu0  ;;  %4161 = vmatmul.mubr.bf16.gmra.mrb[120].mxu1 %v2636_v7  ;;  %v7382_v21 = vmax.f32 %v5640_v5, 0.0 }
 0x23a   :  { %v2306_v61 = vmul.f32 %v2242_v57, %v2242_v57  ;;  %v2498_v48 = vmul.f32 %v2434_v38, %v2434_v38  ;;  %v7381_v56 = vmax.f32 %v5655_v51, 0.0  ;;  %v1823_v17 = vadd.f32 %v1822_v27, %v5473_v4  ;;  %v1826_v13 = vpop.f32.mrb[179].mxu0 }
 0x23b   :  { %v2369_v1 = vadd.f32 %v2305_v50, %v943_v55  ;;  %v2121_v58 = vmax.f32 %v1821_v2, 0.0  ;;  %v1825_v41 = vadd.f32 %v1824_v60, %v5470_v44  ;;  %v1505_v55 = vmax.f32 %v1206_v11, 0.0 }
 0x23c   :  { %v2370_v29 = vadd.f32 %v2306_v61, %v944_v52  ;;  %v2637_v50 = vpack.c.bf16 %v7381_v56, %v7382_v21  ;;  %v2122_v57 = vmax.f32 %v1823_v17, 0.0  ;;  %v1827_v32 = vadd.f32 %v1826_v13, %v5473_v4  ;;  %2089 = vmatmul.mubr.bf16.gmra.mrb[28].mxu0 %v5214_v30 }
 0x23d   :  { %v5665_v62 = vadd.f32 %v2497_v3, %v2369_v1  ;;  %v945_v7 = vmul.f32 %v4760_v24, %v4760_v24  ;;  %v7535_v52 = vmax.f32 %v5308_v20, 0.0  ;;  %v2123_v27 = vmax.f32 %v1825_v41, 0.0  ;;  %v1343_v11 = vpop.f32.mrb[32].mxu1  ;;  %2098 = vmatprep.mubr.bf16.mxu0 %v7447_v15 }
 0x23e   :  { %v5676_v3 = vadd.f32 %v2498_v48, %v2370_v29  ;;  %v1507_v1 = vmax.f32 %v1210_v26, 0.0  ;;  %v2435_v61 = vsub.f32 %v2122_v57, %v1505_v55  ;;  %v2124_v2 = vmax.f32 %v1827_v32, 0.0  ;;  %v5684_v17 = vpop.f32.mrb[33].mxu1  ;;  %4164 = vmatprep.mubr.bf16.mxu1 %v2637_v50 }
 0x23f   :  { %7533 = vst [vmem:[#allocation94_spill] sm:$0xff] %v5665_v62  ;;  %v2243_v38 = vsub.f32 %v2121_v58, %v7535_v52  ;;  %v5682_v60 = vadd.f32 %v1343_v11, %v5228_v42  ;;  %v946_v24 = vmul.f32 %v4771_v34, %v4771_v34  ;;  %v7536_v20 = vmax.f32 %v5313_v19, 0.0  ;;  %v1347_v29 = vpop.f32.mrb[34].mxu1  ;;  %v1830_v41 = vpop.f32.mrb[180].mxu0 }
 0x240   :  { %7534 = vst [vmem:[#allocation95_spill] sm:$0xff] %v5676_v3  ;;  %v5690_v13 = vpack.c.bf16 %v2123_v27, %v2121_v58  ;;  %v1216_v26 = vadd.f32 %v5334_v37, %v5454_v39  ;;  %v2499_v55 = vmul.f32 %v2435_v61, %v2435_v61  ;;  %v2436_v57 = vsub.f32 %v2124_v2, %v1507_v1  ;;  %v5697_v50 = vpop.f32.mrb[35].mxu1  ;;  %v1832_v52 = vpop.f32.mrb[181].mxu0 }
 0x241   :  { %v2307_v30 = vmul.f32 %v2243_v38, %v2243_v38  ;;  %v2244_v48 = vsub.f32 %v2123_v27, %v7536_v20  ;;  %v5695_v32 = vadd.f32 %v1347_v29, %v5228_v42  ;;  %v1220_v34 = vadd.f32 %v5339_v45, %v5454_v39  ;;  %v1834_v27 = vpop.f32.mrb[182].mxu0 }
 0x242   :  { %7537 = vst [vmem:[#allocation96_spill] sm:$0xff] %v5690_v13  ;;  %v1831_v58 = vadd.f32 %v1830_v41, %v5470_v44  ;;  %v2500_v11 = vmul.f32 %v2436_v57, %v2436_v57  ;;  %v7384_v20 = vmax.f32 %v5682_v60, 0.0  ;;  %v1833_v1 = vadd.f32 %v1832_v52, %v5473_v4  ;;  %v1836_v61 = vpop.f32.mrb[183].mxu0 }
 0x243   :  { %v2371_v19 = vadd.f32 %v2307_v30, %v945_v7  ;;  %v2308_v38 = vmul.f32 %v2244_v48, %v2244_v48  ;;  %v7383_v37 = vmax.f32 %v5695_v32, 0.0  ;;  %v1835_v21 = vadd.f32 %v1834_v27, %v5470_v44 }
 0x244   :  { %v2125_v56 = vmax.f32 %v1831_v58, 0.0  ;;  %v1509_v45 = vmax.f32 %v1216_v26, 0.0  ;;  %v2126_v30 = vmax.f32 %v1833_v1, 0.0  ;;  %v1837_v48 = vadd.f32 %v1836_v61, %v5473_v4  ;;  %2099 = vmatmul.mubr.bf16.gmra.mrb[32].mxu0 %v5241_v9 }
 0x245   :  { %v5705_v2 = vadd.f32 %v2499_v55, %v2371_v19  ;;  %v2372_v29 = vadd.f32 %v2308_v38, %v946_v24  ;;  %v2638_v7 = vpack.c.bf16 %v7383_v37, %v7384_v20  ;;  %v947_v41 = vmul.f32 %v4782_v46, %v4782_v46  ;;  %v1353_v26 = vpop.f32.mrb[36].mxu1 }
 0x246   :  { %v7540_v24 = vmax.f32 %v5332_v18, 0.0  ;;  %v2127_v52 = vmax.f32 %v1835_v21, 0.0  ;;  %v1511_v19 = vmax.f32 %v1220_v34, 0.0  ;;  %v2437_v38 = vsub.f32 %v2126_v30, %v1509_v45  ;;  %v5723_v1 = vpop.f32.mrb[37].mxu1  ;;  %v7544_v34 = vld [vmem:[#allocation60_spill] sm:$0xff] }
 0x247   :  { %7538 = vst [vmem:[#allocation97_spill] sm:$0xff] %v5705_v2  ;;  %v5716_v55 = vadd.f32 %v2500_v11, %v2372_v29  ;;  %v2128_v58 = vmax.f32 %v1837_v48, 0.0  ;;  %v5721_v27 = vadd.f32 %v1353_v26, %v5228_v42  ;;  %4165 = vmatmul.mubr.bf16.gmra.mrb[124].mxu1 %v2638_v7  ;;  %v948_v9 = vmul.f32 %v4793_v59, %v4793_v59  ;;  %v7541_v11 = vld [vmem:[#allocation57_spill] sm:$0xff]  ;;  %v1357_v21 = vpop.f32.mrb[38].mxu1  ;;  %v7545_v59 = vld [vmem:[#allocation63_spill] sm:$0xff] }
 0x248   :  { %v2245_v57 = vsub.f32 %v2125_v56, %v7540_v24  ;;  %v7542_v61 = vmax.f32 %v7541_v11, 0.0  ;;  %v5729_v18 = vpack.c.bf16 %v2127_v52, %v2125_v56  ;;  %v1840_v24 = vpop.f32.mrb[184].mxu0  ;;  %v1226_v45 = vadd.f32 %v7544_v34, %v5454_v39  ;;  %v5736_v7 = vpop.f32.mrb[39].mxu1 }
 0x249   :  { %7539 = vst [vmem:[#allocation98_spill] sm:$0xff] %v5716_v55  ;;  %v2501_v30 = vmul.f32 %v2437_v38, %v2437_v38  ;;  %v2438_v48 = vsub.f32 %v2128_v58, %v1511_v19  ;;  %v5734_v26 = vadd.f32 %v1357_v21, %v5228_v42  ;;  %v1842_v37 = vpop.f32.mrb[185].mxu0  ;;  %v1841_v56 = vadd.f32 %v1840_v24, %v5470_v44  ;;  %v7547_v24 = vld [vmem:[#allocation3_spill] sm:$0xff] }
 0x24a   :  { %v2309_v46 = vmul.f32 %v2245_v57, %v2245_v57  ;;  %v2246_v29 = vsub.f32 %v2127_v52, %v7542_v61  ;;  %7543 = vst [vmem:[#allocation57_spill] sm:$0xff] %v5729_v18  ;;  %v1230_v57 = vadd.f32 %v7545_v59, %v5454_v39  ;;  %v1844_v52 = vpop.f32.mrb[186].mxu0  ;;  %v7386_v55 = vmax.f32 %v5721_v27, 0.0 }
 0x24b   :  { %v2502_v20 = vmul.f32 %v2438_v48, %v2438_v48  ;;  %v7385_v38 = vmax.f32 %v5734_v26, 0.0  ;;  %v1843_v19 = vadd.f32 %v1842_v37, %v5473_v4  ;;  %v1846_v58 = vpop.f32.mrb[187].mxu0  ;;  %v2129_v2 = vmax.f32 %v1841_v56, 0.0 }
 0x24c   :  { %v2373_v11 = vadd.f32 %v2309_v46, %v947_v41  ;;  %v2310_v61 = vmul.f32 %v2246_v29, %v2246_v29  ;;  %v1845_v3 = vadd.f32 %v1844_v52, %v5470_v44  ;;  %v1513_v59 = vmax.f32 %v1226_v45, 0.0 }
 0x24d   :  { %v2639_v41 = vpack.c.bf16 %v7385_v38, %v7386_v55  ;;  %v2130_v46 = vmax.f32 %v1843_v19, 0.0  ;;  %v1847_v29 = vadd.f32 %v1846_v58, %v5473_v4  ;;  %v949_v48 = vmul.f32 %v7547_v24, %v7547_v24  ;;  %v1363_v56 = vpop.f32.mrb[40].mxu1  ;;  %v7551_v19 = vld [vmem:[#allocation4_spill] sm:$0xff] }
 0x24e   :  { %v5744_v21 = vadd.f32 %v2501_v30, %v2373_v11  ;;  %v2374_v34 = vadd.f32 %v2310_v61, %v948_v9  ;;  %v7549_v30 = vld [vmem:[#allocation59_spill] sm:$0xff]  ;;  %v2131_v61 = vmax.f32 %v1845_v3, 0.0  ;;  %v1515_v52 = vmax.f32 %v1230_v57, 0.0  ;;  %v5761_v38 = vpop.f32.mrb[41].mxu1  ;;  %v7555_v57 = vld [vmem:[#allocation66_spill] sm:$0xff] }
 0x24f   :  { %v7550_v11 = vmax.f32 %v7549_v30, 0.0  ;;  %v2439_v45 = vsub.f32 %v2130_v46, %v1513_v59  ;;  %v5759_v62 = vadd.f32 %v1363_v56, %v5228_v42  ;;  %4168 = vmatprep.mubr.bf16.mxu1 %v2639_v41  ;;  %v950_v58 = vmul.f32 %v7551_v19, %v7551_v19  ;;  %v1367_v3 = vpop.f32.mrb[42].mxu1 }
 0x250   :  { %7546 = vst [vmem:[#allocation60_spill] sm:$0xff] %v5744_v21  ;;  %v5754_v37 = vadd.f32 %v2502_v20, %v2374_v34  ;;  %v2132_v21 = vmax.f32 %v1847_v29, 0.0  ;;  %v7552_v20 = vld [vmem:[#allocation62_spill] sm:$0xff]  ;;  %v5767_v30 = vpack.c.bf16 %v2131_v61, %v2129_v2  ;;  %v1236_v59 = vadd.f32 %v7555_v57, %v5454_v39  ;;  %v5774_v41 = vpop.f32.mrb[43].mxu1 }
 0x251   :  { %v2247_v9 = vsub.f32 %v2129_v2, %v7550_v11  ;;  %v7553_v34 = vmax.f32 %v7552_v20, 0.0  ;;  %v1850_v11 = vpop.f32.mrb[188].mxu0  ;;  %v2503_v46 = vmul.f32 %v2439_v45, %v2439_v45  ;;  %v5772_v56 = vadd.f32 %v1367_v3, %v5228_v42 }
 0x252   :  { %7548 = vst [vmem:[#allocation63_spill] sm:$0xff] %v5754_v37  ;;  %7554 = vst [vmem:[#allocation3_spill] sm:$0xff] %v5767_v30  ;;  %v2440_v29 = vsub.f32 %v2132_v21, %v1515_v52  ;;  %v1852_v37 = vpop.f32.mrb[189].mxu0  ;;  %v1851_v2 = vadd.f32 %v1850_v11, %v5470_v44  ;;  %v7388_v25 = vmax.f32 %v5759_v62, 0.0  ;;  %v7558_v11 = vld [vmem:[#allocation5_spill] sm:$0xff] }
 0x253   :  { %v2311_v24 = vmul.f32 %v2247_v9, %v2247_v9  ;;  %v2248_v55 = vsub.f32 %v2131_v61, %v7553_v34  ;;  %v7556_v9 = vld [vmem:[#allocation69_spill] sm:$0xff]  ;;  %v1854_v61 = vpop.f32.mrb[190].mxu0  ;;  %v7387_v45 = vmax.f32 %v5772_v56, 0.0  ;;  %v1853_v21 = vadd.f32 %v1852_v37, %v5473_v4 }
 0x254   :  { %v1240_v19 = vadd.f32 %v7556_v9, %v5454_v39  ;;  %v2504_v47 = vmul.f32 %v2440_v29, %v2440_v29  ;;  %v1856_v52 = vpop.f32.mrb[191].mxu0  ;;  %v2133_v10 = vmax.f32 %v1851_v2, 0.0  ;;  %v1855_v30 = vadd.f32 %v1854_v61, %v5470_v44 }
 0x255   :  { %v2375_v20 = vadd.f32 %v2311_v24, %v949_v48  ;;  %v2312_v34 = vmul.f32 %v2248_v55, %v2248_v55  ;;  %v1517_v9 = vmax.f32 %v1236_v59, 0.0  ;;  %v2640_v55 = vpack.c.bf16 %v7387_v45, %v7388_v25  ;;  %v1373_v2 = vpop.f32.mrb[44].mxu1 }
 0x256   :  { %v2134_v48 = vmax.f32 %v1853_v21, 0.0  ;;  %v1857_v24 = vadd.f32 %v1856_v52, %v5473_v4  ;;  %v951_v29 = vmul.f32 %v7558_v11, %v7558_v11  ;;  %v1519_v61 = vmax.f32 %v1240_v19, 0.0  ;;  %v5799_v45 = vpop.f32.mrb[45].mxu1  ;;  %v7563_v21 = vld [vmem:[#allocation6_spill] sm:$0xff]  ;;  %v7567_v19 = vld [vmem:[#allocation72_spill] sm:$0xff] }
 0x257   :  { %v5782_v3 = vadd.f32 %v2503_v46, %v2375_v20  ;;  %v2376_v57 = vadd.f32 %v2312_v34, %v950_v58  ;;  %v7560_v46 = vld [vmem:[#allocation65_spill] sm:$0xff]  ;;  %v2135_v34 = vmax.f32 %v1855_v30, 0.0  ;;  %v5797_v18 = vadd.f32 %v1373_v2, %v5228_v42  ;;  %4169 = vmatmul.mubr.bf16.gmra.mrb[128].mxu1 %v2640_v55  ;;  %v1377_v30 = vpop.f32.mrb[46].mxu1 }
 0x258   :  { %v7561_v20 = vmax.f32 %v7560_v46, 0.0  ;;  %v2441_v59 = vsub.f32 %v2134_v48, %v1517_v9  ;;  %v952_v52 = vmul.f32 %v7563_v21, %v7563_v21  ;;  %v1246_v9 = vadd.f32 %v7567_v19, %v5454_v39  ;;  %v5812_v55 = vpop.f32.mrb[47].mxu1 }
 0x259   :  { %7557 = vst [vmem:[#allocation59_spill] sm:$0xff] %v5782_v3  ;;  %v5792_v37 = vadd.f32 %v2504_v47, %v2376_v57  ;;  %v2136_v3 = vmax.f32 %v1857_v24, 0.0  ;;  %7562 = vst [vmem:[#allocation62_spill] sm:$0xff] %v5797_v18  ;;  %v7564_v47 = vld [vmem:[#allocation68_spill] sm:$0xff]  ;;  %v5805_v46 = vpack.c.bf16 %v2135_v34, %v2133_v10  ;;  %v5810_v2 = vadd.f32 %v1377_v30, %v5228_v42 }
 0x25a   :  { %v2249_v58 = vsub.f32 %v2133_v10, %v7561_v20  ;;  %v7565_v57 = vmax.f32 %v7564_v47, 0.0  ;;  %v1860_v20 = vpop.f32.mrb[192].mxu0  ;;  %v2505_v48 = vmul.f32 %v2441_v59, %v2441_v59  ;;  %v7391_v13 = vmax.f32 %v5797_v18, 0.0 }
 0x25b   :  { %7559 = vst [vmem:[#allocation4_spill] sm:$0xff] %v5792_v37  ;;  %7566 = vst [vmem:[#allocation66_spill] sm:$0xff] %v5805_v46  ;;  %v2442_v24 = vsub.f32 %v2136_v3, %v1519_v61  ;;  %v1862_v37 = vpop.f32.mrb[193].mxu0  ;;  %v1861_v10 = vadd.f32 %v1860_v20, %v5470_v44  ;;  %v7390_v59 = vmax.f32 %v5810_v2, 0.0  ;;  %v7571_v20 = vld [vmem:[#allocation7_spill] sm:$0xff] }
 0x25c   :  { %v2313_v11 = vmul.f32 %v2249_v58, %v2249_v58  ;;  %v2250_v25 = vsub.f32 %v2135_v34, %v7565_v57  ;;  %7568 = vst [vmem:[#allocation69_spill] sm:$0xff] %v5810_v2  ;;  %v7569_v58 = vld [vmem:[#allocation75_spill] sm:$0xff]  ;;  %v1864_v34 = vpop.f32.mrb[194].mxu0  ;;  %v1863_v3 = vadd.f32 %v1862_v37, %v5473_v4 }
 0x25d   :  { %v1250_v21 = vadd.f32 %v7569_v58, %v5454_v39  ;;  %v2506_v46 = vmul.f32 %v2442_v24, %v2442_v24  ;;  %v1866_v61 = vpop.f32.mrb[195].mxu0  ;;  %v2137_v40 = vmax.f32 %v1861_v10, 0.0  ;;  %v1865_v23 = vadd.f32 %v1864_v34, %v5470_v44  ;;  %v1383_v10 = vpop.f32.mrb[48].mxu1 }
 0x25e   :  { %v2377_v47 = vadd.f32 %v2313_v11, %v951_v29  ;;  %v2314_v57 = vmul.f32 %v2250_v25, %v2250_v25  ;;  %v1521_v58 = vmax.f32 %v1246_v9, 0.0  ;;  %v2641_v25 = vpack.c.bf16 %v7390_v59, %v7391_v13  ;;  %v5837_v59 = vpop.f32.mrb[49].mxu1 }
 0x25f   :  { %v2138_v29 = vmax.f32 %v1863_v3, 0.0  ;;  %v1867_v11 = vadd.f32 %v1866_v61, %v5473_v4  ;;  %v953_v24 = vmul.f32 %v7571_v20, %v7571_v20  ;;  %v1523_v34 = vmax.f32 %v1250_v21, 0.0  ;;  %7576 = vst [vmem:[#allocation68_spill] sm:$0xff] %v5837_v59  ;;  %v7577_v3 = vld [vmem:[#allocation8_spill] sm:$0xff] }
 0x260   :  { %v5820_v30 = vadd.f32 %v2505_v48, %v2377_v47  ;;  %v2378_v19 = vadd.f32 %v2314_v57, %v952_v52  ;;  %v7573_v48 = vld [vmem:[#allocation71_spill] sm:$0xff]  ;;  %v2139_v57 = vmax.f32 %v1865_v23, 0.0  ;;  %v5835_v18 = vadd.f32 %v1383_v10, %v5228_v42  ;;  %4172 = vmatprep.mubr.bf16.mxu1 %v2641_v25  ;;  %v1387_v23 = vpop.f32.mrb[50].mxu1  ;;  %v7581_v21 = vld [vmem:[#allocation80_spill] sm:$0xff] }
 0x261   :  { %v7574_v47 = vmax.f32 %v7573_v48, 0.0  ;;  %v2443_v9 = vsub.f32 %v2138_v29, %v1521_v58  ;;  %v954_v61 = vmul.f32 %v7577_v3, %v7577_v3  ;;  %v1256_v58 = vadd.f32 %v7581_v21, %v5454_v39  ;;  %v5850_v25 = vpop.f32.mrb[51].mxu1 }
 0x262   :  { %7570 = vst [vmem:[#allocation5_spill] sm:$0xff] %v5820_v30  ;;  %v5830_v37 = vadd.f32 %v2506_v46, %v2378_v19  ;;  %v2140_v30 = vmax.f32 %v1867_v11, 0.0  ;;  %7575 = vst [vmem:[#allocation6_spill] sm:$0xff] %v5835_v18  ;;  %v7578_v46 = vld [vmem:[#allocation74_spill] sm:$0xff]  ;;  %v5843_v48 = vpack.c.bf16 %v2139_v57, %v2137_v40  ;;  %v5848_v10 = vadd.f32 %v1387_v23, %v5228_v42 }
 0x263   :  { %v2251_v52 = vsub.f32 %v2137_v40, %v7574_v47  ;;  %v7579_v19 = vmax.f32 %v7578_v46, 0.0  ;;  %v1870_v47 = vpop.f32.mrb[196].mxu0  ;;  %v2507_v29 = vmul.f32 %v2443_v9, %v2443_v9  ;;  %7583 = vst [vmem:[#allocation7_spill] sm:$0xff] %v5850_v25  ;;  %v7395_v2 = vmax.f32 %v5835_v18, 0.0 }
 0x264   :  { %7572 = vst [vmem:[#allocation65_spill] sm:$0xff] %v5830_v37  ;;  %7580 = vst [vmem:[#allocation72_spill] sm:$0xff] %v5843_v48  ;;  %v2444_v11 = vsub.f32 %v2140_v30, %v1523_v34  ;;  %v1872_v37 = vpop.f32.mrb[197].mxu0  ;;  %v1871_v40 = vadd.f32 %v1870_v47, %v5470_v44  ;;  %v7394_v9 = vmax.f32 %v5848_v10, 0.0  ;;  %v7586_v47 = vld [vmem:[#allocation9_spill] sm:$0xff] }
 0x265   :  { %v2315_v20 = vmul.f32 %v2251_v52, %v2251_v52  ;;  %v2252_v13 = vsub.f32 %v2139_v57, %v7579_v19  ;;  %7582 = vst [vmem:[#allocation75_spill] sm:$0xff] %v5848_v10  ;;  %v7584_v52 = vld [vmem:[#allocation85_spill] sm:$0xff]  ;;  %v1874_v57 = vpop.f32.mrb[198].mxu0  ;;  %v1873_v30 = vadd.f32 %v1872_v37, %v5473_v4 }
 0x266   :  { %v1260_v3 = vadd.f32 %v7584_v52, %v5454_v39  ;;  %v2508_v48 = vmul.f32 %v2444_v11, %v2444_v11  ;;  %v1876_v34 = vpop.f32.mrb[199].mxu0  ;;  %v2141_v25 = vmax.f32 %v1871_v40, 0.0  ;;  %v1875_v59 = vadd.f32 %v1874_v57, %v5470_v44  ;;  %v1393_v40 = vpop.f32.mrb[52].mxu1 }
 0x267   :  { %v2379_v46 = vadd.f32 %v2315_v20, %v953_v24  ;;  %v2316_v19 = vmul.f32 %v2252_v13, %v2252_v13  ;;  %v1525_v52 = vmax.f32 %v1256_v58, 0.0  ;;  %v2642_v13 = vpack.c.bf16 %v7394_v9, %v7395_v2  ;;  %v5875_v9 = vpop.f32.mrb[53].mxu1 }
 0x268   :  { %v2142_v24 = vmax.f32 %v1873_v30, 0.0  ;;  %v1877_v20 = vadd.f32 %v1876_v34, %v5473_v4  ;;  %v955_v11 = vmul.f32 %v7586_v47, %v7586_v47  ;;  %v1527_v57 = vmax.f32 %v1260_v3, 0.0  ;;  %7591 = vst [vmem:[#allocation80_spill] sm:$0xff] %v5875_v9  ;;  %v7592_v30 = vld [vmem:[#allocation10_spill] sm:$0xff] }
 0x269   :  { %v5858_v23 = vadd.f32 %v2507_v29, %v2379_v46  ;;  %v2380_v21 = vadd.f32 %v2316_v19, %v954_v61  ;;  %v7588_v29 = vld [vmem:[#allocation79_spill] sm:$0xff]  ;;  %v2143_v19 = vmax.f32 %v1875_v59, 0.0  ;;  %v5873_v18 = vadd.f32 %v1393_v40, %v5228_v42  ;;  %4173 = vmatmul.mubr.bf16.gmra.mrb[132].mxu1 %v2642_v13  ;;  %v1397_v59 = vpop.f32.mrb[54].mxu1  ;;  %v7596_v3 = vld [vmem:[#allocation58_spill] sm:$0xff] }
 0x26a   :  { %v7589_v46 = vmax.f32 %v7588_v29, 0.0  ;;  %v2445_v58 = vsub.f32 %v2142_v24, %v1525_v52  ;;  %v956_v34 = vmul.f32 %v7592_v30, %v7592_v30  ;;  %v1266_v52 = vadd.f32 %v7596_v3, %v5454_v39  ;;  %v5888_v13 = vpop.f32.mrb[55].mxu1 }
 0x26b   :  { %7585 = vst [vmem:[#allocation71_spill] sm:$0xff] %v5858_v23  ;;  %v5868_v37 = vadd.f32 %v2508_v48, %v2380_v21  ;;  %v2144_v23 = vmax.f32 %v1877_v20, 0.0  ;;  %7590 = vst [vmem:[#allocation74_spill] sm:$0xff] %v5873_v18  ;;  %v7593_v48 = vld [vmem:[#allocation84_spill] sm:$0xff]  ;;  %v5881_v29 = vpack.c.bf16 %v2143_v19, %v2141_v25  ;;  %v5886_v40 = vadd.f32 %v1397_v59, %v5228_v42 }
 0x26c   :  { %v2253_v61 = vsub.f32 %v2141_v25, %v7589_v46  ;;  %v7594_v21 = vmax.f32 %v7593_v48, 0.0  ;;  %v1880_v46 = vpop.f32.mrb[200].mxu0  ;;  %v2509_v24 = vmul.f32 %v2445_v58, %v2445_v58  ;;  %7598 = vst [vmem:[#allocation79_spill] sm:$0xff] %v5888_v13  ;;  %v7399_v9 = vmax.f32 %v5873_v18, 0.0 }
 0x26d   :  { %7587 = vst [vmem:[#allocation8_spill] sm:$0xff] %v5868_v37  ;;  %7595 = vst [vmem:[#allocation85_spill] sm:$0xff] %v5881_v29  ;;  %v2446_v20 = vsub.f32 %v2144_v23, %v1527_v57  ;;  %v1882_v37 = vpop.f32.mrb[201].mxu0  ;;  %v1881_v25 = vadd.f32 %v1880_v46, %v5470_v44  ;;  %v7398_v58 = vmax.f32 %v5886_v40, 0.0  ;;  %v7601_v46 = vld [vmem:[#allocation11_spill] sm:$0xff] }
 0x26e   :  { %v2317_v47 = vmul.f32 %v2253_v61, %v2253_v61  ;;  %v2254_v2 = vsub.f32 %v2143_v19, %v7594_v21  ;;  %7597 = vst [vmem:[#allocation9_spill] sm:$0xff] %v5886_v40  ;;  %v7599_v61 = vld [vmem:[#allocation61_spill] sm:$0xff]  ;;  %v1884_v19 = vpop.f32.mrb[202].mxu0  ;;  %v1883_v23 = vadd.f32 %v1882_v37, %v5473_v4 }
 0x26f   :  { %v1270_v30 = vadd.f32 %v7599_v61, %v5454_v39  ;;  %v2510_v29 = vmul.f32 %v2446_v20, %v2446_v20  ;;  %v1886_v57 = vpop.f32.mrb[203].mxu0  ;;  %v2145_v13 = vmax.f32 %v1881_v25, 0.0  ;;  %v1885_v10 = vadd.f32 %v1884_v19, %v5470_v44  ;;  %v1403_v25 = vpop.f32.mrb[56].mxu1 }
 0x270   :  { %v2381_v48 = vadd.f32 %v2317_v47, %v955_v11  ;;  %v2318_v21 = vmul.f32 %v2254_v2, %v2254_v2  ;;  %v1529_v61 = vmax.f32 %v1266_v52, 0.0  ;;  %v2643_v2 = vpack.c.bf16 %v7398_v58, %v7399_v9  ;;  %v5913_v58 = vpop.f32.mrb[57].mxu1 }
 0x271   :  { %v2146_v11 = vmax.f32 %v1883_v23, 0.0  ;;  %v1887_v47 = vadd.f32 %v1886_v57, %v5473_v4  ;;  %v957_v20 = vmul.f32 %v7601_v46, %v7601_v46  ;;  %v1531_v19 = vmax.f32 %v1270_v30, 0.0  ;;  %7606 = vst [vmem:[#allocation61_spill] sm:$0xff] %v5913_v58  ;;  %v7607_v23 = vld [vmem:[#allocation12_spill] sm:$0xff] }
 0x272   :  { %v5896_v59 = vadd.f32 %v2509_v24, %v2381_v48  ;;  %v2382_v3 = vadd.f32 %v2318_v21, %v956_v34  ;;  %v7603_v24 = vld [vmem:[#allocation82_spill] sm:$0xff]  ;;  %v2147_v21 = vmax.f32 %v1885_v10, 0.0  ;;  %v5911_v18 = vadd.f32 %v1403_v25, %v5228_v42  ;;  %4176 = vmatprep.mubr.bf16.mxu1 %v2643_v2  ;;  %v1407_v10 = vpop.f32.mrb[58].mxu1  ;;  %v7611_v30 = vld [vmem:[#allocation64_spill] sm:$0xff] }
 0x273   :  { %v7604_v48 = vmax.f32 %v7603_v24, 0.0  ;;  %v2447_v52 = vsub.f32 %v2146_v11, %v1529_v61  ;;  %v958_v57 = vmul.f32 %v7607_v23, %v7607_v23  ;;  %v1276_v61 = vadd.f32 %v7611_v30, %v5454_v39  ;;  %v5926_v2 = vpop.f32.mrb[59].mxu1 }
 0x274   :  { %7600 = vst [vmem:[#allocation10_spill] sm:$0xff] %v5896_v59  ;;  %v5906_v37 = vadd.f32 %v2510_v29, %v2382_v3  ;;  %v2148_v59 = vmax.f32 %v1887_v47, 0.0  ;;  %7605 = vst [vmem:[#allocation58_spill] sm:$0xff] %v5911_v18  ;;  %v7608_v29 = vld [vmem:[#allocation77_spill] sm:$0xff]  ;;  %v5919_v24 = vpack.c.bf16 %v2147_v21, %v2145_v13  ;;  %v5924_v25 = vadd.f32 %v1407_v10, %v5228_v42 }
 0x275   :  { %v2255_v34 = vsub.f32 %v2145_v13, %v7604_v48  ;;  %v7609_v3 = vmax.f32 %v7608_v29, 0.0  ;;  %v1890_v48 = vpop.f32.mrb[204].mxu0  ;;  %v2511_v11 = vmul.f32 %v2447_v52, %v2447_v52  ;;  %7613 = vst [vmem:[#allocation12_spill] sm:$0xff] %v5926_v2  ;;  %v7403_v40 = vmax.f32 %v5911_v18, 0.0 }
 0x276   :  { %7602 = vst [vmem:[#allocation84_spill] sm:$0xff] %v5906_v37  ;;  %7610 = vst [vmem:[#allocation11_spill] sm:$0xff] %v5919_v24  ;;  %v2448_v47 = vsub.f32 %v2148_v59, %v1531_v19  ;;  %v1892_v37 = vpop.f32.mrb[205].mxu0  ;;  %v1891_v13 = vadd.f32 %v1890_v48, %v5470_v44  ;;  %v7402_v52 = vmax.f32 %v5924_v25, 0.0  ;;  %v7616_v48 = vld [vmem:[#allocation13_spill] sm:$0xff] }
 0x277   :  { %v2319_v46 = vmul.f32 %v2255_v34, %v2255_v34  ;;  %v2256_v9 = vsub.f32 %v2147_v21, %v7609_v3  ;;  %7612 = vst [vmem:[#allocation82_spill] sm:$0xff] %v5924_v25  ;;  %v7614_v34 = vld [vmem:[#allocation67_spill] sm:$0xff]  ;;  %v1894_v21 = vpop.f32.mrb[206].mxu0  ;;  %v1893_v59 = vadd.f32 %v1892_v37, %v5473_v4 }
 0x278   :  { %v1280_v23 = vadd.f32 %v7614_v34, %v5454_v39  ;;  %v2512_v24 = vmul.f32 %v2448_v47, %v2448_v47  ;;  %v1896_v19 = vpop.f32.mrb[207].mxu0  ;;  %v2149_v2 = vmax.f32 %v1891_v13, 0.0  ;;  %v1895_v58 = vadd.f32 %v1894_v21, %v5470_v44  ;;  %v1413_v13 = vpop.f32.mrb[60].mxu1 }
 0x279   :  { %v2383_v29 = vadd.f32 %v2319_v46, %v957_v20  ;;  %v2320_v3 = vmul.f32 %v2256_v9, %v2256_v9  ;;  %v1533_v34 = vmax.f32 %v1276_v61, 0.0  ;;  %v2644_v9 = vpack.c.bf16 %v7402_v52, %v7403_v40  ;;  %v5951_v52 = vpop.f32.mrb[61].mxu1 }
 0x27a   :  { %v2150_v20 = vmax.f32 %v1893_v59, 0.0  ;;  %v1897_v46 = vadd.f32 %v1896_v19, %v5473_v4  ;;  %v959_v47 = vmul.f32 %v7616_v48, %v7616_v48  ;;  %v1535_v21 = vmax.f32 %v1280_v23, 0.0  ;;  %7620 = vst [vmem:[#allocation67_spill] sm:$0xff] %v5951_v52  ;;  %v7621_v59 = vld [vmem:[#allocation14_spill] sm:$0xff] }
 0x27b   :  { %v5934_v10 = vadd.f32 %v2511_v11, %v2383_v29  ;;  %v2384_v30 = vadd.f32 %v2320_v3, %v958_v57  ;;  %v7618_v11 = vld [vmem:[#allocation83_spill] sm:$0xff]  ;;  %v2151_v3 = vmax.f32 %v1895_v58, 0.0  ;;  %v5949_v18 = vadd.f32 %v1413_v13, %v5228_v42  ;;  %4177 = vmatmul.mubr.bf16.gmra.mrb[136].mxu1 %v2644_v9  ;;  %v1417_v58 = vpop.f32.mrb[62].mxu1  ;;  %v7625_v23 = vld [vmem:[#allocation70_spill] sm:$0xff] }
 0x27c   :  { %v7619_v29 = vmax.f32 %v7618_v11, 0.0  ;;  %v2449_v61 = vsub.f32 %v2150_v20, %v1533_v34  ;;  %v960_v19 = vmul.f32 %v7621_v59, %v7621_v59  ;;  %v1286_v34 = vadd.f32 %v7625_v23, %v5454_v39  ;;  %v5964_v9 = vpop.f32.mrb[63].mxu1 }
 0x27d   :  { %7615 = vst [vmem:[#allocation77_spill] sm:$0xff] %v5934_v10  ;;  %v5944_v37 = vadd.f32 %v2512_v24, %v2384_v30  ;;  %v2152_v10 = vmax.f32 %v1897_v46, 0.0  ;;  %v7622_v24 = vld [vmem:[#allocation78_spill] sm:$0xff]  ;;  %v5957_v11 = vpack.c.bf16 %v2151_v3, %v2149_v2  ;;  %v5962_v13 = vadd.f32 %v1417_v58, %v5228_v42  ;;  %7627 = vst [vmem:[#allocation14_spill] sm:$0xff] %v5964_v9 }
 0x27e   :  { %v2257_v57 = vsub.f32 %v2149_v2, %v7619_v29  ;;  %v7623_v30 = vmax.f32 %v7622_v24, 0.0  ;;  %v1900_v29 = vpop.f32.mrb[208].mxu0  ;;  %v2513_v20 = vmul.f32 %v2449_v61, %v2449_v61  ;;  %v7406_v52 = vmax.f32 %v5949_v18, 0.0 }
 0x27f   :  { %7617 = vst [vmem:[#allocation64_spill] sm:$0xff] %v5944_v37  ;;  %7624 = vst [vmem:[#allocation13_spill] sm:$0xff] %v5957_v11  ;;  %v2450_v46 = vsub.f32 %v2152_v10, %v1535_v21  ;;  %v1902_v37 = vpop.f32.mrb[209].mxu0  ;;  %v1901_v2 = vadd.f32 %v1900_v29, %v5470_v44  ;;  %v7405_v61 = vmax.f32 %v5962_v13, 0.0  ;;  %v7630_v29 = vld [vmem:[#allocation15_spill] sm:$0xff] }
 0x280   :  { %v2321_v48 = vmul.f32 %v2257_v57, %v2257_v57  ;;  %v2258_v40 = vsub.f32 %v2151_v3, %v7623_v30  ;;  %7626 = vst [vmem:[#allocation83_spill] sm:$0xff] %v5962_v13  ;;  %v7628_v57 = vld [vmem:[#allocation73_spill] sm:$0xff]  ;;  %v1904_v3 = vpop.f32.mrb[210].mxu0  ;;  %v1903_v10 = vadd.f32 %v1902_v37, %v5473_v4 }
 0x281   :  { %v1290_v59 = vadd.f32 %v7628_v57, %v5454_v39  ;;  %v2514_v11 = vmul.f32 %v2450_v46, %v2450_v46  ;;  %v1906_v21 = vpop.f32.mrb[211].mxu0  ;;  %v2153_v9 = vmax.f32 %v1901_v2, 0.0  ;;  %v1905_v25 = vadd.f32 %v1904_v3, %v5470_v44 }
 0x282   :  { %v2385_v24 = vadd.f32 %v2321_v48, %v959_v47  ;;  %v2322_v30 = vmul.f32 %v2258_v40, %v2258_v40  ;;  %v1537_v57 = vmax.f32 %v1286_v34, 0.0  ;;  %v2645_v40 = vpack.c.bf16 %v7405_v61, %v7406_v52 }
 0x283   :  { %v2154_v47 = vmax.f32 %v1903_v10, 0.0  ;;  %v1907_v48 = vadd.f32 %v1906_v21, %v5473_v4  ;;  %v961_v46 = vmul.f32 %v7630_v29, %v7630_v29  ;;  %v1539_v2 = vmax.f32 %v1290_v59, 0.0  ;;  %v7633_v10 = vld [vmem:[#allocation16_spill] sm:$0xff] }
 0x284   :  { %v5972_v58 = vadd.f32 %v2513_v20, %v2385_v24  ;;  %v2386_v23 = vadd.f32 %v2322_v30, %v960_v19  ;;  %v7632_v20 = vmax.f32 %v5498_v22, 0.0  ;;  %v2155_v24 = vmax.f32 %v1905_v25, 0.0  ;;  %v1423_v30 = vpop.f32.mrb[64].mxu1  ;;  %4180 = vmatprep.mubr.bf16.mxu1 %v2645_v40  ;;  %v7636_v59 = vld [vmem:[#allocation76_spill] sm:$0xff] }
 0x285   :  { %v2451_v34 = vsub.f32 %v2154_v47, %v1537_v57  ;;  %v2156_v3 = vmax.f32 %v1907_v48, 0.0  ;;  %v5989_v61 = vpop.f32.mrb[65].mxu1  ;;  %v962_v21 = vmul.f32 %v7633_v10, %v7633_v10  ;;  %v1296_v57 = vadd.f32 %v7636_v59, %v5454_v39 }
 0x286   :  { %7629 = vst [vmem:[#allocation78_spill] sm:$0xff] %v5972_v58  ;;  %v5982_v37 = vadd.f32 %v2514_v11, %v2386_v23  ;;  %v2259_v19 = vsub.f32 %v2153_v9, %v7632_v20  ;;  %v5987_v58 = vadd.f32 %v1423_v30, %v5228_v42  ;;  %v7634_v11 = vmax.f32 %v5488_v12, 0.0  ;;  %v1427_v25 = vpop.f32.mrb[66].mxu1  ;;  %v1910_v20 = vpop.f32.mrb[212].mxu0 }
 0x287   :  { %v5995_v22 = vpack.c.bf16 %v2155_v24, %v2153_v9  ;;  %v2515_v47 = vmul.f32 %v2451_v34, %v2451_v34  ;;  %v2452_v48 = vsub.f32 %v2156_v3, %v1539_v2  ;;  %v6000_v30 = vadd.f32 %v1427_v25, %v5228_v42  ;;  %v6002_v40 = vpop.f32.mrb[67].mxu1  ;;  %v1912_v52 = vpop.f32.mrb[213].mxu0 }
 0x288   :  { %7631 = vst [vmem:[#allocation70_spill] sm:$0xff] %v5982_v37  ;;  %v2323_v29 = vmul.f32 %v2259_v19, %v2259_v19  ;;  %v2260_v23 = vsub.f32 %v2155_v24, %v7634_v11  ;;  %7637 = vst [vmem:[#allocation15_spill] sm:$0xff] %v6002_v40  ;;  %v7638_v19 = vld [vmem:[#allocation81_spill] sm:$0xff]  ;;  %v1911_v9 = vadd.f32 %v1910_v20, %v5470_v44  ;;  %v1914_v24 = vpop.f32.mrb[214].mxu0 }
 0x289   :  { %7635 = vst [vmem:[#allocation73_spill] sm:$0xff] %v5995_v22  ;;  %v1300_v10 = vadd.f32 %v7638_v19, %v5454_v39  ;;  %v2516_v37 = vmul.f32 %v2452_v48, %v2452_v48  ;;  %v7409_v22 = vmax.f32 %v5987_v58, 0.0  ;;  %v7408_v34 = vmax.f32 %v6000_v30, 0.0  ;;  %v1916_v3 = vpop.f32.mrb[215].mxu0  ;;  %v7640_v20 = vld [vmem:[#allocation17_spill] sm:$0xff] }
 0x28a   :  { %v2387_v12 = vadd.f32 %v2323_v29, %v961_v46  ;;  %v2324_v11 = vmul.f32 %v2260_v23, %v2260_v23  ;;  %v1913_v2 = vadd.f32 %v1912_v52, %v5473_v4  ;;  %v2157_v40 = vmax.f32 %v1911_v9, 0.0 }
 0x28b   :  { %v1915_v13 = vadd.f32 %v1914_v24, %v5470_v44  ;;  %v1541_v19 = vmax.f32 %v1296_v57, 0.0  ;;  %v2646_v46 = vpack.c.bf16 %v7408_v34, %v7409_v22  ;;  %v1917_v23 = vadd.f32 %v1916_v3, %v5473_v4 }
 0x28c   :  { %v6010_v25 = vadd.f32 %v2515_v47, %v2387_v12  ;;  %v2388_v59 = vadd.f32 %v2324_v11, %v962_v21  ;;  %v2158_v29 = vmax.f32 %v1913_v2, 0.0  ;;  %v963_v48 = vmul.f32 %v7640_v20, %v7640_v20  ;;  %v1433_v11 = vpop.f32.mrb[68].mxu1  ;;  %v7644_v2 = vld [vmem:[#allocation18_spill] sm:$0xff] }
 0x28d   :  { %v7642_v47 = vmax.f32 %v5501_v36, 0.0  ;;  %v2159_v12 = vmax.f32 %v1915_v13, 0.0  ;;  %v1543_v9 = vmax.f32 %v1300_v10, 0.0  ;;  %v2160_v24 = vmax.f32 %v1917_v23, 0.0  ;;  %v6027_v34 = vpop.f32.mrb[69].mxu1  ;;  %4181 = vmatmul.mubr.bf16.gmra.mrb[140].mxu1 %v2646_v46  ;;  %v7647_v10 = vld [vmem:[#allocation86_spill] sm:$0xff] }
 0x28e   :  { %7639 = vst [vmem:[#allocation16_spill] sm:$0xff] %v6010_v25  ;;  %v6020_v52 = vadd.f32 %v2516_v37, %v2388_v59  ;;  %v2453_v57 = vsub.f32 %v2158_v29, %v1541_v19  ;;  %v6025_v25 = vadd.f32 %v1433_v11, %v5228_v42  ;;  %7643 = vst [vmem:[#allocation81_spill] sm:$0xff] %v6027_v34  ;;  %v7645_v37 = vmax.f32 %v5491_v63, 0.0  ;;  %v1437_v13 = vpop.f32.mrb[70].mxu1 }
 0x28f   :  { %v2261_v21 = vsub.f32 %v2157_v40, %v7642_v47  ;;  %v964_v3 = vmul.f32 %v7644_v2, %v7644_v2  ;;  %v6033_v36 = vpack.c.bf16 %v2159_v12, %v2157_v40  ;;  %v1920_v47 = vpop.f32.mrb[216].mxu0  ;;  %v1306_v19 = vadd.f32 %v7647_v10, %v5454_v39  ;;  %v6040_v46 = vpop.f32.mrb[71].mxu1 }
 0x290   :  { %7641 = vst [vmem:[#allocation76_spill] sm:$0xff] %v6020_v52  ;;  %v2262_v59 = vsub.f32 %v2159_v12, %v7645_v37  ;;  %v2517_v29 = vmul.f32 %v2453_v57, %v2453_v57  ;;  %v2454_v23 = vsub.f32 %v2160_v24, %v1543_v9  ;;  %v6038_v11 = vadd.f32 %v1437_v13, %v5228_v42  ;;  %v1922_v22 = vpop.f32.mrb[217].mxu0 }
 0x291   :  { %v2325_v20 = vmul.f32 %v2261_v21, %v2261_v21  ;;  %7646 = vst [vmem:[#allocation17_spill] sm:$0xff] %v6033_v36  ;;  %7648 = vst [vmem:[#allocation18_spill] sm:$0xff] %v6040_v46  ;;  %v7649_v21 = vld [vmem:[#allocation87_spill] sm:$0xff]  ;;  %v1921_v40 = vadd.f32 %v1920_v47, %v5470_v44  ;;  %v1924_v12 = vpop.f32.mrb[218].mxu0  ;;  %v7411_v36 = vmax.f32 %v6025_v25, 0.0  ;;  %v1923_v9 = vadd.f32 %v1922_v22, %v5473_v4 }
 0x292   :  { %v1310_v2 = vadd.f32 %v7649_v21, %v5454_v39  ;;  %v2326_v37 = vmul.f32 %v2262_v59, %v2262_v59  ;;  %v2518_v52 = vmul.f32 %v2454_v23, %v2454_v23  ;;  %v7410_v57 = vmax.f32 %v6038_v11, 0.0  ;;  %v1926_v24 = vpop.f32.mrb[219].mxu0  ;;  %v7651_v47 = vld [vmem:[#allocation19_spill] sm:$0xff] }
 0x293   :  { %v2389_v63 = vadd.f32 %v2325_v20, %v963_v48  ;;  %v2161_v46 = vmax.f32 %v1921_v40, 0.0  ;;  %v1925_v34 = vadd.f32 %v1924_v12, %v5470_v44  ;;  %v1545_v21 = vmax.f32 %v1306_v19, 0.0 }
 0x294   :  { %v2390_v10 = vadd.f32 %v2326_v37, %v964_v3  ;;  %v2647_v48 = vpack.c.bf16 %v7410_v57, %v7411_v36  ;;  %v2162_v20 = vmax.f32 %v1923_v9, 0.0  ;;  %v1927_v59 = vadd.f32 %v1926_v24, %v5473_v4  ;;  %v1443_v37 = vpop.f32.mrb[72].mxu1  ;;  %v7654_v9 = vld [vmem:[#allocation20_spill] sm:$0xff] }
 0x295   :  { %v6048_v13 = vadd.f32 %v2517_v29, %v2389_v63  ;;  %v965_v23 = vmul.f32 %v7651_v47, %v7651_v47  ;;  %v7653_v29 = vmax.f32 %v5559_v31, 0.0  ;;  %v2163_v63 = vmax.f32 %v1925_v34, 0.0  ;;  %v6065_v57 = vpop.f32.mrb[73].mxu1 }
 0x296   :  { %v6058_v22 = vadd.f32 %v2518_v52, %v2390_v10  ;;  %v1547_v40 = vmax.f32 %v1310_v2, 0.0  ;;  %v2455_v19 = vsub.f32 %v2162_v20, %v1545_v21  ;;  %v2164_v12 = vmax.f32 %v1927_v59, 0.0  ;;  %4184 = vmatprep.mubr.bf16.mxu1 %v2647_v48  ;;  %v1447_v34 = vpop.f32.mrb[74].mxu1 }
 0x297   :  { %7650 = vst [vmem:[#allocation86_spill] sm:$0xff] %v6048_v13  ;;  %v2263_v3 = vsub.f32 %v2161_v46, %v7653_v29  ;;  %v6063_v13 = vadd.f32 %v1443_v37, %v5228_v42  ;;  %v966_v24 = vmul.f32 %v7654_v9, %v7654_v9  ;;  %v7655_v52 = vmax.f32 %v5533_v16, 0.0  ;;  %v1930_v29 = vpop.f32.mrb[220].mxu0  ;;  %v6078_v48 = vpop.f32.mrb[75].mxu1 }
 0x298   :  { %7652 = vst [vmem:[#allocation87_spill] sm:$0xff] %v6058_v22  ;;  %v6071_v31 = vpack.c.bf16 %v2163_v63, %v2161_v46  ;;  %v1316_v2 = vadd.f32 %v5548_v49, %v5454_v39  ;;  %v2519_v21 = vmul.f32 %v2455_v19, %v2455_v19  ;;  %v2456_v20 = vsub.f32 %v2164_v12, %v1547_v40  ;;  %v1932_v37 = vpop.f32.mrb[221].mxu0 }
 0x299   :  { %v2327_v47 = vmul.f32 %v2263_v3, %v2263_v3  ;;  %v2264_v10 = vsub.f32 %v2163_v63, %v7655_v52  ;;  %v6076_v59 = vadd.f32 %v1447_v34, %v5228_v42  ;;  %v1320_v3 = vadd.f32 %v5564_v28, %v5454_v39  ;;  %v1934_v63 = vpop.f32.mrb[222].mxu0 }
 0x29a   :  { %7656 = vst [vmem:[#allocation19_spill] sm:$0xff] %v6071_v31  ;;  %v1931_v46 = vadd.f32 %v1930_v29, %v5470_v44  ;;  %v2520_v52 = vmul.f32 %v2456_v20, %v2456_v20  ;;  %v7413_v36 = vmax.f32 %v6063_v13, 0.0  ;;  %v1933_v40 = vadd.f32 %v1932_v37, %v5473_v4  ;;  %v1936_v19 = vpop.f32.mrb[223].mxu0  ;;  %v7658_v29 = vld [vmem:[#allocation21_spill] sm:$0xff] }
 0x29b   :  { %v2391_v16 = vadd.f32 %v2327_v47, %v965_v23  ;;  %v2328_v9 = vmul.f32 %v2264_v10, %v2264_v10  ;;  %v7412_v49 = vmax.f32 %v6076_v59, 0.0  ;;  %v1935_v31 = vadd.f32 %v1934_v63, %v5470_v44 }
 0x29c   :  { %v2165_v22 = vmax.f32 %v1931_v46, 0.0  ;;  %v1549_v28 = vmax.f32 %v1316_v2, 0.0  ;;  %v2166_v47 = vmax.f32 %v1933_v40, 0.0  ;;  %v1937_v10 = vadd.f32 %v1936_v19, %v5473_v4  ;;  %v7661_v40 = vld [vmem:[#allocation22_spill] sm:$0xff] }
 0x29d   :  { %v6086_v12 = vadd.f32 %v2519_v21, %v2391_v16  ;;  %v2392_v34 = vadd.f32 %v2328_v9, %v966_v24  ;;  %v2648_v23 = vpack.c.bf16 %v7412_v49, %v7413_v36  ;;  %v967_v20 = vmul.f32 %v7658_v29, %v7658_v29  ;;  %v1453_v9 = vpop.f32.mrb[76].mxu1 }
 0x29e   :  { %v7660_v21 = vmax.f32 %v5573_v6, 0.0  ;;  %v2167_v16 = vmax.f32 %v1935_v31, 0.0  ;;  %v1551_v46 = vmax.f32 %v1320_v3, 0.0  ;;  %v2457_v2 = vsub.f32 %v2166_v47, %v1549_v28  ;;  %v6103_v49 = vpop.f32.mrb[77].mxu1 }
 0x29f   :  { %7657 = vst [vmem:[#allocation20_spill] sm:$0xff] %v6086_v12  ;;  %v6096_v37 = vadd.f32 %v2520_v52, %v2392_v34  ;;  %v2168_v63 = vmax.f32 %v1937_v10, 0.0  ;;  %v6101_v12 = vadd.f32 %v1453_v9, %v5228_v42  ;;  %4185 = vmatmul.mubr.bf16.gmra.mrb[144].mxu1 %v2648_v23  ;;  %v968_v19 = vmul.f32 %v7661_v40, %v7661_v40  ;;  %v1457_v31 = vpop.f32.mrb[78].mxu1 }
 0x2a0   :  { %v2265_v24 = vsub.f32 %v2165_v22, %v7660_v21  ;;  %v7662_v52 = vmax.f32 %v5562_v14, 0.0  ;;  %v6109_v6 = vpack.c.bf16 %v2167_v16, %v2165_v22  ;;  %v1940_v21 = vpop.f32.mrb[224].mxu0  ;;  %v1326_v3 = vadd.f32 %v5589_v43, %v5454_v39  ;;  %v6116_v23 = vpop.f32.mrb[79].mxu1 }
 0x2a1   :  { %7659 = vst [vmem:[#allocation21_spill] sm:$0xff] %v6096_v37  ;;  %v2521_v28 = vmul.f32 %v2457_v2, %v2457_v2  ;;  %v2458_v47 = vsub.f32 %v2168_v63, %v1551_v46  ;;  %v6114_v10 = vadd.f32 %v1457_v31, %v5228_v42  ;;  %v1942_v9 = vpop.f32.mrb[225].mxu0  ;;  %v1941_v22 = vadd.f32 %v1940_v21, %v5470_v44  ;;  %v7665_v21 = vld [vmem:[#allocation23_spill] sm:$0xff] }
 0x2a2   :  { %v2329_v29 = vmul.f32 %v2265_v24, %v2265_v24  ;;  %v2266_v34 = vsub.f32 %v2167_v16, %v7662_v52  ;;  %7663 = vst [vmem:[#allocation22_spill] sm:$0xff] %v6109_v6  ;;  %v1330_v24 = vadd.f32 %v5605_v33, %v5454_v39  ;;  %v1944_v16 = vpop.f32.mrb[226].mxu0  ;;  %v7415_v36 = vmax.f32 %v6101_v12, 0.0 }
 0x2a3   :  { %v2522_v52 = vmul.f32 %v2458_v47, %v2458_v47  ;;  %v7414_v43 = vmax.f32 %v6114_v10, 0.0  ;;  %v1943_v46 = vadd.f32 %v1942_v9, %v5473_v4  ;;  %v1946_v2 = vpop.f32.mrb[227].mxu0  ;;  %v2169_v37 = vmax.f32 %v1941_v22, 0.0 }
 0x2a4   :  { %v2393_v14 = vadd.f32 %v2329_v29, %v967_v20  ;;  %v2330_v40 = vmul.f32 %v2266_v34, %v2266_v34  ;;  %v1945_v6 = vadd.f32 %v1944_v16, %v5470_v44  ;;  %v1553_v33 = vmax.f32 %v1326_v3, 0.0 }
 0x2a5   :  { %v2649_v20 = vpack.c.bf16 %v7414_v43, %v7415_v36  ;;  %v2170_v29 = vmax.f32 %v1943_v46, 0.0  ;;  %v1947_v34 = vadd.f32 %v1946_v2, %v5473_v4  ;;  %v969_v47 = vmul.f32 %v7665_v21, %v7665_v21  ;;  %v7668_v46 = vld [vmem:[#allocation24_spill] sm:$0xff] }
 0x2a6   :  { %v6124_v63 = vadd.f32 %v2521_v28, %v2393_v14  ;;  %v2394_v31 = vadd.f32 %v2330_v40, %v968_v19  ;;  %v7667_v28 = vmax.f32 %v5600_v35, 0.0  ;;  %v2171_v14 = vmax.f32 %v1945_v6, 0.0  ;;  %v1463_v40 = vpop.f32.mrb[80].mxu1 }
 0x2a7   :  { %v1555_v22 = vmax.f32 %v1330_v24, 0.0  ;;  %v2459_v3 = vsub.f32 %v2170_v29, %v1553_v33  ;;  %v2172_v16 = vmax.f32 %v1947_v34, 0.0  ;;  %v6141_v43 = vpop.f32.mrb[81].mxu1  ;;  %4188 = vmatprep.mubr.bf16.mxu1 %v2649_v20  ;;  %v970_v2 = vmul.f32 %v7668_v46, %v7668_v46 }
 0x2a8   :  { %7664 = vst [vmem:[#allocation99_spill] sm:$0xff] %v6124_v63  ;;  %v6134_v9 = vadd.f32 %v2522_v52, %v2394_v31  ;;  %v2267_v19 = vsub.f32 %v2169_v37, %v7667_v28  ;;  %v6139_v63 = vadd.f32 %v1463_v40, %v5228_v42  ;;  %v7669_v52 = vmax.f32 %v5603_v0, 0.0  ;;  %v1467_v6 = vpop.f32.mrb[82].mxu1  ;;  %v1950_v28 = vpop.f32.mrb[228].mxu0 }
 0x2a9   :  { %v6147_v35 = vpack.c.bf16 %v2171_v14, %v2169_v37  ;;  %v1336_v24 = vadd.f32 %v5642_v8, %v5454_v39  ;;  %v2523_v33 = vmul.f32 %v2459_v3, %v2459_v3  ;;  %v2460_v29 = vsub.f32 %v2172_v16, %v1555_v22  ;;  %v6154_v20 = vpop.f32.mrb[83].mxu1  ;;  %v1952_v40 = vpop.f32.mrb[229].mxu0 }
 0x2aa   :  { %7666 = vst [vmem:[#allocation23_spill] sm:$0xff] %v6134_v9  ;;  %v2331_v21 = vmul.f32 %v2267_v19, %v2267_v19  ;;  %v2268_v31 = vsub.f32 %v2171_v14, %v7669_v52  ;;  %v6152_v34 = vadd.f32 %v1467_v6, %v5228_v42  ;;  %v1340_v19 = vadd.f32 %v5657_v54, %v5454_v39  ;;  %v1954_v14 = vpop.f32.mrb[230].mxu0 }
 0x2ab   :  { %7670 = vst [vmem:[#allocation24_spill] sm:$0xff] %v6147_v35  ;;  %v1951_v37 = vadd.f32 %v1950_v28, %v5470_v44  ;;  %v2524_v52 = vmul.f32 %v2460_v29, %v2460_v29  ;;  %v7417_v36 = vmax.f32 %v6139_v63, 0.0  ;;  %v1953_v22 = vadd.f32 %v1952_v40, %v5473_v4  ;;  %v1956_v3 = vpop.f32.mrb[231].mxu0  ;;  %v7672_v28 = vld [vmem:[#allocation25_spill] sm:$0xff] }
 0x2ac   :  { %v2395_v0 = vadd.f32 %v2331_v21, %v969_v47  ;;  %v2332_v46 = vmul.f32 %v2268_v31, %v2268_v31  ;;  %v7416_v8 = vmax.f32 %v6152_v34, 0.0  ;;  %v1955_v35 = vadd.f32 %v1954_v14, %v5470_v44 }
 0x2ad   :  { %v2173_v9 = vmax.f32 %v1951_v37, 0.0  ;;  %v1557_v54 = vmax.f32 %v1336_v24, 0.0  ;;  %v2174_v21 = vmax.f32 %v1953_v22, 0.0  ;;  %v1957_v31 = vadd.f32 %v1956_v3, %v5473_v4  ;;  %v7675_v22 = vld [vmem:[#allocation26_spill] sm:$0xff] }
 0x2ae   :  { %v6162_v16 = vadd.f32 %v2523_v33, %v2395_v0  ;;  %v2396_v6 = vadd.f32 %v2332_v46, %v970_v2  ;;  %v2650_v47 = vpack.c.bf16 %v7416_v8, %v7417_v36  ;;  %v971_v29 = vmul.f32 %v7672_v28, %v7672_v28  ;;  %v1473_v46 = vpop.f32.mrb[84].mxu1 }
 0x2af   :  { %v7674_v33 = vmax.f32 %v5640_v5, 0.0  ;;  %v2175_v0 = vmax.f32 %v1955_v35, 0.0  ;;  %v1559_v37 = vmax.f32 %v1340_v19, 0.0  ;;  %v2461_v24 = vsub.f32 %v2174_v21, %v1557_v54  ;;  %v6179_v8 = vpop.f32.mrb[85].mxu1 }
 0x2b0   :  { %7671 = vst [vmem:[#allocation100_spill] sm:$0xff] %v6162_v16  ;;  %v6172_v40 = vadd.f32 %v2524_v52, %v2396_v6  ;;  %v2176_v14 = vmax.f32 %v1957_v31, 0.0  ;;  %v6177_v16 = vadd.f32 %v1473_v46, %v5228_v42  ;;  %4189 = vmatmul.mubr.bf16.gmra.mrb[148].mxu1 %v2650_v47  ;;  %v972_v3 = vmul.f32 %v7675_v22, %v7675_v22  ;;  %v1477_v35 = vpop.f32.mrb[86].mxu1 }
 0x2b1   :  { %v2269_v2 = vsub.f32 %v2173_v9, %v7674_v33  ;;  %v7676_v52 = vmax.f32 %v5655_v51, 0.0  ;;  %v6185_v5 = vpack.c.bf16 %v2175_v0, %v2173_v9  ;;  %v1960_v33 = vpop.f32.mrb[232].mxu0  ;;  %v1346_v19 = vadd.f32 %v5684_v17, %v5454_v39  ;;  %v6192_v47 = vpop.f32.mrb[87].mxu1 }
 0x2b2   :  { %7673 = vst [vmem:[#allocation25_spill] sm:$0xff] %v6172_v40  ;;  %v2525_v54 = vmul.f32 %v2461_v24, %v2461_v24  ;;  %v2462_v21 = vsub.f32 %v2176_v14, %v1559_v37  ;;  %v6190_v31 = vadd.f32 %v1477_v35, %v5228_v42  ;;  %v1962_v46 = vpop.f32.mrb[233].mxu0  ;;  %v1961_v9 = vadd.f32 %v1960_v33, %v5470_v44  ;;  %v7679_v33 = vld [vmem:[#allocation27_spill] sm:$0xff] }
 0x2b3   :  { %v2333_v28 = vmul.f32 %v2269_v2, %v2269_v2  ;;  %v2270_v6 = vsub.f32 %v2175_v0, %v7676_v52  ;;  %7677 = vst [vmem:[#allocation26_spill] sm:$0xff] %v6185_v5  ;;  %v1350_v2 = vadd.f32 %v5697_v50, %v5454_v39  ;;  %v1964_v0 = vpop.f32.mrb[234].mxu0  ;;  %v7419_v36 = vmax.f32 %v6177_v16, 0.0 }
 0x2b4   :  { %v2526_v52 = vmul.f32 %v2462_v21, %v2462_v21  ;;  %v7418_v17 = vmax.f32 %v6190_v31, 0.0  ;;  %v1963_v37 = vadd.f32 %v1962_v46, %v5473_v4  ;;  %v1966_v24 = vpop.f32.mrb[235].mxu0  ;;  %v2177_v40 = vmax.f32 %v1961_v9, 0.0 }
 0x2b5   :  { %v2397_v51 = vadd.f32 %v2333_v28, %v971_v29  ;;  %v2334_v22 = vmul.f32 %v2270_v6, %v2270_v6  ;;  %v1965_v5 = vadd.f32 %v1964_v0, %v5470_v44  ;;  %v1561_v50 = vmax.f32 %v1346_v19, 0.0 }
 0x2b6   :  { %v2651_v29 = vpack.c.bf16 %v7418_v17, %v7419_v36  ;;  %v2178_v28 = vmax.f32 %v1963_v37, 0.0  ;;  %v1967_v6 = vadd.f32 %v1966_v24, %v5473_v4  ;;  %v973_v21 = vmul.f32 %v7679_v33, %v7679_v33  ;;  %v7682_v37 = vld [vmem:[#allocation28_spill] sm:$0xff] }
 0x2b7   :  { %v6200_v14 = vadd.f32 %v2525_v54, %v2397_v51  ;;  %v2398_v35 = vadd.f32 %v2334_v22, %v972_v3  ;;  %v7681_v54 = vmax.f32 %v5682_v60, 0.0  ;;  %v2179_v51 = vmax.f32 %v1965_v5, 0.0  ;;  %v1483_v22 = vpop.f32.mrb[88].mxu1 }
 0x2b8   :  { %v1563_v9 = vmax.f32 %v1350_v2, 0.0  ;;  %v2463_v19 = vsub.f32 %v2178_v28, %v1561_v50  ;;  %v2180_v0 = vmax.f32 %v1967_v6, 0.0  ;;  %v6217_v17 = vpop.f32.mrb[89].mxu1  ;;  %4192 = vmatprep.mubr.bf16.mxu1 %v2651_v29  ;;  %v974_v24 = vmul.f32 %v7682_v37, %v7682_v37 }
 0x2b9   :  { %7678 = vst [vmem:[#allocation101_spill] sm:$0xff] %v6200_v14  ;;  %v6210_v46 = vadd.f32 %v2526_v52, %v2398_v35  ;;  %v2271_v3 = vsub.f32 %v2177_v40, %v7681_v54  ;;  %v6215_v14 = vadd.f32 %v1483_v22, %v5228_v42  ;;  %v7683_v52 = vmax.f32 %v5695_v32, 0.0  ;;  %v1487_v5 = vpop.f32.mrb[90].mxu1  ;;  %v1970_v54 = vpop.f32.mrb[236].mxu0 }
 0x2ba   :  { %v6223_v60 = vpack.c.bf16 %v2179_v51, %v2177_v40  ;;  %v1356_v2 = vadd.f32 %v5723_v1, %v5454_v39  ;;  %v2527_v50 = vmul.f32 %v2463_v19, %v2463_v19  ;;  %v2464_v28 = vsub.f32 %v2180_v0, %v1563_v9  ;;  %v6230_v29 = vpop.f32.mrb[91].mxu1  ;;  %v1972_v22 = vpop.f32.mrb[237].mxu0 }
 0x2bb   :  { %7680 = vst [vmem:[#allocation27_spill] sm:$0xff] %v6210_v46  ;;  %v2335_v33 = vmul.f32 %v2271_v3, %v2271_v3  ;;  %v2272_v35 = vsub.f32 %v2179_v51, %v7683_v52  ;;  %v6228_v6 = vadd.f32 %v1487_v5, %v5228_v42  ;;  %v1360_v3 = vadd.f32 %v5736_v7, %v5454_v39  ;;  %v1974_v51 = vpop.f32.mrb[238].mxu0 }
 0x2bc   :  { %v1971_v40 = vadd.f32 %v1970_v54, %v5470_v44  ;;  %v2528_v52 = vmul.f32 %v2464_v28, %v2464_v28  ;;  %v7421_v36 = vmax.f32 %v6215_v14, 0.0  ;;  %v1973_v9 = vadd.f32 %v1972_v22, %v5473_v4  ;;  %v1976_v42 = vpop.f32.mrb[239].mxu0 }
 0x2bd   :  { %v2399_v32 = vadd.f32 %v2335_v33, %v973_v21  ;;  %v2336_v37 = vmul.f32 %v2272_v35, %v2272_v35  ;;  %v7420_v1 = vmax.f32 %v6228_v6, 0.0  ;;  %v1975_v46 = vadd.f32 %v1974_v51, %v5470_v44 }
 0x2be   :  { %v2181_v5 = vmax.f32 %v1971_v40, 0.0  ;;  %v1565_v7 = vmax.f32 %v1356_v2, 0.0  ;;  %v2182_v33 = vmax.f32 %v1973_v9, 0.0  ;;  %v1977_v35 = vadd.f32 %v1976_v42, %v5473_v4  ;;  %v7687_v40 = vld [vmem:[#allocation29_spill] sm:$0xff] }
 0x2bf   :  { %v6238_v19 = vadd.f32 %v2527_v50, %v2399_v32  ;;  %v2400_v0 = vadd.f32 %v2336_v37, %v974_v24  ;;  %v2652_v21 = vpack.c.bf16 %v7420_v1, %v7421_v36  ;;  %v7686_v28 = vmax.f32 %v5721_v27, 0.0  ;;  %v7689_v27 = vld [vmem:[#allocation30_spill] sm:$0xff] }
 0x2c0   :  { %v2183_v50 = vmax.f32 %v1975_v46, 0.0  ;;  %v1567_v32 = vmax.f32 %v1360_v3, 0.0  ;;  %v1366_v24 = vadd.f32 %v5761_v38, %v5454_v39  ;;  %v2465_v37 = vsub.f32 %v2182_v33, %v1565_v7 }
 0x2c1   :  { %7684 = vst [vmem:[#allocation28_spill] sm:$0xff] %v6238_v19  ;;  %v6246_v54 = vadd.f32 %v2528_v52, %v2400_v0  ;;  %v2273_v22 = vsub.f32 %v2181_v5, %v7686_v28  ;;  %v2184_v2 = vmax.f32 %v1977_v35, 0.0  ;;  %4193 = vmatmul.mubr.bf16.gmra.mrb[152].mxu1 %v2652_v21  ;;  %v975_v51 = vmul.f32 %v7687_v40, %v7687_v40  ;;  %v1980_v0 = vpop.f32.mrb[240].mxu0 }
 0x2c2   :  { %v7688_v9 = vmax.f32 %v5734_v26, 0.0  ;;  %v6256_v52 = vpack.c.bf16 %v2183_v50, %v2181_v5  ;;  %3242 = vmatprep.mubr.bf16.mxu1 %v7447_v15  ;;  %v976_v46 = vmul.f32 %v7689_v27, %v7689_v27  ;;  %v2529_v3 = vmul.f32 %v2465_v37, %v2465_v37  ;;  %v1982_v21 = vpop.f32.mrb[241].mxu0 }
 0x2c3   :  { %7685 = vst [vmem:[#allocation102_spill] sm:$0xff] %v6246_v54  ;;  %v2337_v1 = vmul.f32 %v2273_v22, %v2273_v22  ;;  %v2466_v38 = vsub.f32 %v2184_v2, %v1567_v32  ;;  %v1981_v7 = vadd.f32 %v1980_v0, %v5470_v44  ;;  %v1370_v33 = vadd.f32 %v5774_v41, %v5454_v39  ;;  %v1984_v5 = vpop.f32.mrb[242].mxu0  ;;  %v6269_v0 = vpop.f32.mrb[92].mxu1 }
 0x2c4   :  { %v2274_v42 = vsub.f32 %v2183_v50, %v7688_v9  ;;  %v1983_v26 = vadd.f32 %v1982_v21, %v5473_v4  ;;  %v1569_v22 = vmax.f32 %v1366_v24, 0.0  ;;  %v1985_v9 = vadd.f32 %v1984_v5, %v5470_v44  ;;  %v1986_v36 = vpop.f32.mrb[243].mxu0  ;;  %7691 = vst [vmem:[#allocation30_spill] sm:$0xff] %v6269_v0 }
 0x2c5   :  { %v2401_v35 = vadd.f32 %v2337_v1, %v975_v51  ;;  %v2530_v50 = vmul.f32 %v2466_v38, %v2466_v38  ;;  %v2185_v40 = vmax.f32 %v1981_v7, 0.0  ;;  %v1987_v2 = vadd.f32 %v1986_v36, %v5473_v4 }
 0x2c6   :  { %v2338_v28 = vmul.f32 %v2274_v42, %v2274_v42  ;;  %v2186_v37 = vmax.f32 %v1983_v26, 0.0  ;;  %v7692_v41 = vmax.f32 %v5759_v62, 0.0  ;;  %v2187_v51 = vmax.f32 %v1985_v9, 0.0  ;;  %v6273_v42 = vpop.f32.mrb[93].mxu1  ;;  %v1990_v9 = vpop.f32.mrb[244].mxu0 }
 0x2c7   :  { %v6266_v27 = vadd.f32 %v2529_v3, %v2401_v35  ;;  %v1571_v24 = vmax.f32 %v1370_v33, 0.0  ;;  %v2188_v21 = vmax.f32 %v1987_v2, 0.0  ;;  %v6277_v5 = vpop.f32.mrb[94].mxu1  ;;  %v7695_v3 = vld [vmem:[#allocation31_spill] sm:$0xff]  ;;  %v7696_v36 = vmax.f32 %v5772_v56, 0.0 }
 0x2c8   :  { %v2402_v32 = vadd.f32 %v2338_v28, %v976_v46  ;;  %v2275_v1 = vsub.f32 %v2185_v40, %v7692_v41  ;;  %v2467_v7 = vsub.f32 %v2186_v37, %v1569_v22  ;;  %7694 = vst [vmem:[#allocation104_spill] sm:$0xff] %v6277_v5  ;;  %v977_v46 = vmul.f32 %v7695_v3, %v7695_v3  ;;  %v6285_v62 = vpop.f32.mrb[95].mxu1  ;;  %v1992_v41 = vpop.f32.mrb[245].mxu0 }
 0x2c9   :  { %7690 = vst [vmem:[#allocation29_spill] sm:$0xff] %v6266_v27  ;;  %v2276_v28 = vsub.f32 %v2187_v51, %v7696_v36  ;;  %v6283_v26 = vpack.c.bf16 %v2187_v51, %v2185_v40  ;;  %3243 = vmatmul.mubr.bf16.vlgmr.msra.gmra.mrb[156].mxu1 %v5546_v53  ;;  %v1376_v33 = vadd.f32 %v5799_v45, %v5454_v39  ;;  %v1994_v45 = vpop.f32.mrb[246].mxu0 }
 0x2ca   :  { %v6275_v38 = vadd.f32 %v2530_v50, %v2402_v32  ;;  %v2339_v35 = vmul.f32 %v2275_v1, %v2275_v1  ;;  %v2531_v22 = vmul.f32 %v2467_v7, %v2467_v7  ;;  %v2468_v50 = vsub.f32 %v2188_v21, %v1571_v24  ;;  %3252 = vmatprep.mubr.bf16.mxu1 %v7447_v15  ;;  %v7697_v32 = vld [vmem:[#allocation32_spill] sm:$0xff]  ;;  %v1996_v3 = vpop.f32.mrb[247].mxu0 }
 0x2cb   :  { %v978_v37 = vmul.f32 %v7697_v32, %v7697_v32  ;;  %v2340_v56 = vmul.f32 %v2276_v28, %v2276_v28  ;;  %v1991_v40 = vadd.f32 %v1990_v9, %v5470_v44  ;;  %v1380_v1 = vadd.f32 %v5812_v55, %v5454_v39  ;;  %v7700_v9 = vld [vmem:[#allocation62_spill] sm:$0xff] }
 0x2cc   :  { %7693 = vst [vmem:[#allocation103_spill] sm:$0xff] %v6275_v38  ;;  %v2403_v2 = vadd.f32 %v2339_v35, %v977_v46  ;;  %v2532_v53 = vmul.f32 %v2468_v50, %v2468_v50  ;;  %v1993_v51 = vadd.f32 %v1992_v41, %v5473_v4  ;;  %v1573_v36 = vmax.f32 %v1376_v33, 0.0 }
 0x2cd   :  { %v2404_v24 = vadd.f32 %v2340_v56, %v978_v37  ;;  %v2189_v21 = vmax.f32 %v1991_v40, 0.0  ;;  %v1995_v46 = vadd.f32 %v1994_v45, %v5470_v44  ;;  %v1997_v35 = vadd.f32 %v1996_v3, %v5473_v4  ;;  %v7704_v40 = vld [vmem:[#allocation90_spill] sm:$0xff]  ;;  %v7705_v45 = vld [vmem:[#allocation69_spill] sm:$0xff] }
 0x2ce   :  { %v6297_v7 = vadd.f32 %v2531_v22, %v2403_v2  ;;  %v2190_v38 = vmax.f32 %v1993_v51, 0.0  ;;  %v7701_v32 = vmax.f32 %v7700_v9, 0.0  ;;  %v1575_v50 = vmax.f32 %v1380_v1, 0.0  ;;  %v7702_v22 = vld [vmem:[#allocation33_spill] sm:$0xff]  ;;  %v7703_v2 = vld [vmem:[#allocation68_spill] sm:$0xff]  ;;  %v2000_v1 = vpop.f32.mrb[248].mxu0 }
 0x2cf   :  { %v6301_v28 = vadd.f32 %v2532_v53, %v2404_v24  ;;  %v2191_v41 = vmax.f32 %v1995_v46, 0.0  ;;  %v2192_v54 = vmax.f32 %v1997_v35, 0.0  ;;  %v979_v37 = vmul.f32 %v7702_v22, %v7702_v22 }
 0x2d0   :  { %7698 = vst [vmem:[#allocation31_spill] sm:$0xff] %v6297_v7  ;;  %v2277_v55 = vsub.f32 %v2189_v21, %v7701_v32  ;;  %v2469_v27 = vsub.f32 %v2190_v38, %v1573_v36  ;;  %v1386_v33 = vadd.f32 %v7703_v2, %v5454_v39  ;;  %v7706_v53 = vmax.f32 %v7705_v45, 0.0  ;;  %v7707_v38 = vld [vmem:[#allocation34_spill] sm:$0xff]  ;;  %v2002_v32 = vpop.f32.mrb[249].mxu0 }
 0x2d1   :  { %7699 = vst [vmem:[#allocation32_spill] sm:$0xff] %v6301_v28  ;;  %3253 = vmatmul.mubr.bf16.gmra.mrb[160].mxu1 %v7704_v40  ;;  %v6312_v3 = vpack.c.bf16 %v2191_v41, %v2189_v21  ;;  %v2470_v9 = vsub.f32 %v2192_v54, %v1575_v50  ;;  %v980_v36 = vmul.f32 %v7707_v38, %v7707_v38  ;;  %v2004_v21 = vpop.f32.mrb[250].mxu0  ;;  %v7711_v28 = vld [vmem:[#allocation6_spill] sm:$0xff] }
 0x2d2   :  { %v2341_v56 = vmul.f32 %v2277_v55, %v2277_v55  ;;  %v2533_v51 = vmul.f32 %v2469_v27, %v2469_v27  ;;  %v2278_v24 = vsub.f32 %v2191_v41, %v7706_v53  ;;  %3262 = vmatprep.mubr.bf16.mxu1 %v7447_v15  ;;  %v2001_v35 = vadd.f32 %v2000_v1, %v5470_v44  ;;  %v7708_v55 = vld [vmem:[#allocation7_spill] sm:$0xff]  ;;  %v2006_v45 = vpop.f32.mrb[251].mxu0  ;;  %v6325_v1 = vpop.f32.mrb[96].mxu1 }
 0x2d3   :  { %v1390_v22 = vadd.f32 %v7708_v55, %v5454_v39  ;;  %v2534_v2 = vmul.f32 %v2470_v9, %v2470_v9  ;;  %v2003_v40 = vadd.f32 %v2002_v32, %v5473_v4  ;;  %v2005_v50 = vadd.f32 %v2004_v21, %v5470_v44  ;;  %7710 = vst [vmem:[#allocation33_spill] sm:$0xff] %v6325_v1  ;;  %v6329_v7 = vpop.f32.mrb[97].mxu1 }
 0x2d4   :  { %v2405_v46 = vadd.f32 %v2341_v56, %v979_v37  ;;  %v2342_v27 = vmul.f32 %v2278_v24, %v2278_v24  ;;  %v2193_v54 = vmax.f32 %v2001_v35, 0.0  ;;  %v1577_v53 = vmax.f32 %v1386_v33, 0.0  ;;  %7713 = vst [vmem:[#allocation68_spill] sm:$0xff] %v6329_v7  ;;  %v6333_v21 = vpop.f32.mrb[98].mxu1  ;;  %v7716_v33 = vld [vmem:[#allocation35_spill] sm:$0xff] }
 0x2d5   :  { %v2194_v37 = vmax.f32 %v2003_v40, 0.0  ;;  %v2007_v56 = vadd.f32 %v2006_v45, %v5473_v4  ;;  %v7712_v55 = vmax.f32 %v7711_v28, 0.0  ;;  %v2195_v9 = vmax.f32 %v2005_v50, 0.0  ;;  %7715 = vst [vmem:[#allocation69_spill] sm:$0xff] %v6333_v21  ;;  %v7717_v40 = vld [vmem:[#allocation75_spill] sm:$0xff]  ;;  %v6341_v28 = vpop.f32.mrb[99].mxu1 }
 0x2d6   :  { %v6321_v41 = vadd.f32 %v2533_v51, %v2405_v46  ;;  %v2406_v38 = vadd.f32 %v2342_v27, %v980_v36  ;;  %v1579_v32 = vmax.f32 %v1390_v22, 0.0  ;;  %v981_v36 = vmul.f32 %v7716_v33, %v7716_v33  ;;  %7719 = vst [vmem:[#allocation34_spill] sm:$0xff] %v6341_v28  ;;  %v7720_v50 = vld [vmem:[#allocation93_spill] sm:$0xff]  ;;  %v7721_v22 = vld [vmem:[#allocation80_spill] sm:$0xff] }
 0x2d7   :  { %v2279_v24 = vsub.f32 %v2193_v54, %v7712_v55  ;;  %v2471_v46 = vsub.f32 %v2194_v37, %v1577_v53  ;;  %v2196_v35 = vmax.f32 %v2007_v56, 0.0  ;;  %v7718_v45 = vmax.f32 %v7717_v40, 0.0  ;;  %v2010_v37 = vpop.f32.mrb[252].mxu0  ;;  %v7722_v56 = vld [vmem:[#allocation36_spill] sm:$0xff]  ;;  %v7723_v40 = vld [vmem:[#allocation79_spill] sm:$0xff] }
 0x2d8   :  { %7709 = vst [vmem:[#allocation62_spill] sm:$0xff] %v6321_v41  ;;  %v6331_v51 = vadd.f32 %v2534_v2, %v2406_v38  ;;  %v6339_v19 = vpack.c.bf16 %v2195_v9, %v2193_v54  ;;  %v1396_v2 = vadd.f32 %v7721_v22, %v5454_v39  ;;  %v982_v55 = vmul.f32 %v7722_v56, %v7722_v56 }
 0x2d9   :  { %v2343_v27 = vmul.f32 %v2279_v24, %v2279_v24  ;;  %v2280_v41 = vsub.f32 %v2195_v9, %v7718_v45  ;;  %3263 = vmatmul.mubr.bf16.gmra.mrb[164].mxu1 %v7720_v50  ;;  %v2535_v53 = vmul.f32 %v2471_v46, %v2471_v46  ;;  %v2472_v38 = vsub.f32 %v2196_v35, %v1579_v32  ;;  %v2012_v9 = vpop.f32.mrb[253].mxu0 }
 0x2da   :  { %7714 = vst [vmem:[#allocation90_spill] sm:$0xff] %v6331_v51  ;;  %3272 = vmatprep.mubr.bf16.mxu1 %v7447_v15  ;;  %v2011_v54 = vadd.f32 %v2010_v37, %v5470_v44  ;;  %v1400_v45 = vadd.f32 %v7723_v40, %v5454_v39  ;;  %v2013_v51 = vadd.f32 %v2012_v9, %v5473_v4  ;;  %v2014_v22 = vpop.f32.mrb[254].mxu0  ;;  %v1581_v1 = vmax.f32 %v1396_v2, 0.0  ;;  %v7726_v37 = vld [vmem:[#allocation74_spill] sm:$0xff] }
 0x2db   :  { %v2407_v24 = vadd.f32 %v2343_v27, %v981_v36  ;;  %v2344_v33 = vmul.f32 %v2280_v41, %v2280_v41  ;;  %v2536_v50 = vmul.f32 %v2472_v38, %v2472_v38  ;;  %v2016_v21 = vpop.f32.mrb[255].mxu0  ;;  %v2015_v36 = vadd.f32 %v2014_v22, %v5470_v44 }
 0x2dc   :  { %v2197_v35 = vmax.f32 %v2011_v54, 0.0  ;;  %v2198_v28 = vmax.f32 %v2013_v51, 0.0  ;;  %v2017_v41 = vadd.f32 %v2016_v21, %v5473_v4  ;;  %v7727_v56 = vmax.f32 %v7726_v37, 0.0  ;;  %v7731_v21 = vld [vmem:[#allocation9_spill] sm:$0xff] }
 0x2dd   :  { %v6353_v46 = vadd.f32 %v2535_v53, %v2407_v24  ;;  %v2408_v32 = vadd.f32 %v2344_v33, %v982_v55  ;;  %v1583_v38 = vmax.f32 %v1400_v45, 0.0  ;;  %v2199_v9 = vmax.f32 %v2015_v36, 0.0  ;;  %v7728_v53 = vld [vmem:[#allocation37_spill] sm:$0xff]  ;;  %v7730_v33 = vld [vmem:[#allocation96_spill] sm:$0xff]  ;;  %v2020_v45 = vpop.f32.mrb[0].mxu0 }
 0x2de   :  { %v2281_v40 = vsub.f32 %v2197_v35, %v7727_v56  ;;  %v2473_v7 = vsub.f32 %v2198_v28, %v1581_v1  ;;  %v2200_v5 = vmax.f32 %v2017_v41, 0.0  ;;  %v983_v55 = vmul.f32 %v7728_v53, %v7728_v53  ;;  %v7729_v24 = vld [vmem:[#allocation61_spill] sm:$0xff]  ;;  %v7733_v1 = vld [vmem:[#allocation38_spill] sm:$0xff]  ;;  %v2022_v56 = vpop.f32.mrb[1].mxu0 }
 0x2df   :  { %7724 = vst [vmem:[#allocation7_spill] sm:$0xff] %v6353_v46  ;;  %v6357_v27 = vadd.f32 %v2536_v50, %v2408_v32  ;;  %v1406_v2 = vadd.f32 %v7729_v24, %v5454_v39  ;;  %v7732_v50 = vmax.f32 %v7731_v21, 0.0  ;;  %v6368_v32 = vpack.c.bf16 %v2199_v9, %v2197_v35  ;;  %v2024_v35 = vpop.f32.mrb[2].mxu0 }
 0x2e0   :  { %v2345_v51 = vmul.f32 %v2281_v40, %v2281_v40  ;;  %v2537_v54 = vmul.f32 %v2473_v7, %v2473_v7  ;;  %v2474_v37 = vsub.f32 %v2200_v5, %v1583_v38  ;;  %v984_v28 = vmul.f32 %v7733_v1, %v7733_v1  ;;  %v7734_v40 = vld [vmem:[#allocation12_spill] sm:$0xff]  ;;  %v2026_v21 = vpop.f32.mrb[3].mxu0 }
 0x2e1   :  { %7725 = vst [vmem:[#allocation6_spill] sm:$0xff] %v6357_v27  ;;  %3273 = vmatmul.mubr.bf16.gmra.mrb[168].mxu1 %v7730_v33  ;;  %v2282_v22 = vsub.f32 %v2199_v9, %v7732_v50  ;;  %v2021_v41 = vadd.f32 %v2020_v45, %v5470_v44  ;;  %v1410_v53 = vadd.f32 %v7734_v40, %v5454_v39  ;;  %v1585_v50 = vmax.f32 %v1406_v2, 0.0  ;;  %v6381_v45 = vpop.f32.mrb[100].mxu1  ;;  %v7737_v27 = vld [vmem:[#allocation58_spill] sm:$0xff]  ;;  %v7742_v2 = vld [vmem:[#allocation39_spill] sm:$0xff] }
 0x2e2   :  { %3282 = vmatprep.mubr.bf16.mxu1 %v7447_v15  ;;  %v2409_v36 = vadd.f32 %v2345_v51, %v983_v55  ;;  %v2538_v24 = vmul.f32 %v2474_v37, %v2474_v37  ;;  %v2023_v33 = vadd.f32 %v2022_v56, %v5473_v4  ;;  %v2025_v38 = vadd.f32 %v2024_v35, %v5470_v44  ;;  %v6385_v46 = vpop.f32.mrb[101].mxu1 }
 0x2e3   :  { %v2346_v7 = vmul.f32 %v2282_v22, %v2282_v22  ;;  %v2201_v5 = vmax.f32 %v2021_v41, 0.0  ;;  %v2027_v51 = vadd.f32 %v2026_v21, %v5473_v4  ;;  %7736 = vst [vmem:[#allocation75_spill] sm:$0xff] %v6381_v45  ;;  %v7738_v40 = vmax.f32 %v7737_v27, 0.0  ;;  %7739 = vst [vmem:[#allocation93_spill] sm:$0xff] %v6385_v46  ;;  %v6389_v35 = vpop.f32.mrb[102].mxu1 }
 0x2e4   :  { %v6377_v9 = vadd.f32 %v2537_v54, %v2409_v36  ;;  %v2202_v55 = vmax.f32 %v2023_v33, 0.0  ;;  %v2203_v37 = vmax.f32 %v2025_v38, 0.0  ;;  %v1587_v56 = vmax.f32 %v1410_v53, 0.0  ;;  %7741 = vst [vmem:[#allocation36_spill] sm:$0xff] %v6389_v35  ;;  %v7743_v33 = vld [vmem:[#allocation82_spill] sm:$0xff]  ;;  %v6397_v27 = vpop.f32.mrb[103].mxu1 }
 0x2e5   :  { %v2410_v1 = vadd.f32 %v2346_v7, %v984_v28  ;;  %v2283_v22 = vsub.f32 %v2201_v5, %v7738_v40  ;;  %v2204_v41 = vmax.f32 %v2027_v51, 0.0  ;;  %v985_v28 = vmul.f32 %v7742_v2, %v7742_v2  ;;  %7745 = vst [vmem:[#allocation79_spill] sm:$0xff] %v6397_v27  ;;  %v7746_v38 = vld [vmem:[#allocation57_spill] sm:$0xff]  ;;  %v7747_v53 = vld [vmem:[#allocation67_spill] sm:$0xff]  ;;  %v7748_v51 = vld [vmem:[#allocation40_spill] sm:$0xff] }
 0x2e6   :  { %7735 = vst [vmem:[#allocation35_spill] sm:$0xff] %v6377_v9  ;;  %v2475_v36 = vsub.f32 %v2202_v55, %v1585_v50  ;;  %v7744_v21 = vmax.f32 %v7743_v33, 0.0  ;;  %v6395_v45 = vpack.c.bf16 %v2203_v37, %v2201_v5  ;;  %v2030_v55 = vpop.f32.mrb[4].mxu0  ;;  %v986_v40 = vmul.f32 %v7748_v51, %v7748_v51  ;;  %v7749_v33 = vld [vmem:[#allocation14_spill] sm:$0xff] }
 0x2e7   :  { %v6387_v54 = vadd.f32 %v2538_v24, %v2410_v1  ;;  %v2347_v7 = vmul.f32 %v2283_v22, %v2283_v22  ;;  %v1416_v24 = vadd.f32 %v7747_v53, %v5454_v39  ;;  %v2476_v1 = vsub.f32 %v2204_v41, %v1587_v56 }
 0x2e8   :  { %v2284_v9 = vsub.f32 %v2203_v37, %v7744_v21  ;;  %v2539_v50 = vmul.f32 %v2475_v36, %v2475_v36  ;;  %v2031_v5 = vadd.f32 %v2030_v55, %v5470_v44  ;;  %v2032_v37 = vpop.f32.mrb[5].mxu0  ;;  %v1420_v21 = vadd.f32 %v7749_v33, %v5454_v39 }
 0x2e9   :  { %7740 = vst [vmem:[#allocation80_spill] sm:$0xff] %v6387_v54  ;;  %3283 = vmatmul.mubr.bf16.gmra.mrb[172].mxu1 %v7746_v38  ;;  %v2411_v22 = vadd.f32 %v2347_v7, %v985_v28  ;;  %v2540_v38 = vmul.f32 %v2476_v1, %v2476_v1  ;;  %v2033_v54 = vadd.f32 %v2032_v37, %v5473_v4  ;;  %v2034_v53 = vpop.f32.mrb[6].mxu0  ;;  %v1589_v27 = vmax.f32 %v1416_v24, 0.0 }
 0x2ea   :  { %3292 = vmatprep.mubr.bf16.mxu1 %v7447_v15  ;;  %v2348_v2 = vmul.f32 %v2284_v9, %v2284_v9  ;;  %v2205_v41 = vmax.f32 %v2031_v5, 0.0  ;;  %v2036_v35 = vpop.f32.mrb[7].mxu0  ;;  %v2035_v28 = vadd.f32 %v2034_v53, %v5470_v44  ;;  %v7752_v55 = vmax.f32 %v5949_v18, 0.0 }
 0x2eb   :  { %v6409_v36 = vadd.f32 %v2539_v50, %v2411_v22  ;;  %v2206_v46 = vmax.f32 %v2033_v54, 0.0  ;;  %v2037_v9 = vadd.f32 %v2036_v35, %v5473_v4  ;;  %v1591_v1 = vmax.f32 %v1420_v21, 0.0  ;;  %v7753_v50 = vld [vmem:[#allocation41_spill] sm:$0xff]  ;;  %v7754_v22 = vld [vmem:[#allocation3_spill] sm:$0xff]  ;;  %v2040_v21 = vpop.f32.mrb[8].mxu0 }
 0x2ec   :  { %v2412_v56 = vadd.f32 %v2348_v2, %v986_v40  ;;  %v2285_v51 = vsub.f32 %v2205_v41, %v7752_v55  ;;  %v2207_v37 = vmax.f32 %v2035_v28, 0.0  ;;  %v987_v40 = vmul.f32 %v7753_v50, %v7753_v50  ;;  %v7755_v35 = vld [vmem:[#allocation83_spill] sm:$0xff] }
 0x2ed   :  { %7750 = vst [vmem:[#allocation74_spill] sm:$0xff] %v6409_v36  ;;  %v2477_v33 = vsub.f32 %v2206_v46, %v1589_v27  ;;  %v2208_v0 = vmax.f32 %v2037_v9, 0.0  ;;  %v1426_v24 = vadd.f32 %v5989_v61, %v5454_v39  ;;  %v7756_v5 = vmax.f32 %v7755_v35, 0.0  ;;  %v7757_v46 = vld [vmem:[#allocation42_spill] sm:$0xff]  ;;  %v2042_v61 = vpop.f32.mrb[9].mxu0  ;;  %v7758_v9 = vld [vmem:[#allocation15_spill] sm:$0xff] }
 0x2ee   :  { %v6413_v7 = vadd.f32 %v2540_v38, %v2412_v56  ;;  %v2349_v54 = vmul.f32 %v2285_v51, %v2285_v51  ;;  %v6424_v53 = vpack.c.bf16 %v2207_v37, %v2205_v41  ;;  %v988_v27 = vmul.f32 %v7757_v46, %v7757_v46  ;;  %v2044_v41 = vpop.f32.mrb[10].mxu0 }
 0x2ef   :  { %v2541_v2 = vmul.f32 %v2477_v33, %v2477_v33  ;;  %v2286_v38 = vsub.f32 %v2207_v37, %v7756_v5  ;;  %v2478_v18 = vsub.f32 %v2208_v0, %v1591_v1  ;;  %v2041_v28 = vadd.f32 %v2040_v21, %v5470_v44  ;;  %v6437_v21 = vpop.f32.mrb[104].mxu1 }
 0x2f0   :  { %7751 = vst [vmem:[#allocation37_spill] sm:$0xff] %v6413_v7  ;;  %v2413_v56 = vadd.f32 %v2349_v54, %v987_v40  ;;  %v1430_v55 = vadd.f32 %v7758_v9, %v5454_v39  ;;  %v2043_v50 = vadd.f32 %v2042_v61, %v5473_v4  ;;  %v2045_v1 = vadd.f32 %v2044_v41, %v5470_v44  ;;  %v6441_v9 = vpop.f32.mrb[105].mxu1 }
 0x2f1   :  { %3293 = vmatmul.mubr.bf16.gmra.mrb[176].mxu1 %v7754_v22  ;;  %v2350_v51 = vmul.f32 %v2286_v38, %v2286_v38  ;;  %v2542_v33 = vmul.f32 %v2478_v18, %v2478_v18  ;;  %v2209_v0 = vmax.f32 %v2041_v28, 0.0  ;;  %v2046_v22 = vpop.f32.mrb[11].mxu0  ;;  %v1593_v35 = vmax.f32 %v1426_v24, 0.0  ;;  %v6445_v41 = vpop.f32.mrb[106].mxu1  ;;  %v7763_v24 = vld [vmem:[#allocation43_spill] sm:$0xff] }
 0x2f2   :  { %3302 = vmatprep.mubr.bf16.mxu1 %v7447_v15  ;;  %v6433_v37 = vadd.f32 %v2541_v2, %v2413_v56  ;;  %v2210_v40 = vmax.f32 %v2043_v50, 0.0  ;;  %v2047_v54 = vadd.f32 %v2046_v22, %v5473_v4  ;;  %v7760_v46 = vmax.f32 %v5987_v58, 0.0  ;;  %7762 = vst [vmem:[#allocation9_spill] sm:$0xff] %v6445_v41  ;;  %v6453_v58 = vpop.f32.mrb[107].mxu1 }
 0x2f3   :  { %v2414_v5 = vadd.f32 %v2350_v51, %v988_v27  ;;  %v2211_v18 = vmax.f32 %v2045_v1, 0.0  ;;  %v1595_v61 = vmax.f32 %v1430_v55, 0.0  ;;  %v989_v27 = vmul.f32 %v7763_v24, %v7763_v24  ;;  %v7765_v1 = vld [vmem:[#allocation66_spill] sm:$0xff]  ;;  %v7766_v55 = vld [vmem:[#allocation81_spill] sm:$0xff] }
 0x2f4   :  { %7759 = vst [vmem:[#allocation61_spill] sm:$0xff] %v6433_v37  ;;  %v2287_v38 = vsub.f32 %v2209_v0, %v7760_v46  ;;  %v2479_v56 = vsub.f32 %v2210_v40, %v1593_v35  ;;  %v2212_v28 = vmax.f32 %v2047_v54, 0.0  ;;  %v7764_v50 = vmax.f32 %v6000_v30, 0.0  ;;  %v2050_v40 = vpop.f32.mrb[12].mxu0  ;;  %v7767_v54 = vld [vmem:[#allocation44_spill] sm:$0xff]  ;;  %v7768_v24 = vld [vmem:[#allocation18_spill] sm:$0xff] }
 0x2f5   :  { %v6443_v2 = vadd.f32 %v2542_v33, %v2414_v5  ;;  %v6451_v37 = vpack.c.bf16 %v2211_v18, %v2209_v0  ;;  %v1436_v33 = vadd.f32 %v7766_v55, %v5454_v39  ;;  %v990_v46 = vmul.f32 %v7767_v54, %v7767_v54 }
 0x2f6   :  { %v2351_v51 = vmul.f32 %v2287_v38, %v2287_v38  ;;  %v2288_v22 = vsub.f32 %v2211_v18, %v7764_v50  ;;  %v2543_v35 = vmul.f32 %v2479_v56, %v2479_v56  ;;  %v2480_v5 = vsub.f32 %v2212_v28, %v1595_v61  ;;  %v2052_v18 = vpop.f32.mrb[13].mxu0 }
 0x2f7   :  { %7761 = vst [vmem:[#allocation96_spill] sm:$0xff] %v6443_v2  ;;  %v2051_v0 = vadd.f32 %v2050_v40, %v5470_v44  ;;  %v1440_v50 = vadd.f32 %v7768_v24, %v5454_v39  ;;  %v2053_v2 = vadd.f32 %v2052_v18, %v5473_v4  ;;  %v2054_v55 = vpop.f32.mrb[14].mxu0  ;;  %v1597_v36 = vmax.f32 %v1436_v33, 0.0 }
 0x2f8   :  { %v2415_v38 = vadd.f32 %v2351_v51, %v989_v27  ;;  %v2352_v30 = vmul.f32 %v2288_v22, %v2288_v22  ;;  %v2056_v7 = vpop.f32.mrb[15].mxu0  ;;  %v2055_v27 = vadd.f32 %v2054_v55, %v5470_v44  ;;  %v7771_v40 = vmax.f32 %v6025_v25, 0.0 }
 0x2f9   :  { %3303 = vmatmul.mubr.bf16.gmra.mrb[180].mxu1 %v7765_v1  ;;  %v2544_v1 = vmul.f32 %v2480_v5, %v2480_v5  ;;  %v2213_v28 = vmax.f32 %v2051_v0, 0.0  ;;  %v2214_v41 = vmax.f32 %v2053_v2, 0.0  ;;  %v2057_v51 = vadd.f32 %v2056_v7, %v5473_v4  ;;  %v6473_v5 = vpop.f32.mrb[108].mxu1  ;;  %v7774_v7 = vld [vmem:[#allocation72_spill] sm:$0xff] }
 0x2fa   :  { %3312 = vmatprep.mubr.bf16.mxu1 %v7447_v15  ;;  %v6465_v56 = vadd.f32 %v2543_v35, %v2415_v38  ;;  %v2416_v61 = vadd.f32 %v2352_v30, %v990_v46  ;;  %v1599_v18 = vmax.f32 %v1440_v50, 0.0  ;;  %v2215_v35 = vmax.f32 %v2055_v27, 0.0  ;;  %v6475_v46 = vpop.f32.mrb[109].mxu1  ;;  %v7772_v30 = vld [vmem:[#allocation45_spill] sm:$0xff]  ;;  %v7776_v27 = vld [vmem:[#allocation46_spill] sm:$0xff] }
 0x2fb   :  { %v2289_v54 = vsub.f32 %v2213_v28, %v7771_v40  ;;  %v2481_v24 = vsub.f32 %v2214_v41, %v1597_v36  ;;  %v2216_v38 = vmax.f32 %v2057_v51, 0.0  ;;  %v991_v2 = vmul.f32 %v7772_v30, %v7772_v30  ;;  %v6479_v0 = vpop.f32.mrb[110].mxu1  ;;  %v2060_v36 = vpop.f32.mrb[16].mxu0 }
 0x2fc   :  { %7769 = vst [vmem:[#allocation38_spill] sm:$0xff] %v6465_v56  ;;  %v6469_v22 = vadd.f32 %v2544_v1, %v2416_v61  ;;  %7773 = vst [vmem:[#allocation58_spill] sm:$0xff] %v6479_v0  ;;  %v7775_v25 = vmax.f32 %v6038_v11, 0.0  ;;  %v6484_v61 = vpack.c.bf16 %v2215_v35, %v2213_v28  ;;  %v6486_v41 = vpop.f32.mrb[111].mxu1  ;;  %v992_v51 = vmul.f32 %v7776_v27, %v7776_v27  ;;  %v2062_v30 = vpop.f32.mrb[17].mxu0 }
 0x2fd   :  { %v2353_v33 = vmul.f32 %v2289_v54, %v2289_v54  ;;  %v2545_v1 = vmul.f32 %v2481_v24, %v2481_v24  ;;  %v2482_v50 = vsub.f32 %v2216_v38, %v1599_v18  ;;  %v1446_v40 = vadd.f32 %v6065_v57, %v5454_v39 }
 0x2fe   :  { %7770 = vst [vmem:[#allocation12_spill] sm:$0xff] %v6469_v22  ;;  %v2290_v55 = vsub.f32 %v2215_v35, %v7775_v25  ;;  %v1450_v11 = vadd.f32 %v6078_v48, %v5454_v39  ;;  %v2061_v18 = vadd.f32 %v2060_v36, %v5470_v44  ;;  %v2064_v35 = vpop.f32.mrb[18].mxu0  ;;  %v6501_v48 = vpop.f32.mrb[112].mxu1 }
 0x2ff   :  { %v2417_v54 = vadd.f32 %v2353_v33, %v991_v2  ;;  %v2546_v28 = vmul.f32 %v2482_v50, %v2482_v50  ;;  %v2065_v25 = vadd.f32 %v2064_v35, %v5470_v44  ;;  %v2066_v27 = vpop.f32.mrb[19].mxu0  ;;  %v1601_v2 = vmax.f32 %v1446_v40, 0.0 }
 0x300   :  { %v2354_v24 = vmul.f32 %v2290_v55, %v2290_v55  ;;  %v2217_v56 = vmax.f32 %v2061_v18, 0.0  ;;  %v2067_v57 = vadd.f32 %v2066_v27, %v5473_v4  ;;  %v1603_v55 = vmax.f32 %v1450_v11, 0.0  ;;  %v2070_v27 = vpop.f32.mrb[20].mxu0 }
 0x301   :  { %3313 = vmatmul.mubr.bf16.gmra.mrb[184].mxu1 %v7774_v7  ;;  %v6496_v38 = vadd.f32 %v2545_v1, %v2417_v54  ;;  %v2063_v7 = vadd.f32 %v2062_v30, %v5473_v4  ;;  %v2219_v0 = vmax.f32 %v2065_v25, 0.0  ;;  %v7779_v1 = vmax.f32 %v6063_v13, 0.0  ;;  %v6507_v30 = vpop.f32.mrb[113].mxu1  ;;  %v7783_v25 = vld [vmem:[#allocation47_spill] sm:$0xff] }
 0x302   :  { %3322 = vmatprep.mubr.bf16.mxu1 %v7447_v15  ;;  %v2418_v22 = vadd.f32 %v2354_v24, %v992_v51  ;;  %v2220_v54 = vmax.f32 %v2067_v57, 0.0  ;;  %v7780_v51 = vmax.f32 %v6076_v59, 0.0  ;;  %v6513_v40 = vpop.f32.mrb[114].mxu1  ;;  %v1456_v13 = vadd.f32 %v6103_v49, %v5454_v39  ;;  %v7784_v59 = vld [vmem:[#allocation48_spill] sm:$0xff] }
 0x303   :  { %7777 = vst [vmem:[#allocation39_spill] sm:$0xff] %v6496_v38  ;;  %v2218_v33 = vmax.f32 %v2063_v7, 0.0  ;;  %v2291_v36 = vsub.f32 %v2217_v56, %v7779_v1  ;;  %v6511_v18 = vpack.c.bf16 %v2219_v0, %v2217_v56  ;;  %7781 = vst [vmem:[#allocation57_spill] sm:$0xff] %v6513_v40  ;;  %v7782_v7 = vld [vmem:[#allocation85_spill] sm:$0xff]  ;;  %v6520_v57 = vpop.f32.mrb[115].mxu1  ;;  %v994_v56 = vmul.f32 %v7784_v59, %v7784_v59  ;;  %v2072_v1 = vpop.f32.mrb[21].mxu0 }
 0x304   :  { %v6503_v50 = vadd.f32 %v2546_v28, %v2418_v22  ;;  %v2292_v24 = vsub.f32 %v2219_v0, %v7780_v51  ;;  %v993_v22 = vmul.f32 %v7783_v25, %v7783_v25  ;;  %v2484_v28 = vsub.f32 %v2220_v54, %v1603_v55 }
 0x305   :  { %v2483_v35 = vsub.f32 %v2218_v33, %v1601_v2  ;;  %v2355_v11 = vmul.f32 %v2291_v36, %v2291_v36  ;;  %v2071_v33 = vadd.f32 %v2070_v27, %v5470_v44  ;;  %v1460_v51 = vadd.f32 %v6116_v23, %v5454_v39  ;;  %v2074_v36 = vpop.f32.mrb[22].mxu0 }
 0x306   :  { %7778 = vst [vmem:[#allocation82_spill] sm:$0xff] %v6503_v50  ;;  %v2356_v2 = vmul.f32 %v2292_v24, %v2292_v24  ;;  %v2548_v49 = vmul.f32 %v2484_v28, %v2484_v28  ;;  %v2073_v25 = vadd.f32 %v2072_v1, %v5473_v4  ;;  %v2075_v50 = vadd.f32 %v2074_v36, %v5470_v44  ;;  %v2076_v38 = vpop.f32.mrb[23].mxu0  ;;  %v6537_v28 = vpop.f32.mrb[116].mxu1 }
 0x307   :  { %v2547_v0 = vmul.f32 %v2483_v35, %v2483_v35  ;;  %v2221_v54 = vmax.f32 %v2071_v33, 0.0  ;;  %v1605_v40 = vmax.f32 %v1456_v13, 0.0  ;;  %v2077_v35 = vadd.f32 %v2076_v38, %v5473_v4  ;;  %v6541_v36 = vpop.f32.mrb[117].mxu1 }
 0x308   :  { %v2420_v55 = vadd.f32 %v2356_v2, %v994_v56  ;;  %v7787_v27 = vmax.f32 %v6101_v12, 0.0  ;;  %v7788_v56 = vld [vmem:[#allocation49_spill] sm:$0xff]  ;;  %v1607_v33 = vmax.f32 %v1460_v51, 0.0  ;;  %v7789_v38 = vmax.f32 %v6114_v10, 0.0  ;;  %v6547_v12 = vpop.f32.mrb[118].mxu1 }
 0x309   :  { %3323 = vmatmul.mubr.bf16.gmra.mrb[188].mxu1 %v7782_v7  ;;  %v2419_v7 = vadd.f32 %v2355_v11, %v993_v22  ;;  %v2222_v22 = vmax.f32 %v2073_v25, 0.0  ;;  %v2223_v11 = vmax.f32 %v2075_v50, 0.0  ;;  %v995_v2 = vmul.f32 %v7788_v56, %v7788_v56  ;;  %v7791_v50 = vld [vmem:[#allocation50_spill] sm:$0xff]  ;;  %v6554_v56 = vpop.f32.mrb[119].mxu1 }
 0x30a   :  { %3332 = vmatprep.mubr.bf16.mxu1 %v7447_v15  ;;  %v6533_v24 = vadd.f32 %v2548_v49, %v2420_v55  ;;  %v2293_v23 = vsub.f32 %v2221_v54, %v7787_v27  ;;  %v2224_v1 = vmax.f32 %v2077_v35, 0.0  ;;  %v7790_v55 = vld [vmem:[#allocation11_spill] sm:$0xff]  ;;  %v996_v25 = vmul.f32 %v7791_v50, %v7791_v50  ;;  %v2080_v27 = vpop.f32.mrb[24].mxu0 }
 0x30b   :  { %v6530_v59 = vadd.f32 %v2547_v0, %v2419_v7  ;;  %v2485_v0 = vsub.f32 %v2222_v22, %v1605_v40  ;;  %v2294_v7 = vsub.f32 %v2223_v11, %v7789_v38  ;;  %v6545_v49 = vpack.c.bf16 %v2223_v11, %v2221_v54  ;;  %v2082_v22 = vpop.f32.mrb[25].mxu0 }
 0x30c   :  { %7786 = vst [vmem:[#allocation40_spill] sm:$0xff] %v6533_v24  ;;  %v2357_v13 = vmul.f32 %v2293_v23, %v2293_v23  ;;  %v1466_v51 = vadd.f32 %v6141_v43, %v5454_v39  ;;  %v2486_v35 = vsub.f32 %v2224_v1, %v1607_v33  ;;  %v2081_v23 = vadd.f32 %v2080_v27, %v5470_v44 }
 0x30d   :  { %7785 = vst [vmem:[#allocation67_spill] sm:$0xff] %v6530_v59  ;;  %v2549_v40 = vmul.f32 %v2485_v0, %v2485_v0  ;;  %v2358_v54 = vmul.f32 %v2294_v7, %v2294_v7  ;;  %v1470_v11 = vadd.f32 %v6154_v20, %v5454_v39  ;;  %v2083_v1 = vadd.f32 %v2082_v22, %v5473_v4 }
 0x30e   :  { %v2421_v10 = vadd.f32 %v2357_v13, %v995_v2  ;;  %v2550_v38 = vmul.f32 %v2486_v35, %v2486_v35  ;;  %v2225_v33 = vmax.f32 %v2081_v23, 0.0  ;;  %v1609_v13 = vmax.f32 %v1466_v51, 0.0  ;;  %v6569_v35 = vpop.f32.mrb[120].mxu1  ;;  %v7796_v23 = vld [vmem:[#allocation51_spill] sm:$0xff]  ;;  %v7798_v51 = vld [vmem:[#allocation13_spill] sm:$0xff] }
 0x30f   :  { %v2422_v43 = vadd.f32 %v2358_v54, %v996_v25  ;;  %v7794_v7 = vmax.f32 %v6139_v63, 0.0  ;;  %v2226_v20 = vmax.f32 %v2083_v1, 0.0  ;;  %7795 = vst [vmem:[#allocation3_spill] sm:$0xff] %v6569_v35  ;;  %v6571_v54 = vpop.f32.mrb[121].mxu1  ;;  %v997_v22 = vmul.f32 %v7796_v23, %v7796_v23 }
 0x310   :  { %v6560_v50 = vadd.f32 %v2549_v40, %v2421_v10  ;;  %v1611_v10 = vmax.f32 %v1470_v11, 0.0  ;;  %v7799_v63 = vmax.f32 %v6152_v34, 0.0  ;;  %v1480_v34 = vadd.f32 %v6192_v47, %v5454_v39 }
 0x311   :  { %3333 = vmatmul.mubr.bf16.gmra.mrb[192].mxu1 %v7790_v55  ;;  %v2084_v55 = vpop.f32.mrb[26].mxu0  ;;  %v6565_v0 = vadd.f32 %v2550_v38, %v2422_v43  ;;  %v2295_v27 = vsub.f32 %v2225_v33, %v7794_v7 }
 0x312   :  { %3342 = vmatprep.mubr.bf16.mxu1 %v7447_v15  ;;  %7792 = vst [vmem:[#allocation14_spill] sm:$0xff] %v6560_v50  ;;  %v2086_v24 = vpop.f32.mrb[27].mxu0  ;;  %v2085_v59 = vadd.f32 %v2084_v55, %v5470_v44  ;;  %v2487_v50 = vsub.f32 %v2226_v20, %v1609_v13  ;;  %v1476_v13 = vadd.f32 %v6179_v8, %v5454_v39  ;;  %v1615_v47 = vmax.f32 %v1480_v34, 0.0 }
 0x313   :  { %v2087_v2 = vadd.f32 %v2086_v24, %v5473_v4  ;;  %7793 = vst [vmem:[#allocation41_spill] sm:$0xff] %v6565_v0  ;;  %v2359_v55 = vmul.f32 %v2295_v27, %v2295_v27  ;;  %v6575_v24 = vpop.f32.mrb[122].mxu1  ;;  %v2090_v11 = vpop.f32.mrb[28].mxu0 }
 0x314   :  { %v2227_v40 = vmax.f32 %v2085_v59, 0.0  ;;  %7797 = vst [vmem:[#allocation83_spill] sm:$0xff] %v6575_v24  ;;  %v6582_v59 = vpop.f32.mrb[123].mxu1  ;;  %v2551_v20 = vmul.f32 %v2487_v50, %v2487_v50  ;;  %v2092_v23 = vpop.f32.mrb[29].mxu0 }
 0x315   :  { %v2228_v25 = vmax.f32 %v2087_v2, 0.0  ;;  %v7800_v2 = vld [vmem:[#allocation52_spill] sm:$0xff]  ;;  %v2423_v27 = vadd.f32 %v2359_v55, %v997_v22  ;;  %v1613_v22 = vmax.f32 %v1476_v13, 0.0  ;;  %v1486_v13 = vadd.f32 %v6217_v17, %v5454_v39 }
 0x316   :  { %v2296_v38 = vsub.f32 %v2227_v40, %v7799_v63  ;;  %v6580_v43 = vpack.c.bf16 %v2227_v40, %v2225_v33  ;;  %v998_v7 = vmul.f32 %v7800_v2, %v7800_v2  ;;  %v2093_v63 = vadd.f32 %v2092_v23, %v5473_v4 }
 0x317   :  { %v2488_v1 = vsub.f32 %v2228_v25, %v1611_v10  ;;  %v2091_v10 = vadd.f32 %v2090_v11, %v5470_v44  ;;  %v2094_v25 = vpop.f32.mrb[30].mxu0  ;;  %v7804_v23 = vmax.f32 %v6190_v31, 0.0 }
 0x318   :  { %v2360_v33 = vmul.f32 %v2296_v38, %v2296_v38  ;;  %v2095_v2 = vadd.f32 %v2094_v25, %v5470_v44  ;;  %v2096_v0 = vpop.f32.mrb[31].mxu0  ;;  %v2230_v55 = vmax.f32 %v2093_v63, 0.0 }
 0x319   :  { %3343 = vmatmul.mubr.bf16.gmra.mrb[196].mxu1 %v7798_v51  ;;  %v2552_v40 = vmul.f32 %v2488_v1, %v2488_v1  ;;  %v6592_v51 = vadd.f32 %v2551_v20, %v2423_v27  ;;  %v2229_v8 = vmax.f32 %v2091_v10, 0.0  ;;  %v2097_v50 = vadd.f32 %v2096_v0, %v5473_v4 }
 0x31a   :  { %3352 = vmatprep.mubr.bf16.mxu1 %v7447_v15  ;;  %v2424_v24 = vadd.f32 %v2360_v33, %v998_v7  ;;  %v2231_v35 = vmax.f32 %v2095_v2, 0.0  ;;  %v7803_v1 = vmax.f32 %v6177_v16, 0.0  ;;  %v2489_v20 = vsub.f32 %v2230_v55, %v1613_v22  ;;  %v7805_v7 = vld [vmem:[#allocation73_spill] sm:$0xff]  ;;  %v7807_v16 = vld [vmem:[#allocation54_spill] sm:$0xff] }
 0x31b   :  { %7801 = vst [vmem:[#allocation42_spill] sm:$0xff] %v6592_v51  ;;  %v2232_v27 = vmax.f32 %v2097_v50, 0.0  ;;  %v7806_v33 = vld [vmem:[#allocation53_spill] sm:$0xff]  ;;  %v1000_v10 = vmul.f32 %v7807_v16, %v7807_v16 }
 0x31c   :  { %v6597_v38 = vadd.f32 %v2552_v40, %v2424_v24  ;;  %v2297_v11 = vsub.f32 %v2229_v8, %v7803_v1  ;;  %v2298_v51 = vsub.f32 %v2231_v35, %v7804_v23  ;;  %v6603_v25 = vpack.c.bf16 %v2231_v35, %v2229_v8  ;;  %v2100_v40 = vpop.f32.mrb[32].mxu0 }
 0x31d   :  { %v999_v0 = vmul.f32 %v7806_v33, %v7806_v33  ;;  %v2490_v34 = vsub.f32 %v2232_v27, %v1615_v47  ;;  %v2553_v31 = vmul.f32 %v2489_v20, %v2489_v20  ;;  %v2101_v35 = vadd.f32 %v2100_v40, %v5470_v44  ;;  %v2102_v2 = vpop.f32.mrb[33].mxu0  ;;  %v6617_v47 = vpop.f32.mrb[124].mxu1 }
 0x31e   :  { %7802 = vst [vmem:[#allocation15_spill] sm:$0xff] %v6597_v38  ;;  %v2361_v24 = vmul.f32 %v2297_v11, %v2297_v11  ;;  %v2362_v63 = vmul.f32 %v2298_v51, %v2298_v51  ;;  %v1490_v8 = vadd.f32 %v6230_v29, %v5454_v39  ;;  %v2103_v17 = vadd.f32 %v2102_v2, %v5473_v4  ;;  %v2104_v55 = vpop.f32.mrb[34].mxu0  ;;  %v6620_v20 = vpop.f32.mrb[125].mxu1 }
 0x31f   :  { %v2554_v22 = vmul.f32 %v2490_v34, %v2490_v34  ;;  %v2233_v11 = vmax.f32 %v2101_v35, 0.0  ;;  %v2105_v27 = vadd.f32 %v2104_v55, %v5470_v44  ;;  %v2106_v23 = vpop.f32.mrb[35].mxu0  ;;  %v1617_v51 = vmax.f32 %v1486_v13, 0.0  ;;  %v6625_v29 = vpop.f32.mrb[126].mxu1  ;;  %v7811_v35 = vld [vmem:[#allocation55_spill] sm:$0xff]  ;;  %v7814_v55 = vld [vmem:[#allocation56_spill] sm:$0xff] }
 0x320   :  { %v2425_v50 = vadd.f32 %v2361_v24, %v999_v0  ;;  %v2426_v1 = vadd.f32 %v2362_v63, %v1000_v10  ;;  %v2234_v33 = vmax.f32 %v2103_v17, 0.0  ;;  %v2107_v39 = vadd.f32 %v2106_v23, %v5473_v4  ;;  %v6631_v16 = vpop.f32.mrb[127].mxu1 }
 0x321   :  { %3353 = vmatmul.mubr.bf16.gmra.mrb[200].mxu1 %v7805_v7  ;;  %v7810_v24 = vmax.f32 %v6215_v14, 0.0  ;;  %v2235_v40 = vmax.f32 %v2105_v27, 0.0  ;;  %v1619_v44 = vmax.f32 %v1490_v8, 0.0  ;;  %v1001_v13 = vmul.f32 %v7811_v35, %v7811_v35 }
 0x322   :  { %3362 = vmatprep.mubr.bf16.mxu1 %v7447_v15  ;;  %v6622_v7 = vadd.f32 %v2553_v31, %v2425_v50  ;;  %v6627_v0 = vadd.f32 %v2554_v22, %v2426_v1  ;;  %v2491_v10 = vsub.f32 %v2234_v33, %v1617_v51  ;;  %v2236_v63 = vmax.f32 %v2107_v39, 0.0  ;;  %v7813_v22 = vld [vmem:[#allocation17_spill] sm:$0xff] }
 0x323   :  { %v2299_v34 = vsub.f32 %v2233_v11, %v7810_v24  ;;  %v7812_v2 = vmax.f32 %v6228_v6, 0.0  ;;  %v6637_v50 = vpack.c.bf16 %v2235_v40, %v2233_v11  ;;  %v1002_v8 = vmul.f32 %v7814_v55, %v7814_v55  ;;  %v7817_v6 = vld [vmem:[#allocation19_spill] sm:$0xff] }
 0x324   :  { %7808 = vst [vmem:[#allocation43_spill] sm:$0xff] %v6622_v7  ;;  %7809 = vst [vmem:[#allocation66_spill] sm:$0xff] %v6627_v0  ;;  %v2555_v17 = vmul.f32 %v2491_v10, %v2491_v10  ;;  %v2492_v14 = vsub.f32 %v2236_v63, %v1619_v44  ;;  %v7818_v44 = vld [vmem:[#allocation22_spill] sm:$0xff]  ;;  %v7819_v10 = vld [vmem:[#allocation24_spill] sm:$0xff] }
 0x325   :  { %v2363_v31 = vmul.f32 %v2299_v34, %v2299_v34  ;;  %v2300_v4 = vsub.f32 %v2235_v40, %v7812_v2  ;;  %v7820_v2 = vld [vmem:[#allocation26_spill] sm:$0xff]  ;;  %v4297_v7 = vld [vmem:[%s7337_s6 + $0x8] sm:$0xff] }
 0x326   :  { %v2556_v23 = vmul.f32 %v2492_v14, %v2492_v14 }
 0x327   :  { %v2427_v1 = vadd.f32 %v2363_v31, %v1001_v13  ;;  %v2364_v27 = vmul.f32 %v2300_v4, %v2300_v4 }
 0x329   :  { %3363 = vmatmul.mubr.bf16.gmra.mrb[204].mxu1 %v7813_v22  ;;  %v6643_v51 = vadd.f32 %v2555_v17, %v2427_v1  ;;  %v2428_v33 = vadd.f32 %v2364_v27, %v1002_v8 }
 0x32a   :  { %3372 = vmatprep.mubr.bf16.mxu1 %v7447_v15  ;;  %v6649_v11 = vpop.f32.mrb[128].mxu1 }
 0x32b   :  { %7815 = vst [vmem:[#allocation81_spill] sm:$0xff] %v6643_v51  ;;  %v6645_v39 = vadd.f32 %v2556_v23, %v2428_v33  ;;  %v6651_v24 = vpop.f32.mrb[129].mxu1 }
 0x32c   :  { %v6653_v34 = vpop.f32.mrb[130].mxu1 }
 0x32d   :  { %7816 = vst [vmem:[#allocation44_spill] sm:$0xff] %v6645_v39  ;;  %v6655_v40 = vpop.f32.mrb[131].mxu1 }
 0x331   :  { %3373 = vmatmul.mubr.bf16.gmra.mrb[208].mxu1 %v7817_v6 }
 0x332   :  { %3382 = vmatprep.mubr.bf16.mxu1 %v7447_v15 }
 0x339   :  { %3383 = vmatmul.mubr.bf16.gmra.mrb[212].mxu1 %v7818_v44 }
 0x33a   :  { %3392 = vmatprep.mubr.bf16.mxu1 %v7447_v15 }
 0x33c   :  { %v6661_v63 = vpop.f32.mrb[132].mxu1 }
 0x33d   :  { %v6663_v35 = vpop.f32.mrb[133].mxu1 }
 0x33e   :  { %v6665_v13 = vpop.f32.mrb[134].mxu1 }
 0x33f   :  { %v6667_v31 = vpop.f32.mrb[135].mxu1 }
 0x341   :  { %3393 = vmatmul.mubr.bf16.gmra.mrb[216].mxu1 %v7819_v10 }
 0x342   :  { %3402 = vmatprep.mubr.bf16.mxu1 %v7447_v15 }
 0x349   :  { %3403 = vmatmul.mubr.bf16.gmra.mrb[220].mxu1 %v7820_v2 }
 0x34a   :  { %3412 = vmatprep.mubr.bf16.mxu1 %v7447_v15 }
 0x34e   :  { %v6673_v4 = vpop.f32.mrb[136].mxu1 }
 0x34f   :  { %v6675_v22 = vpop.f32.mrb[137].mxu1 }
 0x350   :  { %v6677_v17 = vpop.f32.mrb[138].mxu1 }
 0x351   :  { %3413 = vmatmul.mubr.bf16.gmra.mrb[224].mxu1 %v6223_v60  ;;  %v6679_v14 = vpop.f32.mrb[139].mxu1 }
 0x352   :  { %3422 = vmatprep.mubr.bf16.mxu1 %v7447_v15 }
 0x359   :  { %3423 = vmatmul.mubr.bf16.gmra.mrb[228].mxu1 %v6256_v52 }
 0x35a   :  { %3432 = vmatprep.mubr.bf16.mxu1 %v7447_v15 }
 0x360   :  { %v6685_v55 = vpop.f32.mrb[140].mxu1 }
 0x361   :  { %3433 = vmatmul.mubr.bf16.gmra.mrb[232].mxu1 %v6283_v26  ;;  %v6687_v60 = vpop.f32.mrb[141].mxu1 }
 0x362   :  { %3442 = vmatprep.mubr.bf16.mxu1 %v7447_v15  ;;  %v6689_v8 = vpop.f32.mrb[142].mxu1 }
 0x363   :  { %v6691_v1 = vpop.f32.mrb[143].mxu1 }
 0x369   :  { %3443 = vmatmul.mubr.bf16.gmra.mrb[236].mxu1 %v6312_v3 }
 0x36a   :  { %3452 = vmatprep.mubr.bf16.mxu1 %v7447_v15 }
 0x371   :  { %3453 = vmatmul.mubr.bf16.gmra.mrb[240].mxu1 %v6339_v19 }
 0x372   :  { %3462 = vmatprep.mubr.bf16.mxu1 %v7447_v15  ;;  %v6697_v52 = vpop.f32.mrb[144].mxu1 }
 0x373   :  { %7821 = vst [vmem:[#allocation18_spill] sm:$0xff] %v6697_v52  ;;  %v6699_v26 = vpop.f32.mrb[145].mxu1 }
 0x374   :  { %v6701_v27 = vpop.f32.mrb[146].mxu1 }
 0x375   :  { %7822 = vst [vmem:[#allocation45_spill] sm:$0xff] %v6701_v27  ;;  %v6703_v23 = vpop.f32.mrb[147].mxu1 }
 0x376   :  { %7823 = vst [vmem:[#allocation72_spill] sm:$0xff] %v6703_v23  ;;  %v7839_v23 = vld [vmem:[#allocation91_spill] sm:$0xff] }
 0x379   :  { %3463 = vmatmul.mubr.bf16.gmra.mrb[244].mxu1 %v6368_v32  ;;  %v7828_v32 = vld [vmem:[#allocation2_spill] sm:$0xff] }
 0x37a   :  { %3472 = vmatprep.mubr.bf16.mxu1 %v7447_v15  ;;  %v3124_v2 = vsub.s32 4, %v7828_v32 }
 0x381   :  { %3473 = vmatmul.mubr.bf16.gmra.mrb[248].mxu1 %v6395_v45  ;;  %v2671_v45 = vsub.s32 3, %v7828_v32 }
 0x382   :  { %3482 = vmatprep.mubr.bf16.mxu1 %v7447_v15 }
 0x383   :  { %v6709_v3 = vpop.f32.mrb[148].mxu1 }
 0x384   :  { %7824 = vst [vmem:[#allocation46_spill] sm:$0xff] %v6709_v3  ;;  %v6711_v19 = vpop.f32.mrb[149].mxu1 }
 0x385   :  { %7825 = vst [vmem:[#allocation85_spill] sm:$0xff] %v6711_v19  ;;  %v6713_v33 = vpop.f32.mrb[150].mxu1  ;;  %v7834_v19 = vld [vmem:[#allocation104_spill] sm:$0xff] }
 0x386   :  { %7826 = vst [vmem:[#allocation47_spill] sm:$0xff] %v6713_v33  ;;  %v6715_v6 = vpop.f32.mrb[151].mxu1 }
 0x387   :  { %7827 = vst [vmem:[#allocation48_spill] sm:$0xff] %v6715_v6 }
 0x389   :  { %3483 = vmatmul.mubr.bf16.gmra.mrb[252].mxu1 %v6424_v53  ;;  %v4296_v53 = vld [vmem:[%s7337_s6] sm:$0xff] }
 0x38a   :  { %3492 = vmatprep.mubr.bf16.mxu1 %v7447_v15  ;;  %v6734_v0 = vrot.slane %v4296_v53, %v2671_v45 }
 0x38c   :  { %v2756_v32 = vadd.f32 %v6273_v42, %v6734_v0  ;;  %v2767_v27 = vadd.f32 %v7834_v19, %v6734_v0 }
 0x38e   :  { %v3010_v42 = vmax.f32 %v2756_v32, 0.0 }
 0x391   :  { %3493 = vmatmul.mubr.bf16.gmra.mrb[0].mxu1 %v6451_v37  ;;  %v6737_v37 = vrot.slane %v4296_v53, %v3124_v2 }
 0x392   :  { %3502 = vmatprep.mubr.bf16.mxu1 %v7447_v15 }
 0x394   :  { %v6722_v44 = vpop.f32.mrb[152].mxu1 }
 0x395   :  { %7829 = vst [vmem:[#allocation49_spill] sm:$0xff] %v6722_v44  ;;  %v6724_v10 = vpop.f32.mrb[153].mxu1  ;;  %v6742_v44 = vrot.slane %v4297_v7, %v3124_v2 }
 0x396   :  { %7830 = vst [vmem:[#allocation11_spill] sm:$0xff] %v6724_v10  ;;  %v6727_v39 = vpop.f32.mrb[154].mxu1 }
 0x397   :  { %7831 = vst [vmem:[#allocation50_spill] sm:$0xff] %v6727_v39  ;;  %v6729_v51 = vpop.f32.mrb[155].mxu1 }
 0x398   :  { %7832 = vst [vmem:[#allocation51_spill] sm:$0xff] %v6729_v51 }
 0x399   :  { %3503 = vmatmul.mubr.bf16.gmra.mrb[4].mxu1 %v6484_v61  ;;  %v2759_v61 = vadd.f32 %v6285_v62, %v6734_v0 }
 0x39a   :  { %3512 = vmatprep.mubr.bf16.mxu1 %v7447_v15 }
 0x39b   :  { %v3011_v62 = vmax.f32 %v2759_v61, 0.0 }
 0x39c   :  { %v3244_v39 = vpop.f32.mrb[156].mxu1 }
 0x39d   :  { %v3245_v45 = vadd.f32 %v3244_v39, %v6737_v37  ;;  %v3246_v38 = vpop.f32.mrb[157].mxu1 }
 0x39e   :  { %v3247_v53 = vadd.f32 %v3246_v38, %v6742_v44  ;;  %v3248_v51 = vpop.f32.mrb[158].mxu1 }
 0x39f   :  { %3820 = vst.msk [vmem:[%s7340_s7] sm:$0xff] %vm3819_vm1, %v3245_v45  ;;  %v3249_v7 = vadd.f32 %v3248_v51, %v6737_v37  ;;  %v3250_v2 = vpop.f32.mrb[159].mxu1  ;;  %v7833_v45 = vld [vmem:[#allocation30_spill] sm:$0xff] }
 0x3a0   :  { %v3563_v10 = vmax.f32 %v3247_v53, 0.0  ;;  %v3251_v33 = vadd.f32 %v3250_v2, %v6742_v44  ;;  %v2764_v51 = vadd.f32 %v7833_v45, %v6734_v0 }
 0x3a1   :  { %3821 = vst.msk [vmem:[%s7340_s7 + $0x8] sm:$0xff] %vm3819_vm1, %v3249_v7  ;;  %3513 = vmatmul.mubr.bf16.gmra.mrb[8].mxu1 %v6511_v18  ;;  %v7835_v7 = vld [vmem:[#allocation88_spill] sm:$0xff] }
 0x3a2   :  { %v3627_v38 = vsub.f32 %v3563_v10, %v3010_v42  ;;  %v3564_v39 = vmax.f32 %v3251_v33, 0.0  ;;  %3522 = vmatprep.mubr.bf16.mxu1 %v7447_v15 }
 0x3a4   :  { %v3691_v3 = vmul.f32 %v3627_v38, %v3627_v38  ;;  %v3628_v32 = vsub.f32 %v3564_v39, %v3011_v62  ;;  %v3254_v53 = vpop.f32.mrb[160].mxu1  ;;  %v3012_v62 = vmax.f32 %v2764_v51, 0.0  ;;  %v7836_v38 = vld [vmem:[#allocation89_spill] sm:$0xff]  ;;  %v7837_v51 = vld [vmem:[#allocation68_spill] sm:$0xff] }
 0x3a5   :  { %v3255_v2 = vadd.f32 %v3254_v53, %v6737_v37  ;;  %v3256_v6 = vpop.f32.mrb[161].mxu1 }
 0x3a6   :  { %v3755_v52 = vadd.f32 %v3691_v3, %v7835_v7  ;;  %v3692_v18 = vmul.f32 %v3628_v32, %v3628_v32  ;;  %v3257_v10 = vadd.f32 %v3256_v6, %v6742_v44  ;;  %v3258_v33 = vpop.f32.mrb[162].mxu1  ;;  %v3013_v3 = vmax.f32 %v2767_v27, 0.0 }
 0x3a7   :  { %3822 = vst.msk [vmem:[%s7340_s7 + $0x10] sm:$0xff] %vm3819_vm1, %v3255_v2  ;;  %v3259_v61 = vadd.f32 %v3258_v33, %v6737_v37  ;;  %v3260_v42 = vpop.f32.mrb[163].mxu1  ;;  %v2772_v2 = vadd.f32 %v7837_v51, %v6734_v0 }
 0x3a8   :  { %v3756_v39 = vadd.f32 %v3692_v18, %v7836_v38  ;;  %v3565_v45 = vmax.f32 %v3257_v10, 0.0  ;;  %v3261_v19 = vadd.f32 %v3260_v42, %v6742_v44  ;;  %v7838_v38 = vld [vmem:[#allocation34_spill] sm:$0xff] }
 0x3a9   :  { %3823 = vst.msk [vmem:[%s7340_s7 + $0x18] sm:$0xff] %vm3819_vm1, %v3259_v61  ;;  %3523 = vmatmul.mubr.bf16.gmra.mrb[12].mxu1 %v6545_v49  ;;  %v2775_v61 = vadd.f32 %v7838_v38, %v6734_v0 }
 0x3aa   :  { %v3884_v6 = vadd.f32 %v3756_v39, %v3755_v52  ;;  %v3629_v32 = vsub.f32 %v3565_v45, %v3012_v62  ;;  %v3566_v53 = vmax.f32 %v3261_v19, 0.0  ;;  %3532 = vmatprep.mubr.bf16.mxu1 %v7447_v15  ;;  %v3014_v39 = vmax.f32 %v2772_v2, 0.0 }
 0x3ac   :  { %v3693_v7 = vmul.f32 %v3629_v32, %v3629_v32  ;;  %v3630_v18 = vsub.f32 %v3566_v53, %v3013_v3  ;;  %v3264_v10 = vpop.f32.mrb[164].mxu1  ;;  %v7840_v32 = vld [vmem:[#allocation92_spill] sm:$0xff] }
 0x3ad   :  { %v3265_v33 = vadd.f32 %v3264_v10, %v6737_v37  ;;  %v3266_v42 = vpop.f32.mrb[165].mxu1 }
 0x3ae   :  { %v3757_v49 = vadd.f32 %v3693_v7, %v7839_v23  ;;  %v3694_v27 = vmul.f32 %v3630_v18, %v3630_v18  ;;  %v3267_v52 = vadd.f32 %v3266_v42, %v6742_v44  ;;  %v3268_v62 = vpop.f32.mrb[166].mxu1  ;;  %v3015_v23 = vmax.f32 %v2775_v61, 0.0 }
 0x3af   :  { %3824 = vst.msk [vmem:[%s7340_s7 + $0x20] sm:$0xff] %vm3819_vm1, %v3265_v33  ;;  %v3269_v45 = vadd.f32 %v3268_v62, %v6737_v37  ;;  %v3270_v19 = vpop.f32.mrb[167].mxu1  ;;  %v7842_v62 = vld [vmem:[#allocation69_spill] sm:$0xff] }
 0x3b0   :  { %v3885_v3 = vadd.f32 %v3884_v6, %v3757_v49  ;;  %v3758_v53 = vadd.f32 %v3694_v27, %v7840_v32  ;;  %v3567_v51 = vmax.f32 %v3267_v52, 0.0  ;;  %v3271_v10 = vadd.f32 %v3270_v19, %v6742_v44  ;;  %v7841_v6 = vld [vmem:[#allocation33_spill] sm:$0xff]  ;;  %v7843_v19 = vld [vmem:[#allocation94_spill] sm:$0xff] }
 0x3b1   :  { %3825 = vst.msk [vmem:[%s7340_s7 + $0x28] sm:$0xff] %vm3819_vm1, %v3269_v45  ;;  %3533 = vmatmul.mubr.bf16.gmra.mrb[16].mxu1 %v6580_v43  ;;  %v2780_v33 = vadd.f32 %v7841_v6, %v6734_v0  ;;  %v2783_v45 = vadd.f32 %v7842_v62, %v6734_v0 }
 0x3b2   :  { %v3886_v2 = vadd.f32 %v3885_v3, %v3758_v53  ;;  %v3631_v7 = vsub.f32 %v3567_v51, %v3014_v39  ;;  %v3568_v18 = vmax.f32 %v3271_v10, 0.0  ;;  %3542 = vmatprep.mubr.bf16.mxu1 %v7447_v15 }
 0x3b3   :  { %v3016_v32 = vmax.f32 %v2780_v33, 0.0  ;;  %v3017_v33 = vmax.f32 %v2783_v45, 0.0 }
 0x3b4   :  { %v3695_v42 = vmul.f32 %v3631_v7, %v3631_v7  ;;  %v3632_v38 = vsub.f32 %v3568_v18, %v3015_v23  ;;  %v3274_v49 = vpop.f32.mrb[168].mxu1  ;;  %v7844_v23 = vld [vmem:[#allocation95_spill] sm:$0xff] }
 0x3b5   :  { %v3275_v27 = vadd.f32 %v3274_v49, %v6737_v37  ;;  %v3276_v52 = vpop.f32.mrb[169].mxu1 }
 0x3b6   :  { %v3759_v43 = vadd.f32 %v3695_v42, %v7843_v19  ;;  %v3696_v61 = vmul.f32 %v3632_v38, %v3632_v38  ;;  %v3277_v39 = vadd.f32 %v3276_v52, %v6742_v44  ;;  %v3278_v3 = vpop.f32.mrb[170].mxu1 }
 0x3b7   :  { %3826 = vst.msk [vmem:[%s7340_s7 + $0x30] sm:$0xff] %vm3819_vm1, %v3275_v27  ;;  %v3279_v53 = vadd.f32 %v3278_v3, %v6737_v37  ;;  %v3280_v51 = vpop.f32.mrb[171].mxu1 }
 0x3b8   :  { %v3887_v10 = vadd.f32 %v3886_v2, %v3759_v43  ;;  %v3760_v7 = vadd.f32 %v3696_v61, %v7844_v23  ;;  %v3569_v18 = vmax.f32 %v3277_v39, 0.0  ;;  %v3281_v6 = vadd.f32 %v3280_v51, %v6742_v44  ;;  %v7845_v2 = vld [vmem:[#allocation93_spill] sm:$0xff]  ;;  %v7846_v39 = vld [vmem:[#allocation79_spill] sm:$0xff] }
 0x3b9   :  { %3827 = vst.msk [vmem:[%s7340_s7 + $0x38] sm:$0xff] %vm3819_vm1, %v3279_v53  ;;  %3543 = vmatmul.mubr.bf16.gmra.mrb[20].mxu1 %v6603_v25  ;;  %v2788_v27 = vadd.f32 %v7845_v2, %v6734_v0  ;;  %v2791_v3 = vadd.f32 %v7846_v39, %v6734_v0  ;;  %v7847_v53 = vld [vmem:[#allocation97_spill] sm:$0xff] }
 0x3ba   :  { %v3888_v42 = vadd.f32 %v3887_v10, %v3760_v7  ;;  %v3633_v38 = vsub.f32 %v3569_v18, %v3016_v32  ;;  %v3570_v49 = vmax.f32 %v3281_v6, 0.0  ;;  %3552 = vmatprep.mubr.bf16.mxu1 %v7447_v15  ;;  %v7848_v18 = vld [vmem:[#allocation98_spill] sm:$0xff] }
 0x3bb   :  { %v3018_v10 = vmax.f32 %v2788_v27, 0.0 }
 0x3bc   :  { %v3697_v52 = vmul.f32 %v3633_v38, %v3633_v38  ;;  %v3634_v62 = vsub.f32 %v3570_v49, %v3017_v33  ;;  %v3284_v19 = vpop.f32.mrb[172].mxu1  ;;  %v3019_v49 = vmax.f32 %v2791_v3, 0.0 }
 0x3bd   :  { %v3285_v43 = vadd.f32 %v3284_v19, %v6737_v37  ;;  %v3286_v61 = vpop.f32.mrb[173].mxu1 }
 0x3be   :  { %v3761_v25 = vadd.f32 %v3697_v52, %v7847_v53  ;;  %v3698_v45 = vmul.f32 %v3634_v62, %v3634_v62  ;;  %v3287_v32 = vadd.f32 %v3286_v61, %v6742_v44  ;;  %v3288_v51 = vpop.f32.mrb[174].mxu1  ;;  %v7849_v62 = vld [vmem:[#allocation75_spill] sm:$0xff] }
 0x3bf   :  { %3828 = vst.msk [vmem:[%s7340_s7 + $0x40] sm:$0xff] %vm3819_vm1, %v3285_v43  ;;  %v3289_v15 = vadd.f32 %v3288_v51, %v6737_v37  ;;  %v3290_v23 = vpop.f32.mrb[175].mxu1  ;;  %v2796_v19 = vadd.f32 %v7849_v62, %v6734_v0 }
 0x3c0   :  { %v3889_v7 = vadd.f32 %v3888_v42, %v3761_v25  ;;  %v3762_v6 = vadd.f32 %v3698_v45, %v7848_v18  ;;  %v3571_v33 = vmax.f32 %v3287_v32, 0.0  ;;  %v3291_v38 = vadd.f32 %v3290_v23, %v6742_v44  ;;  %v7850_v25 = vld [vmem:[#allocation36_spill] sm:$0xff] }
 0x3c1   :  { %3829 = vst.msk [vmem:[%s7340_s7 + $0x48] sm:$0xff] %vm3819_vm1, %v3289_v15  ;;  %3553 = vmatmul.mubr.bf16.gmra.mrb[24].mxu1 %v6637_v50  ;;  %v2799_v45 = vadd.f32 %v7850_v25, %v6734_v0  ;;  %v7851_v32 = vld [vmem:[#allocation60_spill] sm:$0xff]  ;;  %v2807_v25 = vadd.f32 %v6453_v58, %v6734_v0 }
 0x3c2   :  { %v3890_v2 = vadd.f32 %v3889_v7, %v3762_v6  ;;  %v3635_v27 = vsub.f32 %v3571_v33, %v3018_v10  ;;  %v3572_v52 = vmax.f32 %v3291_v38, 0.0  ;;  %v3020_v10 = vmax.f32 %v2796_v19, 0.0  ;;  %v7852_v6 = vld [vmem:[#allocation63_spill] sm:$0xff] }
 0x3c4   :  { %v3699_v42 = vmul.f32 %v3635_v27, %v3635_v27  ;;  %v3636_v43 = vsub.f32 %v3572_v52, %v3019_v49  ;;  %v3294_v61 = vpop.f32.mrb[176].mxu1  ;;  %v3021_v27 = vmax.f32 %v2799_v45, 0.0 }
 0x3c5   :  { %v3295_v39 = vadd.f32 %v3294_v61, %v6737_v37  ;;  %v3296_v53 = vpop.f32.mrb[177].mxu1 }
 0x3c6   :  { %v3763_v51 = vadd.f32 %v3699_v42, %v7851_v32  ;;  %v3700_v15 = vmul.f32 %v3636_v43, %v3636_v43  ;;  %v3297_v50 = vadd.f32 %v3296_v53, %v6742_v44  ;;  %v3298_v3 = vpop.f32.mrb[178].mxu1  ;;  %v2804_v42 = vadd.f32 %v6441_v9, %v6734_v0  ;;  %v7853_v32 = vld [vmem:[#allocation59_spill] sm:$0xff] }
 0x3c7   :  { %3830 = vst.msk [vmem:[%s7340_s7 + $0x50] sm:$0xff] %vm3819_vm1, %v3295_v39  ;;  %v3299_v23 = vadd.f32 %v3298_v3, %v6737_v37  ;;  %v3300_v7 = vpop.f32.mrb[179].mxu1 }
 0x3c8   :  { %v3891_v18 = vadd.f32 %v3890_v2, %v3763_v51  ;;  %v3764_v33 = vadd.f32 %v3700_v15, %v7852_v6  ;;  %v3573_v38 = vmax.f32 %v3297_v50, 0.0  ;;  %v3301_v49 = vadd.f32 %v3300_v7, %v6742_v44  ;;  %v7854_v7 = vld [vmem:[#allocation4_spill] sm:$0xff] }
 0x3c9   :  { %3831 = vst.msk [vmem:[%s7340_s7 + $0x58] sm:$0xff] %vm3819_vm1, %v3299_v23  ;;  %v3022_v3 = vmax.f32 %v2804_v42, 0.0 }
 0x3ca   :  { %v3892_v52 = vadd.f32 %v3891_v18, %v3764_v33  ;;  %v3637_v62 = vsub.f32 %v3573_v38, %v3020_v10  ;;  %v3574_v19 = vmax.f32 %v3301_v49, 0.0  ;;  %v3023_v33 = vmax.f32 %v2807_v25, 0.0 }
 0x3cc   :  { %v3701_v43 = vmul.f32 %v3637_v62, %v3637_v62  ;;  %v3638_v61 = vsub.f32 %v3574_v19, %v3021_v27  ;;  %v3304_v2 = vpop.f32.mrb[180].mxu1  ;;  %v2812_v62 = vadd.f32 %v6437_v21, %v6734_v0 }
 0x3cd   :  { %v3305_v39 = vadd.f32 %v3304_v2, %v6737_v37  ;;  %v3306_v53 = vpop.f32.mrb[181].mxu1  ;;  %v7855_v2 = vld [vmem:[#allocation9_spill] sm:$0xff] }
 0x3ce   :  { %v3765_v51 = vadd.f32 %v3701_v43, %v7853_v32  ;;  %v3702_v15 = vmul.f32 %v3638_v61, %v3638_v61  ;;  %v3307_v45 = vadd.f32 %v3306_v53, %v6742_v44  ;;  %v3308_v50 = vpop.f32.mrb[182].mxu1  ;;  %v7856_v53 = vld [vmem:[#allocation5_spill] sm:$0xff] }
 0x3cf   :  { %3832 = vst.msk [vmem:[%s7340_s7 + $0x60] sm:$0xff] %vm3819_vm1, %v3305_v39  ;;  %v3309_v9 = vadd.f32 %v3308_v50, %v6737_v37  ;;  %v3310_v10 = vpop.f32.mrb[183].mxu1  ;;  %v2815_v39 = vadd.f32 %v7855_v2, %v6734_v0 }
 0x3d0   :  { %v3893_v23 = vadd.f32 %v3892_v52, %v3765_v51  ;;  %v3766_v18 = vadd.f32 %v3702_v15, %v7854_v7  ;;  %v3575_v6 = vmax.f32 %v3307_v45, 0.0  ;;  %v3311_v58 = vadd.f32 %v3310_v10, %v6742_v44 }
 0x3d1   :  { %3833 = vst.msk [vmem:[%s7340_s7 + $0x68] sm:$0xff] %vm3819_vm1, %v3309_v9  ;;  %v3024_v45 = vmax.f32 %v2812_v62, 0.0  ;;  %v7857_v9 = vld [vmem:[#allocation65_spill] sm:$0xff] }
 0x3d2   :  { %v3894_v38 = vadd.f32 %v3893_v23, %v3766_v18  ;;  %v3639_v49 = vsub.f32 %v3575_v6, %v3022_v3  ;;  %v3576_v27 = vmax.f32 %v3311_v58, 0.0  ;;  %v3025_v18 = vmax.f32 %v2815_v39, 0.0 }
 0x3d4   :  { %v3703_v19 = vmul.f32 %v3639_v49, %v3639_v49  ;;  %v3640_v42 = vsub.f32 %v3576_v27, %v3023_v33  ;;  %v3314_v52 = vpop.f32.mrb[184].mxu1  ;;  %v2820_v49 = vadd.f32 %v6475_v46, %v6734_v0 }
 0x3d5   :  { %v3315_v43 = vadd.f32 %v3314_v52, %v6737_v37  ;;  %v3316_v61 = vpop.f32.mrb[185].mxu1  ;;  %v2823_v52 = vadd.f32 %v6486_v41, %v6734_v0 }
 0x3d6   :  { %v3767_v32 = vadd.f32 %v3703_v19, %v7856_v53  ;;  %v3704_v51 = vmul.f32 %v3640_v42, %v3640_v42  ;;  %v3317_v25 = vadd.f32 %v3316_v61, %v6742_v44  ;;  %v3318_v15 = vpop.f32.mrb[186].mxu1 }
 0x3d7   :  { %3834 = vst.msk [vmem:[%s7340_s7 + $0x70] sm:$0xff] %vm3819_vm1, %v3315_v43  ;;  %v3319_v21 = vadd.f32 %v3318_v15, %v6737_v37  ;;  %v3320_v50 = vpop.f32.mrb[187].mxu1  ;;  %v7858_v43 = vld [vmem:[#allocation71_spill] sm:$0xff]  ;;  %v7859_v15 = vld [vmem:[#allocation8_spill] sm:$0xff] }
 0x3d8   :  { %v3895_v3 = vadd.f32 %v3894_v38, %v3767_v32  ;;  %v3768_v10 = vadd.f32 %v3704_v51, %v7857_v9  ;;  %v3577_v23 = vmax.f32 %v3317_v25, 0.0  ;;  %v3321_v7 = vadd.f32 %v3320_v50, %v6742_v44 }
 0x3d9   :  { %3835 = vst.msk [vmem:[%s7340_s7 + $0x78] sm:$0xff] %vm3819_vm1, %v3319_v21  ;;  %v3026_v32 = vmax.f32 %v2820_v49, 0.0  ;;  %v3027_v50 = vmax.f32 %v2823_v52, 0.0  ;;  %v7860_v49 = vld [vmem:[#allocation58_spill] sm:$0xff] }
 0x3da   :  { %v3896_v6 = vadd.f32 %v3895_v3, %v3768_v10  ;;  %v3641_v58 = vsub.f32 %v3577_v23, %v3024_v45  ;;  %v3578_v33 = vmax.f32 %v3321_v7, 0.0  ;;  %v2828_v23 = vadd.f32 %v6473_v5, %v6734_v0 }
 0x3dc   :  { %v3705_v27 = vmul.f32 %v3641_v58, %v3641_v58  ;;  %v3642_v62 = vsub.f32 %v3578_v33, %v3025_v18  ;;  %v3324_v38 = vpop.f32.mrb[188].mxu1 }
 0x3dd   :  { %v3325_v19 = vadd.f32 %v3324_v38, %v6737_v37  ;;  %v3326_v42 = vpop.f32.mrb[189].mxu1 }
 0x3de   :  { %v3769_v61 = vadd.f32 %v3705_v27, %v7858_v43  ;;  %v3706_v2 = vmul.f32 %v3642_v62, %v3642_v62  ;;  %v3327_v39 = vadd.f32 %v3326_v42, %v6742_v44  ;;  %v3328_v53 = vpop.f32.mrb[190].mxu1  ;;  %v2831_v27 = vadd.f32 %v7860_v49, %v6734_v0  ;;  %v7861_v62 = vld [vmem:[#allocation10_spill] sm:$0xff] }
 0x3df   :  { %3836 = vst.msk [vmem:[%s7340_s7 + $0x80] sm:$0xff] %vm3819_vm1, %v3325_v19  ;;  %v3329_v46 = vadd.f32 %v3328_v53, %v6737_v37  ;;  %v3330_v51 = vpop.f32.mrb[191].mxu1  ;;  %v3028_v43 = vmax.f32 %v2828_v23, 0.0  ;;  %v2839_v23 = vadd.f32 %v6520_v57, %v6734_v0 }
 0x3e0   :  { %v3897_v25 = vadd.f32 %v3896_v6, %v3769_v61  ;;  %v3770_v45 = vadd.f32 %v3706_v2, %v7859_v15  ;;  %v3579_v21 = vmax.f32 %v3327_v39, 0.0  ;;  %v3331_v41 = vadd.f32 %v3330_v51, %v6742_v44  ;;  %v7862_v39 = vld [vmem:[#allocation84_spill] sm:$0xff] }
 0x3e1   :  { %3837 = vst.msk [vmem:[%s7340_s7 + $0x88] sm:$0xff] %vm3819_vm1, %v3329_v46  ;;  %v3029_v51 = vmax.f32 %v2831_v27, 0.0 }
 0x3e2   :  { %v3898_v3 = vadd.f32 %v3897_v25, %v3770_v45  ;;  %v3643_v9 = vsub.f32 %v3579_v21, %v3026_v32  ;;  %v3580_v10 = vmax.f32 %v3331_v41, 0.0  ;;  %v2836_v21 = vadd.f32 %v6507_v30, %v6734_v0 }
 0x3e4   :  { %v3707_v7 = vmul.f32 %v3643_v9, %v3643_v9  ;;  %v3644_v18 = vsub.f32 %v3580_v10, %v3027_v50  ;;  %v3334_v6 = vpop.f32.mrb[192].mxu1  ;;  %v3030_v49 = vmax.f32 %v2836_v21, 0.0 }
 0x3e5   :  { %v3335_v58 = vadd.f32 %v3334_v6, %v6737_v37  ;;  %v3336_v33 = vpop.f32.mrb[193].mxu1 }
 0x3e6   :  { %v3771_v38 = vadd.f32 %v3707_v7, %v7861_v62  ;;  %v3708_v19 = vmul.f32 %v3644_v18, %v3644_v18  ;;  %v3337_v42 = vadd.f32 %v3336_v33, %v6742_v44  ;;  %v3338_v52 = vpop.f32.mrb[194].mxu1  ;;  %v7863_v7 = vld [vmem:[#allocation77_spill] sm:$0xff] }
 0x3e7   :  { %3838 = vst.msk [vmem:[%s7340_s7 + $0x90] sm:$0xff] %vm3819_vm1, %v3335_v58  ;;  %v3339_v5 = vadd.f32 %v3338_v52, %v6737_v37  ;;  %v3340_v61 = vpop.f32.mrb[195].mxu1  ;;  %v3031_v52 = vmax.f32 %v2839_v23, 0.0 }
 0x3e8   :  { %v3899_v2 = vadd.f32 %v3898_v3, %v3771_v38  ;;  %v3772_v53 = vadd.f32 %v3708_v19, %v7862_v39  ;;  %v3581_v32 = vmax.f32 %v3337_v42, 0.0  ;;  %v3341_v46 = vadd.f32 %v3340_v61, %v6742_v44  ;;  %v7864_v38 = vld [vmem:[#allocation64_spill] sm:$0xff] }
 0x3e9   :  { %3839 = vst.msk [vmem:[%s7340_s7 + $0x98] sm:$0xff] %vm3819_vm1, %v3339_v5 }
 0x3ea   :  { %v3900_v25 = vadd.f32 %v3899_v2, %v3772_v53  ;;  %v3645_v15 = vsub.f32 %v3581_v32, %v3028_v43  ;;  %v3582_v45 = vmax.f32 %v3341_v46, 0.0  ;;  %v2844_v2 = vadd.f32 %v6501_v48, %v6734_v0 }
 0x3ec   :  { %v3709_v41 = vmul.f32 %v3645_v15, %v3645_v15  ;;  %v3646_v50 = vsub.f32 %v3582_v45, %v3029_v51  ;;  %v3344_v3 = vpop.f32.mrb[196].mxu1  ;;  %v7866_v45 = vld [vmem:[#allocation78_spill] sm:$0xff] }
 0x3ed   :  { %v3345_v9 = vadd.f32 %v3344_v3, %v6737_v37  ;;  %v3346_v10 = vpop.f32.mrb[197].mxu1 }
 0x3ee   :  { %v3773_v18 = vadd.f32 %v3709_v41, %v7863_v7  ;;  %v3710_v6 = vmul.f32 %v3646_v50, %v3646_v50  ;;  %v3347_v58 = vadd.f32 %v3346_v10, %v6742_v44  ;;  %v3348_v33 = vpop.f32.mrb[198].mxu1  ;;  %v7867_v7 = vld [vmem:[#allocation70_spill] sm:$0xff] }
 0x3ef   :  { %3840 = vst.msk [vmem:[%s7340_s7 + $0xa0] sm:$0xff] %vm3819_vm1, %v3345_v9  ;;  %v3349_v30 = vadd.f32 %v3348_v33, %v6737_v37  ;;  %v3350_v27 = vpop.f32.mrb[199].mxu1  ;;  %v3032_v9 = vmax.f32 %v2844_v2, 0.0 }
 0x3f0   :  { %v3901_v62 = vadd.f32 %v3900_v25, %v3773_v18  ;;  %v3774_v19 = vadd.f32 %v3710_v6, %v7864_v38  ;;  %v3583_v42 = vmax.f32 %v3347_v58, 0.0  ;;  %v3351_v57 = vadd.f32 %v3350_v27, %v6742_v44  ;;  %v7865_v25 = vld [vmem:[#allocation57_spill] sm:$0xff] }
 0x3f1   :  { %3841 = vst.msk [vmem:[%s7340_s7 + $0xa8] sm:$0xff] %vm3819_vm1, %v3349_v30  ;;  %v2847_v15 = vadd.f32 %v7865_v25, %v6734_v0  ;;  %v7869_v25 = vld [vmem:[#allocation76_spill] sm:$0xff] }
 0x3f2   :  { %v3902_v43 = vadd.f32 %v3901_v62, %v3774_v19  ;;  %v3647_v5 = vsub.f32 %v3583_v42, %v3030_v49  ;;  %v3584_v61 = vmax.f32 %v3351_v57, 0.0  ;;  %v2852_v62 = vadd.f32 %v6541_v36, %v6734_v0 }
 0x3f3   :  { %v3033_v33 = vmax.f32 %v2847_v15, 0.0 }
 0x3f4   :  { %v3711_v39 = vmul.f32 %v3647_v5, %v3647_v5  ;;  %v3648_v53 = vsub.f32 %v3584_v61, %v3031_v52  ;;  %v3354_v32 = vpop.f32.mrb[200].mxu1  ;;  %v7868_v5 = vld [vmem:[#allocation16_spill] sm:$0xff] }
 0x3f5   :  { %v3355_v46 = vadd.f32 %v3354_v32, %v6737_v37  ;;  %v3356_v51 = vpop.f32.mrb[201].mxu1  ;;  %v3034_v32 = vmax.f32 %v2852_v62, 0.0 }
 0x3f6   :  { %v3775_v21 = vadd.f32 %v3711_v39, %v7866_v45  ;;  %v3712_v41 = vmul.f32 %v3648_v53, %v3648_v53  ;;  %v3357_v50 = vadd.f32 %v3356_v51, %v6742_v44  ;;  %v3358_v3 = vpop.f32.mrb[202].mxu1 }
 0x3f7   :  { %3842 = vst.msk [vmem:[%s7340_s7 + $0xb0] sm:$0xff] %vm3819_vm1, %v3355_v46  ;;  %v3359_v48 = vadd.f32 %v3358_v3, %v6737_v37  ;;  %v3360_v10 = vpop.f32.mrb[203].mxu1 }
 0x3f8   :  { %v3903_v23 = vadd.f32 %v3902_v43, %v3775_v21  ;;  %v3776_v18 = vadd.f32 %v3712_v41, %v7867_v7  ;;  %v3585_v6 = vmax.f32 %v3357_v50, 0.0  ;;  %v3361_v58 = vadd.f32 %v3360_v10, %v6742_v44 }
 0x3f9   :  { %3843 = vst.msk [vmem:[%s7340_s7 + $0xb8] sm:$0xff] %vm3819_vm1, %v3359_v48  ;;  %v2855_v43 = vadd.f32 %v6554_v56, %v6734_v0 }
 0x3fa   :  { %v3904_v49 = vadd.f32 %v3903_v23, %v3776_v18  ;;  %v3649_v30 = vsub.f32 %v3585_v6, %v3032_v9  ;;  %v3586_v27 = vmax.f32 %v3361_v58, 0.0  ;;  %v2860_v9 = vadd.f32 %v6537_v28, %v6734_v0  ;;  %v7870_v58 = vld [vmem:[#allocation86_spill] sm:$0xff] }
 0x3fb   :  { %v3035_v21 = vmax.f32 %v2855_v43, 0.0  ;;  %v2863_v6 = vadd.f32 %v6547_v12, %v6734_v0 }
 0x3fc   :  { %v3713_v38 = vmul.f32 %v3649_v30, %v3649_v30  ;;  %v3650_v19 = vsub.f32 %v3586_v27, %v3033_v33  ;;  %v3364_v42 = vpop.f32.mrb[204].mxu1  ;;  %v3036_v62 = vmax.f32 %v2860_v9, 0.0 }
 0x3fd   :  { %v3365_v57 = vadd.f32 %v3364_v42, %v6737_v37  ;;  %v3366_v52 = vpop.f32.mrb[205].mxu1  ;;  %v7871_v42 = vld [vmem:[#allocation87_spill] sm:$0xff]  ;;  %v3037_v43 = vmax.f32 %v2863_v6, 0.0 }
 0x3fe   :  { %v3777_v61 = vadd.f32 %v3713_v38, %v7868_v5  ;;  %v3714_v2 = vmul.f32 %v3650_v19, %v3650_v19  ;;  %v3367_v39 = vadd.f32 %v3366_v52, %v6742_v44  ;;  %v3368_v53 = vpop.f32.mrb[206].mxu1 }
 0x3ff   :  { %3844 = vst.msk [vmem:[%s7340_s7 + $0xc0] sm:$0xff] %vm3819_vm1, %v3365_v57  ;;  %v3369_v36 = vadd.f32 %v3368_v53, %v6737_v37  ;;  %v3370_v46 = vpop.f32.mrb[207].mxu1 }
 0x400   :  { %v3905_v51 = vadd.f32 %v3904_v49, %v3777_v61  ;;  %v3778_v15 = vadd.f32 %v3714_v2, %v7869_v25  ;;  %v3587_v45 = vmax.f32 %v3367_v39, 0.0  ;;  %v3371_v56 = vadd.f32 %v3370_v46, %v6742_v44 }
 0x401   :  { %3845 = vst.msk [vmem:[%s7340_s7 + $0xc8] sm:$0xff] %vm3819_vm1, %v3369_v36  ;;  %v2868_v39 = vadd.f32 %v6571_v54, %v6734_v0  ;;  %v2871_v25 = vadd.f32 %v6582_v59, %v6734_v0 }
 0x402   :  { %v3906_v41 = vadd.f32 %v3905_v51, %v3778_v15  ;;  %v3651_v50 = vsub.f32 %v3587_v45, %v3034_v32  ;;  %v3588_v3 = vmax.f32 %v3371_v56, 0.0  ;;  %v7872_v15 = vld [vmem:[#allocation20_spill] sm:$0xff] }
 0x404   :  { %v3715_v48 = vmul.f32 %v3651_v50, %v3651_v50  ;;  %v3652_v10 = vsub.f32 %v3588_v3, %v3035_v21  ;;  %v3374_v23 = vpop.f32.mrb[208].mxu1  ;;  %v3038_v50 = vmax.f32 %v2868_v39, 0.0 }
 0x405   :  { %v3375_v7 = vadd.f32 %v3374_v23, %v6737_v37  ;;  %v3376_v18 = vpop.f32.mrb[209].mxu1 }
 0x406   :  { %v3779_v33 = vadd.f32 %v3715_v48, %v7870_v58  ;;  %v3716_v49 = vmul.f32 %v3652_v10, %v3652_v10  ;;  %v3377_v30 = vadd.f32 %v3376_v18, %v6742_v44  ;;  %v3378_v27 = vpop.f32.mrb[210].mxu1  ;;  %v7873_v48 = vld [vmem:[#allocation21_spill] sm:$0xff] }
 0x407   :  { %3846 = vst.msk [vmem:[%s7340_s7 + $0xd0] sm:$0xff] %vm3819_vm1, %v3375_v7  ;;  %v3379_v28 = vadd.f32 %v3378_v27, %v6737_v37  ;;  %v3380_v38 = vpop.f32.mrb[211].mxu1  ;;  %v3039_v7 = vmax.f32 %v2871_v25, 0.0 }
 0x408   :  { %v3907_v19 = vadd.f32 %v3906_v41, %v3779_v33  ;;  %v3780_v57 = vadd.f32 %v3716_v49, %v7871_v42  ;;  %v3589_v52 = vmax.f32 %v3377_v30, 0.0  ;;  %v3381_v12 = vadd.f32 %v3380_v38, %v6742_v44  ;;  %v7874_v33 = vld [vmem:[#allocation3_spill] sm:$0xff] }
 0x409   :  { %3847 = vst.msk [vmem:[%s7340_s7 + $0xd8] sm:$0xff] %vm3819_vm1, %v3379_v28  ;;  %v2876_v49 = vadd.f32 %v7874_v33, %v6734_v0 }
 0x40a   :  { %v3908_v5 = vadd.f32 %v3907_v19, %v3780_v57  ;;  %v3653_v61 = vsub.f32 %v3589_v52, %v3036_v62  ;;  %v3590_v2 = vmax.f32 %v3381_v12, 0.0  ;;  %v7875_v19 = vld [vmem:[#allocation83_spill] sm:$0xff] }
 0x40b   :  { %v2879_v42 = vadd.f32 %v7875_v19, %v6734_v0  ;;  %v7876_v57 = vld [vmem:[#allocation99_spill] sm:$0xff] }
 0x40c   :  { %v3717_v53 = vmul.f32 %v3653_v61, %v3653_v61  ;;  %v3654_v32 = vsub.f32 %v3590_v2, %v3037_v43  ;;  %v3384_v36 = vpop.f32.mrb[212].mxu1  ;;  %v3040_v61 = vmax.f32 %v2876_v49, 0.0  ;;  %v7879_v49 = vld [vmem:[#allocation25_spill] sm:$0xff] }
 0x40d   :  { %v3385_v46 = vadd.f32 %v3384_v36, %v6737_v37  ;;  %v3386_v51 = vpop.f32.mrb[213].mxu1  ;;  %v3041_v25 = vmax.f32 %v2879_v42, 0.0  ;;  %v2892_v42 = vadd.f32 %v6617_v47, %v6734_v0 }
 0x40e   :  { %v3781_v45 = vadd.f32 %v3717_v53, %v7872_v15  ;;  %v3718_v56 = vmul.f32 %v3654_v32, %v3654_v32  ;;  %v3387_v21 = vadd.f32 %v3386_v51, %v6742_v44  ;;  %v3388_v41 = vpop.f32.mrb[214].mxu1  ;;  %v7877_v32 = vld [vmem:[#allocation23_spill] sm:$0xff] }
 0x40f   :  { %3848 = vst.msk [vmem:[%s7340_s7 + $0xe0] sm:$0xff] %vm3819_vm1, %v3385_v46  ;;  %v3389_v54 = vadd.f32 %v3388_v41, %v6737_v37  ;;  %v3390_v3 = vpop.f32.mrb[215].mxu1 }
 0x410   :  { %v3909_v9 = vadd.f32 %v3908_v5, %v3781_v45  ;;  %v3782_v10 = vadd.f32 %v3718_v56, %v7873_v48  ;;  %v3591_v23 = vmax.f32 %v3387_v21, 0.0  ;;  %v3391_v59 = vadd.f32 %v3390_v3, %v6742_v44 }
 0x411   :  { %3849 = vst.msk [vmem:[%s7340_s7 + $0xe8] sm:$0xff] %vm3819_vm1, %v3389_v54  ;;  %v2884_v21 = vadd.f32 %v6620_v20, %v6734_v0  ;;  %v2887_v48 = vadd.f32 %v6631_v16, %v6734_v0 }
 0x412   :  { %v3910_v18 = vadd.f32 %v3909_v9, %v3782_v10  ;;  %v3655_v6 = vsub.f32 %v3591_v23, %v3038_v50  ;;  %v3592_v58 = vmax.f32 %v3391_v59, 0.0  ;;  %v7878_v10 = vld [vmem:[#allocation100_spill] sm:$0xff] }
 0x414   :  { %v3719_v30 = vmul.f32 %v3655_v6, %v3655_v6  ;;  %v3656_v27 = vsub.f32 %v3592_v58, %v3039_v7  ;;  %v3394_v62 = vpop.f32.mrb[216].mxu1  ;;  %v3042_v6 = vmax.f32 %v2884_v21, 0.0 }
 0x415   :  { %v3395_v28 = vadd.f32 %v3394_v62, %v6737_v37  ;;  %v3396_v38 = vpop.f32.mrb[217].mxu1  ;;  %v3043_v62 = vmax.f32 %v2887_v48, 0.0 }
 0x416   :  { %v3783_v52 = vadd.f32 %v3719_v30, %v7876_v57  ;;  %v3720_v12 = vmul.f32 %v3656_v27, %v3656_v27  ;;  %v3397_v43 = vadd.f32 %v3396_v38, %v6742_v44  ;;  %v3398_v5 = vpop.f32.mrb[218].mxu1 }
 0x417   :  { %3850 = vst.msk [vmem:[%s7340_s7 + $0xf0] sm:$0xff] %vm3819_vm1, %v3395_v28  ;;  %v3399_v2 = vadd.f32 %v3398_v5, %v6737_v37  ;;  %v3400_v39 = vpop.f32.mrb[219].mxu1 }
 0x418   :  { %v3911_v53 = vadd.f32 %v3910_v18, %v3783_v52  ;;  %v3784_v36 = vadd.f32 %v3720_v12, %v7877_v32  ;;  %v3593_v46 = vmax.f32 %v3397_v43, 0.0  ;;  %v3401_v51 = vadd.f32 %v3400_v39, %v6742_v44 }
 0x419   :  { %3851 = vst.msk [vmem:[%s7340_s7 + $0xf8] sm:$0xff] %vm3819_vm1, %v3399_v2  ;;  %v7880_v2 = vld [vmem:[#allocation101_spill] sm:$0xff] }
 0x41a   :  { %v3912_v15 = vadd.f32 %v3911_v53, %v3784_v36  ;;  %v3657_v45 = vsub.f32 %v3593_v46, %v3040_v61  ;;  %v3594_v56 = vmax.f32 %v3401_v51, 0.0  ;;  %v2895_v61 = vadd.f32 %v6625_v29, %v6734_v0 }
 0x41b   :  { %v3044_v46 = vmax.f32 %v2892_v42, 0.0 }
 0x41c   :  { %v3721_v41 = vmul.f32 %v3657_v45, %v3657_v45  ;;  %v3658_v50 = vsub.f32 %v3594_v56, %v3041_v25  ;;  %v3404_v54 = vpop.f32.mrb[220].mxu1  ;;  %v3045_v21 = vmax.f32 %v2895_v61, 0.0 }
 0x41d   :  { %v3405_v3 = vadd.f32 %v3404_v54, %v6737_v37  ;;  %v3406_v9 = vpop.f32.mrb[221].mxu1 }
 0x41e   :  { %v3785_v23 = vadd.f32 %v3721_v41, %v7878_v10  ;;  %v3722_v59 = vmul.f32 %v3658_v50, %v3658_v50  ;;  %v3407_v7 = vadd.f32 %v3406_v9, %v6742_v44  ;;  %v3408_v18 = vpop.f32.mrb[222].mxu1 }
 0x41f   :  { %3852 = vst.msk [vmem:[%s7340_s7 + $0x100] sm:$0xff] %vm3819_vm1, %v3405_v3  ;;  %v3409_v20 = vadd.f32 %v3408_v18, %v6737_v37  ;;  %v3410_v58 = vpop.f32.mrb[223].mxu1  ;;  %v2900_v3 = vadd.f32 %v6651_v24, %v6734_v0  ;;  %v7882_v18 = vld [vmem:[#allocation28_spill] sm:$0xff] }
 0x420   :  { %v3913_v33 = vadd.f32 %v3912_v15, %v3785_v23  ;;  %v3786_v30 = vadd.f32 %v3722_v59, %v7879_v49  ;;  %v3595_v27 = vmax.f32 %v3407_v7, 0.0  ;;  %v3411_v16 = vadd.f32 %v3410_v58, %v6742_v44  ;;  %v7881_v15 = vld [vmem:[#allocation27_spill] sm:$0xff] }
 0x421   :  { %3853 = vst.msk [vmem:[%s7340_s7 + $0x108] sm:$0xff] %vm3819_vm1, %v3409_v20  ;;  %v2903_v7 = vadd.f32 %v6655_v40, %v6734_v0  ;;  %v3046_v49 = vmax.f32 %v2900_v3, 0.0  ;;  %v2916_v3 = vadd.f32 %v6663_v35, %v6734_v0 }
 0x422   :  { %v3914_v28 = vadd.f32 %v3913_v33, %v3786_v30  ;;  %v3659_v38 = vsub.f32 %v3595_v27, %v3042_v6  ;;  %v3596_v19 = vmax.f32 %v3411_v16, 0.0  ;;  %v7883_v16 = vld [vmem:[#allocation102_spill] sm:$0xff] }
 0x424   :  { %v3723_v57 = vmul.f32 %v3659_v38, %v3659_v38  ;;  %v3660_v52 = vsub.f32 %v3596_v19, %v3043_v62  ;;  %v3414_v12 = vpop.f32.mrb[224].mxu1  ;;  %v3047_v38 = vmax.f32 %v2903_v7, 0.0  ;;  %v2919_v7 = vadd.f32 %v6667_v31, %v6734_v0 }
 0x425   :  { %v3415_v43 = vadd.f32 %v3414_v12, %v6737_v37  ;;  %v3416_v5 = vpop.f32.mrb[225].mxu1 }
 0x426   :  { %v3787_v39 = vadd.f32 %v3723_v57, %v7880_v2  ;;  %v3724_v53 = vmul.f32 %v3660_v52, %v3660_v52  ;;  %v3417_v32 = vadd.f32 %v3416_v5, %v6742_v44  ;;  %v3418_v36 = vpop.f32.mrb[226].mxu1  ;;  %v2908_v52 = vadd.f32 %v6649_v11, %v6734_v0 }
 0x427   :  { %3854 = vst.msk [vmem:[%s7340_s7 + $0x110] sm:$0xff] %vm3819_vm1, %v3415_v43  ;;  %v3419_v47 = vadd.f32 %v3418_v36, %v6737_v37  ;;  %v3420_v51 = vpop.f32.mrb[227].mxu1 }
 0x428   :  { %v3915_v25 = vadd.f32 %v3914_v28, %v3787_v39  ;;  %v3788_v45 = vadd.f32 %v3724_v53, %v7881_v15  ;;  %v3597_v56 = vmax.f32 %v3417_v32, 0.0  ;;  %v3421_v29 = vadd.f32 %v3420_v51, %v6742_v44  ;;  %v7884_v53 = vld [vmem:[#allocation29_spill] sm:$0xff] }
 0x429   :  { %3855 = vst.msk [vmem:[%s7340_s7 + $0x118] sm:$0xff] %vm3819_vm1, %v3419_v47  ;;  %v2911_v39 = vadd.f32 %v6653_v34, %v6734_v0  ;;  %v3048_v51 = vmax.f32 %v2908_v52, 0.0 }
 0x42a   :  { %v3916_v41 = vadd.f32 %v3915_v25, %v3788_v45  ;;  %v3661_v50 = vsub.f32 %v3597_v56, %v3044_v46  ;;  %v3598_v54 = vmax.f32 %v3421_v29, 0.0  ;;  %v7885_v45 = vld [vmem:[#allocation103_spill] sm:$0xff] }
 0x42c   :  { %v3725_v9 = vmul.f32 %v3661_v50, %v3661_v50  ;;  %v3662_v48 = vsub.f32 %v3598_v54, %v3045_v21  ;;  %v3424_v10 = vpop.f32.mrb[228].mxu1  ;;  %v3049_v21 = vmax.f32 %v2911_v39, 0.0 }
 0x42d   :  { %v3425_v23 = vadd.f32 %v3424_v10, %v6737_v37  ;;  %v3426_v59 = vpop.f32.mrb[229].mxu1 }
 0x42e   :  { %v3789_v6 = vadd.f32 %v3725_v9, %v7882_v18  ;;  %v3726_v20 = vmul.f32 %v3662_v48, %v3662_v48  ;;  %v3427_v58 = vadd.f32 %v3426_v59, %v6742_v44  ;;  %v3428_v33 = vpop.f32.mrb[230].mxu1  ;;  %v7886_v18 = vld [vmem:[#allocation31_spill] sm:$0xff] }
 0x42f   :  { %3856 = vst.msk [vmem:[%s7340_s7 + $0x120] sm:$0xff] %vm3819_vm1, %v3425_v23  ;;  %v3429_v24 = vadd.f32 %v3428_v33, %v6737_v37  ;;  %v3430_v30 = vpop.f32.mrb[231].mxu1 }
 0x430   :  { %v3917_v27 = vadd.f32 %v3916_v41, %v3789_v6  ;;  %v3790_v62 = vadd.f32 %v3726_v20, %v7883_v16  ;;  %v3599_v28 = vmax.f32 %v3427_v58, 0.0  ;;  %v3431_v40 = vadd.f32 %v3430_v30, %v6742_v44 }
 0x431   :  { %3857 = vst.msk [vmem:[%s7340_s7 + $0x128] sm:$0xff] %vm3819_vm1, %v3429_v24 }
 0x432   :  { %v3918_v19 = vadd.f32 %v3917_v27, %v3790_v62  ;;  %v3663_v42 = vsub.f32 %v3599_v28, %v3046_v49  ;;  %v3600_v57 = vmax.f32 %v3431_v40, 0.0  ;;  %v3050_v49 = vmax.f32 %v2916_v3, 0.0  ;;  %v7887_v27 = vld [vmem:[#allocation32_spill] sm:$0xff] }
 0x433   :  { %v3051_v28 = vmax.f32 %v2919_v7, 0.0 }
 0x434   :  { %v3727_v12 = vmul.f32 %v3663_v42, %v3663_v42  ;;  %v3664_v43 = vsub.f32 %v3600_v57, %v3047_v38  ;;  %v3434_v5 = vpop.f32.mrb[232].mxu1  ;;  %v2924_v42 = vadd.f32 %v6661_v63, %v6734_v0 }
 0x435   :  { %v3435_v61 = vadd.f32 %v3434_v5, %v6737_v37  ;;  %v3436_v2 = vpop.f32.mrb[233].mxu1 }
 0x436   :  { %v3791_v32 = vadd.f32 %v3727_v12, %v7884_v53  ;;  %v3728_v36 = vmul.f32 %v3664_v43, %v3664_v43  ;;  %v3437_v46 = vadd.f32 %v3436_v2, %v6742_v44  ;;  %v3438_v47 = vpop.f32.mrb[234].mxu1  ;;  %v7888_v2 = vld [vmem:[#allocation62_spill] sm:$0xff] }
 0x437   :  { %3858 = vst.msk [vmem:[%s7340_s7 + $0x130] sm:$0xff] %vm3819_vm1, %v3435_v61  ;;  %v3439_v11 = vadd.f32 %v3438_v47, %v6737_v37  ;;  %v3440_v25 = vpop.f32.mrb[235].mxu1  ;;  %v2927_v61 = vadd.f32 %v6665_v13, %v6734_v0 }
 0x438   :  { %v3919_v15 = vadd.f32 %v3918_v19, %v3791_v32  ;;  %v3792_v56 = vadd.f32 %v3728_v36, %v7885_v45  ;;  %v3601_v29 = vmax.f32 %v3437_v46, 0.0  ;;  %v3441_v34 = vadd.f32 %v3440_v25, %v6742_v44 }
 0x439   :  { %3859 = vst.msk [vmem:[%s7340_s7 + $0x138] sm:$0xff] %vm3819_vm1, %v3439_v11  ;;  %v3052_v46 = vmax.f32 %v2924_v42, 0.0  ;;  %v7889_v11 = vld [vmem:[#allocation90_spill] sm:$0xff]  ;;  %v3053_v45 = vmax.f32 %v2927_v61, 0.0  ;;  %v2943_v42 = vadd.f32 %v6677_v17, %v6734_v0 }
 0x43a   :  { %v3920_v41 = vadd.f32 %v3919_v15, %v3792_v56  ;;  %v3665_v50 = vsub.f32 %v3601_v29, %v3048_v51  ;;  %v3602_v54 = vmax.f32 %v3441_v34, 0.0 }
 0x43c   :  { %v3729_v9 = vmul.f32 %v3665_v50, %v3665_v50  ;;  %v3666_v48 = vsub.f32 %v3602_v54, %v3049_v21  ;;  %v3444_v10 = vpop.f32.mrb[236].mxu1  ;;  %v2932_v21 = vadd.f32 %v6675_v22, %v6734_v0 }
 0x43d   :  { %v3445_v23 = vadd.f32 %v3444_v10, %v6737_v37  ;;  %v3446_v59 = vpop.f32.mrb[237].mxu1  ;;  %v7890_v10 = vld [vmem:[#allocation7_spill] sm:$0xff] }
 0x43e   :  { %v3793_v6 = vadd.f32 %v3729_v9, %v7886_v18  ;;  %v3730_v20 = vmul.f32 %v3666_v48, %v3666_v48  ;;  %v3447_v58 = vadd.f32 %v3446_v59, %v6742_v44  ;;  %v3448_v33 = vpop.f32.mrb[238].mxu1  ;;  %v2935_v48 = vadd.f32 %v6679_v14, %v6734_v0 }
 0x43f   :  { %3860 = vst.msk [vmem:[%s7340_s7 + $0x140] sm:$0xff] %vm3819_vm1, %v3445_v23  ;;  %v3449_v35 = vadd.f32 %v3448_v33, %v6737_v37  ;;  %v3450_v24 = vpop.f32.mrb[239].mxu1  ;;  %v7891_v33 = vld [vmem:[#allocation6_spill] sm:$0xff] }
 0x440   :  { %v3921_v30 = vadd.f32 %v3920_v41, %v3793_v6  ;;  %v3794_v16 = vadd.f32 %v3730_v20, %v7887_v27  ;;  %v3603_v62 = vmax.f32 %v3447_v58, 0.0  ;;  %v3451_v31 = vadd.f32 %v3450_v24, %v6742_v44 }
 0x441   :  { %3861 = vst.msk [vmem:[%s7340_s7 + $0x148] sm:$0xff] %vm3819_vm1, %v3449_v35  ;;  %v3054_v6 = vmax.f32 %v2932_v21, 0.0  ;;  %v3055_v24 = vmax.f32 %v2935_v48, 0.0 }
 0x442   :  { %v3922_v40 = vadd.f32 %v3921_v30, %v3794_v16  ;;  %v3667_v38 = vsub.f32 %v3603_v62, %v3050_v49  ;;  %v3604_v19 = vmax.f32 %v3451_v31, 0.0  ;;  %v2940_v62 = vadd.f32 %v6673_v4, %v6734_v0 }
 0x444   :  { %v3731_v57 = vmul.f32 %v3667_v38, %v3667_v38  ;;  %v3668_v52 = vsub.f32 %v3604_v19, %v3051_v28  ;;  %v3454_v12 = vpop.f32.mrb[240].mxu1  ;;  %v3056_v61 = vmax.f32 %v2940_v62, 0.0 }
 0x445   :  { %v3455_v43 = vadd.f32 %v3454_v12, %v6737_v37  ;;  %v3456_v5 = vpop.f32.mrb[241].mxu1 }
 0x446   :  { %v3795_v39 = vadd.f32 %v3731_v57, %v7888_v2  ;;  %v3732_v53 = vmul.f32 %v3668_v52, %v3668_v52  ;;  %v3457_v32 = vadd.f32 %v3456_v5, %v6742_v44  ;;  %v3458_v36 = vpop.f32.mrb[242].mxu1  ;;  %v7892_v57 = vld [vmem:[#allocation35_spill] sm:$0xff] }
 0x447   :  { %3862 = vst.msk [vmem:[%s7340_s7 + $0x150] sm:$0xff] %vm3819_vm1, %v3455_v43  ;;  %v3459_v63 = vadd.f32 %v3458_v36, %v6737_v37  ;;  %v3460_v47 = vpop.f32.mrb[243].mxu1 }
 0x448   :  { %v3923_v51 = vadd.f32 %v3922_v40, %v3795_v39  ;;  %v3796_v25 = vadd.f32 %v3732_v53, %v7889_v11  ;;  %v3605_v15 = vmax.f32 %v3457_v32, 0.0  ;;  %v3461_v13 = vadd.f32 %v3460_v47, %v6742_v44  ;;  %v7893_v53 = vld [vmem:[#allocation80_spill] sm:$0xff] }
 0x449   :  { %3863 = vst.msk [vmem:[%s7340_s7 + $0x158] sm:$0xff] %vm3819_vm1, %v3459_v63  ;;  %v2948_v11 = vadd.f32 %v6687_v60, %v6734_v0 }
 0x44a   :  { %v3924_v56 = vadd.f32 %v3923_v51, %v3796_v25  ;;  %v3669_v29 = vsub.f32 %v3605_v15, %v3052_v46  ;;  %v3606_v34 = vmax.f32 %v3461_v13, 0.0  ;;  %v3057_v46 = vmax.f32 %v2943_v42, 0.0 }
 0x44c   :  { %v3733_v41 = vmul.f32 %v3669_v29, %v3669_v29  ;;  %v3670_v50 = vsub.f32 %v3606_v34, %v3053_v45  ;;  %v3464_v54 = vpop.f32.mrb[244].mxu1  ;;  %v2951_v29 = vadd.f32 %v6691_v1, %v6734_v0  ;;  %v7894_v34 = vld [vmem:[#allocation74_spill] sm:$0xff] }
 0x44d   :  { %v3465_v3 = vadd.f32 %v3464_v54, %v6737_v37  ;;  %v3466_v9 = vpop.f32.mrb[245].mxu1 }
 0x44e   :  { %v3797_v23 = vadd.f32 %v3733_v41, %v7890_v10  ;;  %v3734_v59 = vmul.f32 %v3670_v50, %v3670_v50  ;;  %v3467_v7 = vadd.f32 %v3466_v9, %v6742_v44  ;;  %v3468_v18 = vpop.f32.mrb[246].mxu1  ;;  %v7895_v10 = vld [vmem:[#allocation37_spill] sm:$0xff] }
 0x44f   :  { %3864 = vst.msk [vmem:[%s7340_s7 + $0x160] sm:$0xff] %vm3819_vm1, %v3465_v3  ;;  %v3469_v22 = vadd.f32 %v3468_v18, %v6737_v37  ;;  %v3470_v20 = vpop.f32.mrb[247].mxu1  ;;  %v3058_v3 = vmax.f32 %v2948_v11, 0.0 }
 0x450   :  { %v3925_v58 = vadd.f32 %v3924_v56, %v3797_v23  ;;  %v3798_v49 = vadd.f32 %v3734_v59, %v7891_v33  ;;  %v3607_v35 = vmax.f32 %v3467_v7, 0.0  ;;  %v3471_v14 = vadd.f32 %v3470_v20, %v6742_v44 }
 0x451   :  { %3865 = vst.msk [vmem:[%s7340_s7 + $0x168] sm:$0xff] %vm3819_vm1, %v3469_v22  ;;  %v3059_v7 = vmax.f32 %v2951_v29, 0.0  ;;  %v2956_v20 = vadd.f32 %v6685_v55, %v6734_v0 }
 0x452   :  { %v3926_v30 = vadd.f32 %v3925_v58, %v3798_v49  ;;  %v3671_v27 = vsub.f32 %v3607_v35, %v3054_v6  ;;  %v3608_v16 = vmax.f32 %v3471_v14, 0.0 }
 0x454   :  { %v3735_v31 = vmul.f32 %v3671_v27, %v3671_v27  ;;  %v3672_v28 = vsub.f32 %v3608_v16, %v3055_v24  ;;  %v3474_v40 = vpop.f32.mrb[248].mxu1  ;;  %v2959_v24 = vadd.f32 %v6689_v8, %v6734_v0 }
 0x455   :  { %v3475_v38 = vadd.f32 %v3474_v40, %v6737_v37  ;;  %v3476_v19 = vpop.f32.mrb[249].mxu1 }
 0x456   :  { %v3799_v52 = vadd.f32 %v3735_v31, %v7892_v57  ;;  %v3736_v12 = vmul.f32 %v3672_v28, %v3672_v28  ;;  %v3477_v43 = vadd.f32 %v3476_v19, %v6742_v44  ;;  %v3478_v5 = vpop.f32.mrb[250].mxu1  ;;  %v3060_v28 = vmax.f32 %v2956_v20, 0.0  ;;  %v7897_v19 = vld [vmem:[#allocation96_spill] sm:$0xff] }
 0x457   :  { %3866 = vst.msk [vmem:[%s7340_s7 + $0x170] sm:$0xff] %vm3819_vm1, %v3475_v38  ;;  %v3479_v4 = vadd.f32 %v3478_v5, %v6737_v37  ;;  %v3480_v2 = vpop.f32.mrb[251].mxu1 }
 0x458   :  { %v3927_v39 = vadd.f32 %v3926_v30, %v3799_v52  ;;  %v3800_v32 = vadd.f32 %v3736_v12, %v7893_v53  ;;  %v3609_v36 = vmax.f32 %v3477_v43, 0.0  ;;  %v3481_v17 = vadd.f32 %v3480_v2, %v6742_v44  ;;  %v7896_v30 = vld [vmem:[#allocation61_spill] sm:$0xff] }
 0x459   :  { %3867 = vst.msk [vmem:[%s7340_s7 + $0x178] sm:$0xff] %vm3819_vm1, %v3479_v4  ;;  %v3061_v52 = vmax.f32 %v2959_v24, 0.0  ;;  %v7904_v24 = vld [vmem:[#allocation82_spill] sm:$0xff] }
 0x45a   :  { %v3928_v63 = vadd.f32 %v3927_v39, %v3800_v32  ;;  %v3673_v47 = vsub.f32 %v3609_v36, %v3056_v61  ;;  %v3610_v51 = vmax.f32 %v3481_v17, 0.0  ;;  %v2964_v61 = vadd.f32 %v6699_v26, %v6734_v0  ;;  %v7898_v36 = vld [vmem:[#allocation72_spill] sm:$0xff] }
 0x45b   :  { %v2967_v17 = vadd.f32 %v7898_v36, %v6734_v0 }
 0x45c   :  { %v3737_v25 = vmul.f32 %v3673_v47, %v3673_v47  ;;  %v3674_v15 = vsub.f32 %v3610_v51, %v3057_v46  ;;  %v3484_v13 = vpop.f32.mrb[252].mxu1  ;;  %v7899_v46 = vld [vmem:[#allocation38_spill] sm:$0xff] }
 0x45d   :  { %v3485_v45 = vadd.f32 %v3484_v13, %v6737_v37  ;;  %v3486_v56 = vpop.f32.mrb[253].mxu1 }
 0x45e   :  { %v3801_v21 = vadd.f32 %v3737_v25, %v7894_v34  ;;  %v3738_v41 = vmul.f32 %v3674_v15, %v3674_v15  ;;  %v3487_v50 = vadd.f32 %v3486_v56, %v6742_v44  ;;  %v3488_v54 = vpop.f32.mrb[254].mxu1  ;;  %v3062_v25 = vmax.f32 %v2964_v61, 0.0 }
 0x45f   :  { %3868 = vst.msk [vmem:[%s7340_s7 + $0x180] sm:$0xff] %vm3819_vm1, %v3485_v45  ;;  %v3489_v60 = vadd.f32 %v3488_v54, %v6737_v37  ;;  %v3490_v9 = vpop.f32.mrb[255].mxu1  ;;  %v7900_v45 = vld [vmem:[#allocation12_spill] sm:$0xff] }
 0x460   :  { %v3929_v48 = vadd.f32 %v3928_v63, %v3801_v21  ;;  %v3802_v23 = vadd.f32 %v3738_v41, %v7895_v10  ;;  %v3611_v59 = vmax.f32 %v3487_v50, 0.0  ;;  %v3491_v1 = vadd.f32 %v3490_v9, %v6742_v44 }
 0x461   :  { %3869 = vst.msk [vmem:[%s7340_s7 + $0x188] sm:$0xff] %vm3819_vm1, %v3489_v60  ;;  %v3063_v21 = vmax.f32 %v2967_v17, 0.0 }
 0x462   :  { %v3930_v18 = vadd.f32 %v3929_v48, %v3802_v23  ;;  %v3675_v6 = vsub.f32 %v3611_v59, %v3058_v3  ;;  %v3612_v22 = vmax.f32 %v3491_v1, 0.0  ;;  %v7901_v3 = vld [vmem:[#allocation18_spill] sm:$0xff]  ;;  %v7902_v1 = vld [vmem:[#allocation45_spill] sm:$0xff] }
 0x463   :  { %v2972_v60 = vadd.f32 %v7901_v3, %v6734_v0  ;;  %v7911_v3 = vld [vmem:[#allocation14_spill] sm:$0xff] }
 0x464   :  { %v3739_v58 = vmul.f32 %v3675_v6, %v3675_v6  ;;  %v3676_v33 = vsub.f32 %v3612_v22, %v3059_v7  ;;  %v3494_v49 = vpop.f32.mrb[0].mxu1  ;;  %v2975_v7 = vadd.f32 %v7902_v1, %v6734_v0 }
 0x465   :  { %v3495_v35 = vadd.f32 %v3494_v49, %v6737_v37  ;;  %v3496_v14 = vpop.f32.mrb[1].mxu1 }
 0x466   :  { %v3803_v27 = vadd.f32 %v3739_v58, %v7896_v30  ;;  %v3740_v16 = vmul.f32 %v3676_v33, %v3676_v33  ;;  %v3497_v62 = vadd.f32 %v3496_v14, %v6742_v44  ;;  %v3498_v31 = vpop.f32.mrb[2].mxu1  ;;  %v3064_v33 = vmax.f32 %v2972_v60, 0.0 }
 0x467   :  { %3870 = vst.msk [vmem:[%s7340_s7 + $0x190] sm:$0xff] %vm3819_vm1, %v3495_v35  ;;  %v3499_v55 = vadd.f32 %v3498_v31, %v6737_v37  ;;  %v3500_v40 = vpop.f32.mrb[3].mxu1 }
 0x468   :  { %v3931_v38 = vadd.f32 %v3930_v18, %v3803_v27  ;;  %v3804_v42 = vadd.f32 %v3740_v16, %v7897_v19  ;;  %v3613_v57 = vmax.f32 %v3497_v62, 0.0  ;;  %v3501_v8 = vadd.f32 %v3500_v40, %v6742_v44  ;;  %v7903_v18 = vld [vmem:[#allocation39_spill] sm:$0xff]  ;;  %v7905_v40 = vld [vmem:[#allocation85_spill] sm:$0xff] }
 0x469   :  { %3871 = vst.msk [vmem:[%s7340_s7 + $0x198] sm:$0xff] %vm3819_vm1, %v3499_v55  ;;  %v3065_v62 = vmax.f32 %v2975_v7, 0.0 }
 0x46a   :  { %v3932_v12 = vadd.f32 %v3931_v38, %v3804_v42  ;;  %v3677_v43 = vsub.f32 %v3613_v57, %v3060_v28  ;;  %v3614_v5 = vmax.f32 %v3501_v8, 0.0  ;;  %v2980_v38 = vadd.f32 %v7905_v40, %v6734_v0  ;;  %v7915_v40 = vld [vmem:[#allocation42_spill] sm:$0xff] }
 0x46c   :  { %v3741_v4 = vmul.f32 %v3677_v43, %v3677_v43  ;;  %v3678_v2 = vsub.f32 %v3614_v5, %v3061_v52  ;;  %v3504_v39 = vpop.f32.mrb[4].mxu1  ;;  %v7907_v5 = vld [vmem:[#allocation67_spill] sm:$0xff] }
 0x46d   :  { %v3505_v53 = vadd.f32 %v3504_v39, %v6737_v37  ;;  %v3506_v32 = vpop.f32.mrb[5].mxu1 }
 0x46e   :  { %v3805_v63 = vadd.f32 %v3741_v4, %v7899_v46  ;;  %v3742_v47 = vmul.f32 %v3678_v2, %v3678_v2  ;;  %v3507_v51 = vadd.f32 %v3506_v32, %v6742_v44  ;;  %v3508_v11 = vpop.f32.mrb[6].mxu1  ;;  %v7908_v46 = vld [vmem:[#allocation40_spill] sm:$0xff] }
 0x46f   :  { %3872 = vst.msk [vmem:[%s7340_s7 + $0x1a0] sm:$0xff] %vm3819_vm1, %v3505_v53  ;;  %v3509_v26 = vadd.f32 %v3508_v11, %v6737_v37  ;;  %v3510_v15 = vpop.f32.mrb[7].mxu1  ;;  %v3066_v53 = vmax.f32 %v2980_v38, 0.0 }
 0x470   :  { %v3933_v13 = vadd.f32 %v3932_v12, %v3805_v63  ;;  %v3806_v56 = vadd.f32 %v3742_v47, %v7900_v45  ;;  %v3615_v29 = vmax.f32 %v3507_v51, 0.0  ;;  %v3511_v34 = vadd.f32 %v3510_v15, %v6742_v44  ;;  %v7906_v12 = vld [vmem:[#allocation48_spill] sm:$0xff] }
 0x471   :  { %3873 = vst.msk [vmem:[%s7340_s7 + $0x1a8] sm:$0xff] %vm3819_vm1, %v3509_v26  ;;  %v2983_v43 = vadd.f32 %v7906_v12, %v6734_v0 }
 0x472   :  { %v3934_v41 = vadd.f32 %v3933_v13, %v3806_v56  ;;  %v3679_v50 = vsub.f32 %v3615_v29, %v3062_v25  ;;  %v3616_v54 = vmax.f32 %v3511_v34, 0.0  ;;  %v7909_v13 = vld [vmem:[#allocation46_spill] sm:$0xff] }
 0x473   :  { %v3067_v11 = vmax.f32 %v2983_v43, 0.0  ;;  %v2988_v45 = vadd.f32 %v7909_v13, %v6734_v0  ;;  %v7919_v13 = vld [vmem:[#allocation43_spill] sm:$0xff] }
 0x474   :  { %v3743_v9 = vmul.f32 %v3679_v50, %v3679_v50  ;;  %v3680_v48 = vsub.f32 %v3616_v54, %v3063_v21  ;;  %v3514_v10 = vpop.f32.mrb[8].mxu1  ;;  %v7910_v50 = vld [vmem:[#allocation47_spill] sm:$0xff] }
 0x475   :  { %v3515_v23 = vadd.f32 %v3514_v10, %v6737_v37  ;;  %v3516_v59 = vpop.f32.mrb[9].mxu1  ;;  %v2991_v54 = vadd.f32 %v7910_v50, %v6734_v0 }
 0x476   :  { %v3807_v6 = vadd.f32 %v3743_v9, %v7903_v18  ;;  %v3744_v22 = vmul.f32 %v3680_v48, %v3680_v48  ;;  %v3517_v20 = vadd.f32 %v3516_v59, %v6742_v44  ;;  %v3518_v58 = vpop.f32.mrb[10].mxu1  ;;  %v7912_v18 = vld [vmem:[#allocation41_spill] sm:$0xff] }
 0x477   :  { %3874 = vst.msk [vmem:[%s7340_s7 + $0x1b0] sm:$0xff] %vm3819_vm1, %v3515_v23  ;;  %v3519_v49 = vadd.f32 %v3518_v58, %v6737_v37  ;;  %v3520_v35 = vpop.f32.mrb[11].mxu1  ;;  %v3068_v23 = vmax.f32 %v2988_v45, 0.0  ;;  %v3069_v58 = vmax.f32 %v2991_v54, 0.0 }
 0x478   :  { %v3935_v14 = vadd.f32 %v3934_v41, %v3807_v6  ;;  %v3808_v30 = vadd.f32 %v3744_v22, %v7904_v24  ;;  %v3617_v27 = vmax.f32 %v3517_v20, 0.0  ;;  %v3521_v16 = vadd.f32 %v3520_v35, %v6742_v44 }
 0x479   :  { %3875 = vst.msk [vmem:[%s7340_s7 + $0x1b8] sm:$0xff] %vm3819_vm1, %v3519_v49 }
 0x47a   :  { %v3936_v31 = vadd.f32 %v3935_v14, %v3808_v30  ;;  %v3681_v28 = vsub.f32 %v3617_v27, %v3064_v33  ;;  %v3618_v55 = vmax.f32 %v3521_v16, 0.0  ;;  %v7913_v14 = vld [vmem:[#allocation11_spill] sm:$0xff] }
 0x47b   :  { %v2996_v24 = vadd.f32 %v7913_v14, %v6734_v0 }
 0x47c   :  { %v3745_v19 = vmul.f32 %v3681_v28, %v3681_v28  ;;  %v3682_v42 = vsub.f32 %v3618_v55, %v3065_v62  ;;  %v3524_v57 = vpop.f32.mrb[12].mxu1  ;;  %v7914_v28 = vld [vmem:[#allocation51_spill] sm:$0xff] }
 0x47d   :  { %v3525_v8 = vadd.f32 %v3524_v57, %v6737_v37  ;;  %v3526_v52 = vpop.f32.mrb[13].mxu1  ;;  %v2999_v55 = vadd.f32 %v7914_v28, %v6734_v0 }
 0x47e   :  { %v3809_v61 = vadd.f32 %v3745_v19, %v7907_v5  ;;  %v3746_v4 = vmul.f32 %v3682_v42, %v3682_v42  ;;  %v3527_v2 = vadd.f32 %v3526_v52, %v6742_v44  ;;  %v3528_v39 = vpop.f32.mrb[14].mxu1  ;;  %v7916_v5 = vld [vmem:[#allocation15_spill] sm:$0xff] }
 0x47f   :  { %3876 = vst.msk [vmem:[%s7340_s7 + $0x1c0] sm:$0xff] %vm3819_vm1, %v3525_v8  ;;  %v3529_v32 = vadd.f32 %v3528_v39, %v6737_v37  ;;  %v3530_v36 = vpop.f32.mrb[15].mxu1  ;;  %v3070_v8 = vmax.f32 %v2996_v24, 0.0  ;;  %v3071_v39 = vmax.f32 %v2999_v55, 0.0 }
 0x480   :  { %v3937_v17 = vadd.f32 %v3936_v31, %v3809_v61  ;;  %v3810_v63 = vadd.f32 %v3746_v4, %v7908_v46  ;;  %v3619_v47 = vmax.f32 %v3527_v2, 0.0  ;;  %v3531_v51 = vadd.f32 %v3530_v36, %v6742_v44 }
 0x481   :  { %3877 = vst.msk [vmem:[%s7340_s7 + $0x1c8] sm:$0xff] %vm3819_vm1, %v3529_v32 }
 0x482   :  { %v3938_v25 = vadd.f32 %v3937_v17, %v3810_v63  ;;  %v3683_v26 = vsub.f32 %v3619_v47, %v3066_v53  ;;  %v3620_v15 = vmax.f32 %v3531_v51, 0.0  ;;  %v7917_v17 = vld [vmem:[#allocation49_spill] sm:$0xff] }
 0x483   :  { %v3004_v46 = vadd.f32 %v7917_v17, %v6734_v0 }
 0x484   :  { %v3747_v56 = vmul.f32 %v3683_v26, %v3683_v26  ;;  %v3684_v29 = vsub.f32 %v3620_v15, %v3067_v11  ;;  %v3534_v34 = vpop.f32.mrb[16].mxu1  ;;  %v7918_v26 = vld [vmem:[#allocation50_spill] sm:$0xff] }
 0x485   :  { %v3535_v21 = vadd.f32 %v3534_v34, %v6737_v37  ;;  %v3536_v41 = vpop.f32.mrb[17].mxu1  ;;  %v3007_v15 = vadd.f32 %v7918_v26, %v6734_v0 }
 0x486   :  { %v3811_v60 = vadd.f32 %v3747_v56, %v7911_v3  ;;  %v3748_v9 = vmul.f32 %v3684_v29, %v3684_v29  ;;  %v3537_v48 = vadd.f32 %v3536_v41, %v6742_v44  ;;  %v3538_v10 = vpop.f32.mrb[18].mxu1  ;;  %v7920_v3 = vld [vmem:[#allocation66_spill] sm:$0xff] }
 0x487   :  { %3878 = vst.msk [vmem:[%s7340_s7 + $0x1d0] sm:$0xff] %vm3819_vm1, %v3535_v21  ;;  %v3539_v59 = vadd.f32 %v3538_v10, %v6737_v37  ;;  %v3540_v1 = vpop.f32.mrb[19].mxu1  ;;  %v3072_v21 = vmax.f32 %v3004_v46, 0.0 }
 0x488   :  { %v3939_v7 = vadd.f32 %v3938_v25, %v3811_v60  ;;  %v3812_v6 = vadd.f32 %v3748_v9, %v7912_v18  ;;  %v3621_v22 = vmax.f32 %v3537_v48, 0.0  ;;  %v3541_v20 = vadd.f32 %v3540_v1, %v6742_v44  ;;  %v7921_v18 = vld [vmem:[#allocation81_spill] sm:$0xff] }
 0x489   :  { %3879 = vst.msk [vmem:[%s7340_s7 + $0x1d8] sm:$0xff] %vm3819_vm1, %v3539_v59  ;;  %v3073_v48 = vmax.f32 %v3007_v15, 0.0 }
 0x48a   :  { %v3940_v33 = vadd.f32 %v3939_v7, %v3812_v6  ;;  %v3685_v49 = vsub.f32 %v3621_v22, %v3068_v23  ;;  %v3622_v35 = vmax.f32 %v3541_v20, 0.0  ;;  %v7922_v20 = vld [vmem:[#allocation44_spill] sm:$0xff] }
 0x48c   :  { %v3749_v30 = vmul.f32 %v3685_v49, %v3685_v49  ;;  %v3686_v27 = vsub.f32 %v3622_v35, %v3069_v58  ;;  %v3544_v16 = vpop.f32.mrb[20].mxu1 }
 0x48d   :  { %v3545_v62 = vadd.f32 %v3544_v16, %v6737_v37  ;;  %v3546_v31 = vpop.f32.mrb[21].mxu1 }
 0x48e   :  { %v3813_v38 = vadd.f32 %v3749_v30, %v7915_v40  ;;  %v3750_v19 = vmul.f32 %v3686_v27, %v3686_v27  ;;  %v3547_v42 = vadd.f32 %v3546_v31, %v6742_v44  ;;  %v3548_v57 = vpop.f32.mrb[22].mxu1 }
 0x48f   :  { %3880 = vst.msk [vmem:[%s7340_s7 + $0x1e0] sm:$0xff] %vm3819_vm1, %v3545_v62  ;;  %v3549_v52 = vadd.f32 %v3548_v57, %v6737_v37  ;;  %v3550_v12 = vpop.f32.mrb[23].mxu1 }
 0x490   :  { %v3941_v43 = vadd.f32 %v3940_v33, %v3813_v38  ;;  %v3814_v61 = vadd.f32 %v3750_v19, %v7916_v5  ;;  %v3623_v4 = vmax.f32 %v3547_v42, 0.0  ;;  %v3551_v2 = vadd.f32 %v3550_v12, %v6742_v44 }
 0x491   :  { %3881 = vst.msk [vmem:[%s7340_s7 + $0x1e8] sm:$0xff] %vm3819_vm1, %v3549_v52 }
 0x492   :  { %v3942_v53 = vadd.f32 %v3941_v43, %v3814_v61  ;;  %v3687_v32 = vsub.f32 %v3623_v4, %v3070_v8  ;;  %v3624_v36 = vmax.f32 %v3551_v2, 0.0 }
 0x494   :  { %v3751_v63 = vmul.f32 %v3687_v32, %v3687_v32  ;;  %v3688_v47 = vsub.f32 %v3624_v36, %v3071_v39  ;;  %v3554_v51 = vpop.f32.mrb[24].mxu1 }
 0x495   :  { %v3555_v11 = vadd.f32 %v3554_v51, %v6737_v37  ;;  %v3556_v25 = vpop.f32.mrb[25].mxu1 }
 0x496   :  { %v3815_v45 = vadd.f32 %v3751_v63, %v7919_v13  ;;  %v3752_v56 = vmul.f32 %v3688_v47, %v3688_v47  ;;  %v3557_v29 = vadd.f32 %v3556_v25, %v6742_v44  ;;  %v3558_v34 = vpop.f32.mrb[26].mxu1 }
 0x497   :  { %3882 = vst.msk [vmem:[%s7340_s7 + $0x1f0] sm:$0xff] %vm3819_vm1, %v3555_v11  ;;  %v3559_v41 = vadd.f32 %v3558_v34, %v6737_v37  ;;  %v3560_v50 = vpop.f32.mrb[27].mxu1 }
 0x498   :  { %v3943_v54 = vadd.f32 %v3942_v53, %v3815_v45  ;;  %v3816_v60 = vadd.f32 %v3752_v56, %v7920_v3  ;;  %v3625_v9 = vmax.f32 %v3557_v29, 0.0  ;;  %v3561_v0 = vadd.f32 %v3560_v50, %v6742_v44 }
 0x499   :  { %3883 = vst.msk [vmem:[%s7340_s7 + $0x1f8] sm:$0xff] %vm3819_vm1, %v3559_v41 }
 0x49a   :  { %v3944_v10 = vadd.f32 %v3943_v54, %v3816_v60  ;;  %v3689_v23 = vsub.f32 %v3625_v9, %v3072_v21  ;;  %v3626_v59 = vmax.f32 %v3561_v0, 0.0 }
 0x49c   :  { %v3753_v1 = vmul.f32 %v3689_v23, %v3689_v23  ;;  %v3690_v7 = vsub.f32 %v3626_v59, %v3073_v48 }
 0x49e   :  { %v3817_v37 = vadd.f32 %v3753_v1, %v7921_v18  ;;  %v3754_v6 = vmul.f32 %v3690_v7, %v3690_v7 }
 0x4a0   :  { %v3945_v22 = vadd.f32 %v3944_v10, %v3817_v37  ;;  %v3818_v58 = vadd.f32 %v3754_v6, %v7922_v20 }
 0x4a2   :  { %v3946_v33 = vadd.f32 %v3945_v22, %v3818_v58 }
 0x4a4   :  { %3947 = vst [vmem:[%s7341_s8] sm:$0xff] %v3946_v33 }

</bundles_post_ra>
